<compile_context>
chip_gen: v7x
topology: tpu7x:2x2x1
jax: 0.10.0
libtpu: 0.0.40
codegen_flags: <defaults>
</compile_context>

<pallas_src>
import functools
import math

import jax
import jax.numpy as jnp
from jax.experimental import pallas as pl
from jax.experimental.pallas import tpu as pltpu

F32 = jnp.float32
EPS = 1e-5


# ----------------------------- Pallas helpers ------------------------------

def _whole_spec(shape):
    n = len(shape)
    return pl.BlockSpec(shape, lambda i, _n=n: (0,) * _n)


def _run(kernel, inputs, out_shape):
    """Single-block pallas_call: every operand/result is one whole-array VMEM block."""
    if isinstance(out_shape, (tuple, list)):
        out_specs = [_whole_spec(o.shape) for o in out_shape]
        out_shape = tuple(out_shape)
    else:
        out_specs = _whole_spec(out_shape.shape)
    return pl.pallas_call(
        kernel,
        out_shape=out_shape,
        grid=(1,),
        in_specs=[_whole_spec(a.shape) for a in inputs],
        out_specs=out_specs,
        compiler_params=pltpu.CompilerParams(dimension_semantics=("arbitrary",)),
    )(*inputs)


def _activate(y, act):
    if act == "relu":
        return jnp.maximum(y, 0.0)
    if act == "gelu":  # exact erf-based GELU == torch.nn.functional.gelu
        return 0.5 * y * (1.0 + jax.lax.erf(y * (1.0 / math.sqrt(2.0))))
    return y


def _layernorm(y, g, b):
    mu = jnp.mean(y, axis=-1, keepdims=True)
    yc = y - mu
    var = jnp.mean(yc * yc, axis=-1, keepdims=True)
    return yc * jax.lax.rsqrt(var + EPS) * g + b


# ------------------------------ Pallas kernels ------------------------------

def _linear_kernel(x_ref, w_ref, b_ref, o_ref, *, act):
    y = jnp.dot(x_ref[...], w_ref[...], preferred_element_type=F32) + b_ref[...]
    o_ref[...] = _activate(y, act)


def _linear_add_kernel(x_ref, w_ref, b_ref, a_ref, o_ref, *, act):
    y = jnp.dot(x_ref[...], w_ref[...], preferred_element_type=F32) + b_ref[...]
    o_ref[...] = _activate(y + a_ref[...], act)


def _qkv_kernel(xq_ref, xkv_ref, wq_ref, bq_ref, wkv_ref, bkv_ref, q_ref, kv_ref):
    # Fused Q projection and (K|V) projection: two MXU matmuls in one launch.
    q_ref[...] = jnp.dot(xq_ref[...], wq_ref[...], preferred_element_type=F32) + bq_ref[...]
    kv_ref[...] = jnp.dot(xkv_ref[...], wkv_ref[...], preferred_element_type=F32) + bkv_ref[...]


def _attn_kernel(q_ref, k_ref, v_ref, o_ref, *, scale, causal):
    # Batched attention over all (batch*head) in ONE grid step.
    q = q_ref[...]            # (BH, L, Dh)
    k = k_ref[...]            # (BH, S, Dh)
    v = v_ref[...]            # (BH, S, Dh)
    s = jnp.einsum("bld,bsd->bls", q, k, preferred_element_type=F32) * scale
    if causal:
        L, S = s.shape[1], s.shape[2]
        row = jax.lax.broadcasted_iota(jnp.int32, (L, S), 0)
        col = jax.lax.broadcasted_iota(jnp.int32, (L, S), 1)
        s = jnp.where((col > row)[None, :, :], -jnp.inf, s)
    m = jnp.max(s, axis=-1, keepdims=True)
    p = jnp.exp(s - m)                              # exp -> EUP slot
    l = jnp.sum(p, axis=-1, keepdims=True)
    p = p * pl.reciprocal(l, approx=True)           # EUP reciprocal, no VALU divide
    o_ref[...] = jnp.einsum("bls,bsd->bld", p, v,
                            preferred_element_type=F32).astype(o_ref.dtype)


def _proj_res_ln_kernel(x_ref, res_ref, w_ref, b_ref, g_ref, bb_ref, o_ref):
    # Attention out-projection + residual add + LayerNorm, fused.
    y = jnp.dot(x_ref[...], w_ref[...], preferred_element_type=F32) + b_ref[...]
    o_ref[...] = _layernorm(y + res_ref[...], g_ref[...], bb_ref[...])


def _ffn_res_ln_kernel(x_ref, w1_ref, b1_ref, w2_ref, b2_ref, g_ref, bb_ref, o_ref, *, act):
    # Conv1d(k=1) -> act -> Conv1d(k=1) -> +residual -> LayerNorm, fused.
    x = x_ref[...]
    h = jnp.dot(x, w1_ref[...], preferred_element_type=F32) + b1_ref[...]
    h = _activate(h, act)
    y = jnp.dot(h, w2_ref[...], preferred_element_type=F32) + b2_ref[...]
    o_ref[...] = _layernorm(x + y, g_ref[...], bb_ref[...])


def _conv_bn_elu_kernel(p_ref, w_ref, b_ref, g_ref, bb_ref, o_ref):
    # Circular Conv1d(k=3) as matmul on im2col patches + BatchNorm(batch stats) + ELU.
    y = jnp.dot(p_ref[...], w_ref[...], preferred_element_type=F32) + b_ref[...]
    mu = jnp.mean(y, axis=0, keepdims=True)
    var = jnp.mean((y - mu) * (y - mu), axis=0, keepdims=True)
    y = (y - mu) * jax.lax.rsqrt(var + EPS) * g_ref[...] + bb_ref[...]
    o_ref[...] = jnp.where(y > 0, y, jnp.exp(y) - 1.0)      # ELU(alpha=1)


def _ln_kernel(x_ref, g_ref, b_ref, o_ref):
    o_ref[...] = _layernorm(x_ref[...], g_ref[...], b_ref[...])


def _ln_linear_kernel(x_ref, g_ref, b_ref, w_ref, wb_ref, o_ref):
    # Final decoder LayerNorm + output projection, fused.
    xn = _layernorm(x_ref[...], g_ref[...], b_ref[...])
    o_ref[...] = jnp.dot(xn, w_ref[...], preferred_element_type=F32) + wb_ref[...]


# ------------------------------ JAX glue ------------------------------------

def pallas_linear(x, w, b=None, act="none", add=None):
    M, K = x.shape
    N = w.shape[1]
    b2 = (jnp.zeros((N,), F32) if b is None else b).reshape(1, N)
    out = jax.ShapeDtypeStruct((M, N), F32)
    if add is None:
        return _run(functools.partial(_linear_kernel, act=act), (x, w, b2), out)
    return _run(functools.partial(_linear_add_kernel, act=act), (x, w, b2, add), out)


def layernorm_bl(x, g, b):
    B, L, D = x.shape
    y = _run(_ln_kernel, (x.reshape(B * L, D), g.reshape(1, D), b.reshape(1, D)),
             jax.ShapeDtypeStruct((B * L, D), F32))
    return y.reshape(B, L, D)


def attention_block(xq, xkv, p, ln_g, ln_b, n_heads, causal, mix):
    """AttentionLayer + residual + LayerNorm in 3 pallas_calls."""
    B, L, D = xq.shape
    S = xkv.shape[1]
    H, Dh = n_heads, D // n_heads

    q2, kv2 = _run(
        _qkv_kernel,
        (xq.reshape(B * L, D), xkv.reshape(B * S, D),
         p["wq"], p["bq"].reshape(1, D), p["wkv"], p["bkv"].reshape(1, 2 * D)),
        (jax.ShapeDtypeStruct((B * L, D), F32),
         jax.ShapeDtypeStruct((B * S, 2 * D), F32)))

    q = q2.reshape(B, L, H, Dh).transpose(0, 2, 1, 3).reshape(B * H, L, Dh)
    k = kv2[:, :D].reshape(B, S, H, Dh).transpose(0, 2, 1, 3).reshape(B * H, S, Dh)
    v = kv2[:, D:].reshape(B, S, H, Dh).transpose(0, 2, 1, 3).reshape(B * H, S, Dh)

    o = _run(functools.partial(_attn_kernel, scale=1.0 / math.sqrt(Dh), causal=causal),
             (q, k, v), jax.ShapeDtypeStruct((B * H, L, Dh), F32))

    if mix:
        # AttentionLayer(mix=True): (B,H,L,Dh).contiguous().view(B, L, H*Dh)
        o2 = o.reshape(B, H, L, Dh).reshape(B, L, D)
    else:
        o2 = o.reshape(B, H, L, Dh).transpose(0, 2, 1, 3).reshape(B, L, D)

    y = _run(_proj_res_ln_kernel,
             (o2.reshape(B * L, D), xq.reshape(B * L, D),
              p["wo"], p["bo"].reshape(1, D), ln_g.reshape(1, D), ln_b.reshape(1, D)),
             jax.ShapeDtypeStruct((B * L, D), F32))
    return y.reshape(B, L, D)


def ffn_block(x, p, act, ln_g, ln_b):
    B, L, D = x.shape
    d_ff = p["w1"].shape[1]
    y = _run(functools.partial(_ffn_res_ln_kernel, act=act),
             (x.reshape(B * L, D), p["w1"], p["b1"].reshape(1, d_ff),
              p["w2"], p["b2"].reshape(1, D), ln_g.reshape(1, D), ln_b.reshape(1, D)),
             jax.ShapeDtypeStruct((B * L, D), F32))
    return y.reshape(B, L, D)


def conv_layer(x, p):
    # ConvLayer: circular Conv1d(k=3, pad=2) -> BatchNorm1d -> ELU -> MaxPool1d(3,2,1)
    B, L, C = x.shape
    # im2col patches for output position j use x[(j-2)%L], x[(j-1)%L], x[j%L]
    # (slice+concat instead of an advanced-index gather).
    a = jnp.concatenate([x[:, -2:, :], x], axis=1)
    b = jnp.concatenate([x[:, -1:, :], x, x[:, :1, :]], axis=1)
    c = jnp.concatenate([x, x[:, :2, :]], axis=1)
    patches = jnp.concatenate([a, b, c], axis=-1)            # (B, L+2, 3C)
    Lc = L + 2
    # TODO(synk): BatchNorm uses training-mode batch statistics (PyTorch default
    # module state, biased variance); MaxPool stays in plain JAX (strided slices).
    y = _run(_conv_bn_elu_kernel,
             (patches.reshape(B * Lc, 3 * C), p["w"], p["b"].reshape(1, C),
              p["bn_g"].reshape(1, C), p["bn_b"].reshape(1, C)),
             jax.ShapeDtypeStruct((B * Lc, C), F32)).reshape(B, Lc, C)
    neg = jnp.full((B, 1, C), -jnp.inf, F32)
    yp = jnp.concatenate([neg, y, neg], axis=1)              # pad=1 with -inf
    Lo = (Lc + 2 - 3) // 2 + 1
    w0 = yp[:, 0:2 * Lo - 1:2, :]
    w1 = yp[:, 1:2 * Lo:2, :]
    w2 = yp[:, 2:2 * Lo + 1:2, :]
    return jnp.maximum(jnp.maximum(w0, w1), w2)


def sinusoid_table(n, d_model):
    pos = jnp.arange(n, dtype=F32)[:, None]
    div = jnp.exp(jnp.arange(0, d_model, 2, dtype=F32) * (-math.log(10000.0) / d_model))
    tbl = jnp.zeros((n, d_model), F32)
    tbl = tbl.at[:, 0::2].set(jnp.sin(pos * div))
    tbl = tbl.at[:, 1::2].set(jnp.cos(pos * div))
    return tbl


def data_embedding(x, x_mark, w_token, tables, d_model):
    # TokenEmbedding: Conv1d(c_in, d_model, k=3, pad=1, circular, bias=False)
    # as (t-1, t, t+1 mod L) patch gather + Pallas matmul, with the positional +
    # temporal embedding fused into the matmul epilogue.
    B, L, C = x.shape
    patches = jnp.concatenate(
        [jnp.roll(x, 1, axis=1), x, jnp.roll(x, -1, axis=1)], axis=-1)
    xm = x_mark.astype(jnp.int32)
    temporal = (tables["month"][xm[..., 0]] + tables["day"][xm[..., 1]]
                + tables["weekday"][xm[..., 2]] + tables["hour"][xm[..., 3]])
    add = (temporal + tables["pos"][:L][None, :, :]).reshape(B * L, d_model)
    val = pallas_linear(patches.reshape(B * L, 3 * C), w_token, None, add=add)
    return val.reshape(B, L, d_model)


def informer_forward(params, x_enc, x_mark_enc, x_dec, x_mark_dec, cfg):
    d_model, H, act = cfg["d_model"], cfg["n_heads"], cfg["activation"]
    tables = params["tables"]

    enc = data_embedding(x_enc, x_mark_enc, params["enc_emb_w"], tables, d_model)
    for i in range(cfg["e_layers"] - 1):                     # distil=True path
        lp = params["enc_layers"][i]
        enc = attention_block(enc, enc, lp["attn"], lp["ln1_g"], lp["ln1_b"], H,
                              causal=False, mix=False)
        enc = ffn_block(enc, lp, act, lp["ln2_g"], lp["ln2_b"])
        enc = conv_layer(enc, params["conv_layers"][i])
    lp = params["enc_layers"][-1]
    enc = attention_block(enc, enc, lp["attn"], lp["ln1_g"], lp["ln1_b"], H,
                          causal=False, mix=False)
    enc = ffn_block(enc, lp, act, lp["ln2_g"], lp["ln2_b"])
    enc = layernorm_bl(enc, params["enc_norm_g"], params["enc_norm_b"])

    dec = data_embedding(x_dec, x_mark_dec, params["dec_emb_w"], tables, d_model)
    for i in range(cfg["d_layers"]):
        lp = params["dec_layers"][i]
        dec = attention_block(dec, dec, lp["self_attn"], lp["ln1_g"], lp["ln1_b"], H,
                              causal=True, mix=True)
        dec = attention_block(dec, enc, lp["cross_attn"], lp["ln2_g"], lp["ln2_b"], H,
                              causal=False, mix=False)
        dec = ffn_block(dec, lp, act, lp["ln3_g"], lp["ln3_b"])

    # decoder final LayerNorm + projection fused into one kernel
    B, Ld, _ = dec.shape
    out = _run(_ln_linear_kernel,
               (dec.reshape(B * Ld, d_model),
                params["dec_norm_g"].reshape(1, d_model),
                params["dec_norm_b"].reshape(1, d_model),
                params["proj_w"], params["proj_b"].reshape(1, cfg["c_out"])),
               jax.ShapeDtypeStruct((B * Ld, cfg["c_out"]), F32))
    out = out.reshape(B, Ld, cfg["c_out"])
    return out[:, -cfg["pred_len"]:, :]


# --------------------------- parameter init ---------------------------------

class KeyGen:
    def __init__(self, key):
        self.key, self.i = key, 0

    def __call__(self):
        self.i += 1
        return jax.random.fold_in(self.key, self.i)


def _init_linear(key, fan_in, fan_out):
    w = jax.random.normal(key, (fan_in, fan_out), F32) * 0.02
    return w, jnp.zeros((fan_out,), F32)


def init_params(key, cfg):
    d_model, d_ff = cfg["d_model"], cfg["d_ff"]
    kg = KeyGen(key)

    def attn_params():
        p = {}
        p["wq"], p["bq"] = _init_linear(kg(), d_model, d_model)
        p["wkv"], p["bkv"] = _init_linear(kg(), d_model, 2 * d_model)   # fused K|V
        p["wo"], p["bo"] = _init_linear(kg(), d_model, d_model)
        return p

    params = {
        "enc_emb_w": jax.random.normal(kg(), (3 * cfg["enc_in"], d_model)) * 0.02,
        "dec_emb_w": jax.random.normal(kg(), (3 * cfg["dec_in"], d_model)) * 0.02,
        "enc_layers": [], "conv_layers": [], "dec_layers": [],
    }
    ones, zeros = jnp.ones((d_model,), F32), jnp.zeros((d_model,), F32)
    for _ in range(cfg["e_layers"]):
        lp = {"attn": attn_params()}
        lp["w1"], lp["b1"] = _init_linear(kg(), d_model, d_ff)
        lp["w2"], lp["b2"] = _init_linear(kg(), d_ff, d_model)
        lp["ln1_g"], lp["ln1_b"] = ones, zeros
        lp["ln2_g"], lp["ln2_b"] = ones, zeros
        params["enc_layers"].append(lp)
    for _ in range(cfg["e_layers"] - 1):
        cw, cb = _init_linear(kg(), 3 * d_model, d_model)
        params["conv_layers"].append({"w": cw, "b": cb, "bn_g": ones, "bn_b": zeros})
    params["enc_norm_g"], params["enc_norm_b"] = ones, zeros
    for _ in range(cfg["d_layers"]):
        lp = {"self_attn": attn_params(), "cross_attn": attn_params()}
        lp["w1"], lp["b1"] = _init_linear(kg(), d_model, d_ff)
        lp["w2"], lp["b2"] = _init_linear(kg(), d_ff, d_model)
        lp["ln1_g"], lp["ln1_b"] = ones, zeros
        lp["ln2_g"], lp["ln2_b"] = ones, zeros
        lp["ln3_g"], lp["ln3_b"] = ones, zeros
        params["dec_layers"].append(lp)
    params["dec_norm_g"], params["dec_norm_b"] = ones, zeros
    params["proj_w"], params["proj_b"] = _init_linear(kg(), d_model, cfg["c_out"])

    # hoisted sinusoid tables (fixed, non-learned): computed once, reused per call
    max_len = max(cfg["seq_len"], cfg["label_len"] + cfg["pred_len"])
    params["tables"] = {
        "pos": sinusoid_table(max_len, d_model),
        "month": sinusoid_table(13, d_model),
        "day": sinusoid_table(32, d_model),
        "weekday": sinusoid_table(7, d_model),
        "hour": sinusoid_table(24, d_model),
    }
    return params


# ------------------------------- main ----------------------------------------

if __name__ == "__main__":
    cfg = dict(enc_in=4, dec_in=4, c_out=4, seq_len=8, label_len=4, pred_len=4,
               d_model=32, n_heads=4, e_layers=2, d_layers=1, d_ff=32,
               activation="gelu")
    key = jax.random.PRNGKey(0)
    kp, k1, k2, k3, k4 = jax.random.split(key, 5)
    params = init_params(kp, cfg)

    B = 2
    dec_len = cfg["label_len"] + cfg["pred_len"]
    x_enc = jax.random.normal(k1, (B, cfg["seq_len"], cfg["enc_in"]), F32)
    x_dec = jax.random.normal(k2, (B, dec_len, cfg["dec_in"]), F32)

    def make_marks(k, L):
        km, kd, kw, kh = jax.random.split(k, 4)
        cols = [jax.random.randint(km, (B, L, 1), 0, 13),   # month
                jax.random.randint(kd, (B, L, 1), 0, 32),   # day
                jax.random.randint(kw, (B, L, 1), 0, 7),    # weekday
                jax.random.randint(kh, (B, L, 1), 0, 24)]   # hour
        return jnp.concatenate(cols, axis=-1).astype(jnp.int32)

    x_mark_enc = make_marks(k3, cfg["seq_len"])
    x_mark_dec = make_marks(k4, dec_len)

    forward = jax.jit(functools.partial(informer_forward, cfg=cfg))
    out = forward(params, x_enc, x_mark_enc, x_dec, x_mark_dec)
    out = jax.block_until_ready(out)
    assert out.shape == (B, cfg["pred_len"], cfg["c_out"]), out.shape
    assert bool(jnp.all(jnp.isfinite(out)))
    print("KERNEL_OK")
</pallas_src>

<mosaic_0001>
module attributes {stable_mosaic.version = 11 : i64} {
  func.func @_linear_add_kernel(%arg0: i32, %arg1: memref<16x12xf32, #tpu.memory_space<vmem>>, %arg2: memref<12x32xf32, #tpu.memory_space<vmem>>, %arg3: memref<1x32xf32, #tpu.memory_space<vmem>>, %arg4: memref<16x32xf32, #tpu.memory_space<vmem>>, %arg5: memref<16x32xf32, #tpu.memory_space<vmem>>) attributes {dimension_semantics = [#tpu.dimension_semantics<arbitrary>], iteration_bounds = array<i64: 1>, scalar_prefetch = 0 : i64, scratch_operands = 0 : i64, tpu.core_type = #tpu.core_type<tc>, window_params = [{pipeline_mode = #tpu.pipeline_mode<synchronous>, transform_indices = @transform_0, window_bounds = array<i64: 16, 12>}, {pipeline_mode = #tpu.pipeline_mode<synchronous>, transform_indices = @transform_1, window_bounds = array<i64: 12, 32>}, {pipeline_mode = #tpu.pipeline_mode<synchronous>, transform_indices = @transform_2, window_bounds = array<i64: 1, 32>}, {pipeline_mode = #tpu.pipeline_mode<synchronous>, transform_indices = @transform_3, window_bounds = array<i64: 16, 32>}, {pipeline_mode = #tpu.pipeline_mode<synchronous>, transform_indices = @transform_4, window_bounds = array<i64: 16, 32>}]} {
    %c0 = arith.constant 0 : index
    %c0_0 = arith.constant 0 : index
    %0 = vector.load %arg1[%c0, %c0_0] : memref<16x12xf32, #tpu.memory_space<vmem>>, vector<16x12xf32>
    %c0_1 = arith.constant 0 : index
    %c0_2 = arith.constant 0 : index
    %1 = vector.load %arg2[%c0_1, %c0_2] : memref<12x32xf32, #tpu.memory_space<vmem>>, vector<12x32xf32>
    %cst = arith.constant dense<0.000000e+00> : vector<16x32xf32>
    %2 = tpu.matmul %0, %1, %cst {dimension_numbers = #tpu.dot_dimension_numbers<[1], [0], [0], [1], [0, 0, 1, 1], [], []>} : vector<16x12xf32>, vector<12x32xf32>, vector<16x32xf32> -> vector<16x32xf32>
    %c0_3 = arith.constant 0 : index
    %c0_4 = arith.constant 0 : index
    %3 = vector.load %arg3[%c0_3, %c0_4] : memref<1x32xf32, #tpu.memory_space<vmem>>, vector<1x32xf32>
    %4 = vector.broadcast %3 : vector<1x32xf32> to vector<16x32xf32>
    %5 = arith.addf %2, %4 : vector<16x32xf32>
    %c0_5 = arith.constant 0 : index
    %c0_6 = arith.constant 0 : index
    %6 = vector.load %arg4[%c0_5, %c0_6] : memref<16x32xf32, #tpu.memory_space<vmem>>, vector<16x32xf32>
    %7 = arith.addf %5, %6 : vector<16x32xf32>
    %c0_7 = arith.constant 0 : index
    %c0_8 = arith.constant 0 : index
    %8 = vector.load %arg5[%c0_7, %c0_8] : memref<16x32xf32, #tpu.memory_space<vmem>>, vector<16x32xf32>
    tpu.vector_store %arg5[%c0_7, %c0_8], %7 {strides = array<i32>} : memref<16x32xf32, #tpu.memory_space<vmem>>, vector<16x32xf32>,
    return
  }
  func.func @transform_0(%arg0: i32) -> (i32, i32) {
    %c0_i32 = arith.constant 0 : i32
    %c0_i32_0 = arith.constant 0 : i32
    %c0_i32_1 = arith.constant 0 : i32
    return %c0_i32, %c0_i32_0 : i32, i32
  }
  func.func @transform_1(%arg0: i32) -> (i32, i32) {
    %c0_i32 = arith.constant 0 : i32
    %c0_i32_0 = arith.constant 0 : i32
    %c0_i32_1 = arith.constant 0 : i32
    return %c0_i32, %c0_i32_0 : i32, i32
  }
  func.func @transform_2(%arg0: i32) -> (i32, i32) {
    %c0_i32 = arith.constant 0 : i32
    %c0_i32_0 = arith.constant 0 : i32
    %c0_i32_1 = arith.constant 0 : i32
    return %c0_i32, %c0_i32_0 : i32, i32
  }
  func.func @transform_3(%arg0: i32) -> (i32, i32) {
    %c0_i32 = arith.constant 0 : i32
    %c0_i32_0 = arith.constant 0 : i32
    %c0_i32_1 = arith.constant 0 : i32
    return %c0_i32, %c0_i32_0 : i32, i32
  }
  func.func @transform_4(%arg0: i32) -> (i32, i32) {
    %c0_i32 = arith.constant 0 : i32
    %c0_i32_0 = arith.constant 0 : i32
    %c0_i32_1 = arith.constant 0 : i32
    return %c0_i32, %c0_i32_0 : i32, i32
  }
}

module attributes {stable_mosaic.version = 11 : i64} {
  func.func @_qkv_kernel(%arg0: i32, %arg1: memref<16x32xf32, #tpu.memory_space<vmem>>, %arg2: memref<16x32xf32, #tpu.memory_space<vmem>>, %arg3: memref<32x32xf32, #tpu.memory_space<vmem>>, %arg4: memref<1x32xf32, #tpu.memory_space<vmem>>, %arg5: memref<32x64xf32, #tpu.memory_space<vmem>>, %arg6: memref<1x64xf32, #tpu.memory_space<vmem>>, %arg7: memref<16x32xf32, #tpu.memory_space<vmem>>, %arg8: memref<16x64xf32, #tpu.memory_space<vmem>>) attributes {dimension_semantics = [#tpu.dimension_semantics<arbitrary>], iteration_bounds = array<i64: 1>, scalar_prefetch = 0 : i64, scratch_operands = 0 : i64, tpu.core_type = #tpu.core_type<tc>, window_params = [{pipeline_mode = #tpu.pipeline_mode<synchronous>, transform_indices = @transform_0, window_bounds = array<i64: 16, 32>}, {pipeline_mode = #tpu.pipeline_mode<synchronous>, transform_indices = @transform_1, window_bounds = array<i64: 16, 32>}, {pipeline_mode = #tpu.pipeline_mode<synchronous>, transform_indices = @transform_2, window_bounds = array<i64: 32, 32>}, {pipeline_mode = #tpu.pipeline_mode<synchronous>, transform_indices = @transform_3, window_bounds = array<i64: 1, 32>}, {pipeline_mode = #tpu.pipeline_mode<synchronous>, transform_indices = @transform_4, window_bounds = array<i64: 32, 64>}, {pipeline_mode = #tpu.pipeline_mode<synchronous>, transform_indices = @transform_5, window_bounds = array<i64: 1, 64>}, {pipeline_mode = #tpu.pipeline_mode<synchronous>, transform_indices = @transform_6, window_bounds = array<i64: 16, 32>}, {pipeline_mode = #tpu.pipeline_mode<synchronous>, transform_indices = @transform_7, window_bounds = array<i64: 16, 64>}]} {
    %c0 = arith.constant 0 : index
    %c0_0 = arith.constant 0 : index
    %0 = vector.load %arg1[%c0, %c0_0] : memref<16x32xf32, #tpu.memory_space<vmem>>, vector<16x32xf32>
    %c0_1 = arith.constant 0 : index
    %c0_2 = arith.constant 0 : index
    %1 = vector.load %arg3[%c0_1, %c0_2] : memref<32x32xf32, #tpu.memory_space<vmem>>, vector<32x32xf32>
    %cst = arith.constant dense<0.000000e+00> : vector<16x32xf32>
    %2 = tpu.matmul %0, %1, %cst {dimension_numbers = #tpu.dot_dimension_numbers<[1], [0], [0], [1], [0, 0, 1, 1], [], []>} : vector<16x32xf32>, vector<32x32xf32>, vector<16x32xf32> -> vector<16x32xf32>
    %c0_3 = arith.constant 0 : index
    %c0_4 = arith.constant 0 : index
    %3 = vector.load %arg4[%c0_3, %c0_4] : memref<1x32xf32, #tpu.memory_space<vmem>>, vector<1x32xf32>
    %4 = vector.broadcast %3 : vector<1x32xf32> to vector<16x32xf32>
    %5 = arith.addf %2, %4 : vector<16x32xf32>
    %c0_5 = arith.constant 0 : index
    %c0_6 = arith.constant 0 : index
    %6 = vector.load %arg7[%c0_5, %c0_6] : memref<16x32xf32, #tpu.memory_space<vmem>>, vector<16x32xf32>
    tpu.vector_store %arg7[%c0_5, %c0_6], %5 {strides = array<i32>} : memref<16x32xf32, #tpu.memory_space<vmem>>, vector<16x32xf32>,
    %c0_7 = arith.constant 0 : index
    %c0_8 = arith.constant 0 : index
    %7 = vector.load %arg2[%c0_7, %c0_8] : memref<16x32xf32, #tpu.memory_space<vmem>>, vector<16x32xf32>
    %c0_9 = arith.constant 0 : index
    %c0_10 = arith.constant 0 : index
    %8 = vector.load %arg5[%c0_9, %c0_10] : memref<32x64xf32, #tpu.memory_space<vmem>>, vector<32x64xf32>
    %cst_11 = arith.constant dense<0.000000e+00> : vector<16x64xf32>
    %9 = tpu.matmul %7, %8, %cst_11 {dimension_numbers = #tpu.dot_dimension_numbers<[1], [0], [0], [1], [0, 0, 1, 1], [], []>} : vector<16x32xf32>, vector<32x64xf32>, vector<16x64xf32> -> vector<16x64xf32>
    %c0_12 = arith.constant 0 : index
    %c0_13 = arith.constant 0 : index
    %10 = vector.load %arg6[%c0_12, %c0_13] : memref<1x64xf32, #tpu.memory_space<vmem>>, vector<1x64xf32>
    %11 = vector.broadcast %10 : vector<1x64xf32> to vector<16x64xf32>
    %12 = arith.addf %9, %11 : vector<16x64xf32>
    %c0_14 = arith.constant 0 : index
    %c0_15 = arith.constant 0 : index
    %13 = vector.load %arg8[%c0_14, %c0_15] : memref<16x64xf32, #tpu.memory_space<vmem>>, vector<16x64xf32>
    tpu.vector_store %arg8[%c0_14, %c0_15], %12 {strides = array<i32>} : memref<16x64xf32, #tpu.memory_space<vmem>>, vector<16x64xf32>,
    return
  }
  func.func @transform_0(%arg0: i32) -> (i32, i32) {
    %c0_i32 = arith.constant 0 : i32
    %c0_i32_0 = arith.constant 0 : i32
    %c0_i32_1 = arith.constant 0 : i32
    return %c0_i32, %c0_i32_0 : i32, i32
  }
  func.func @transform_1(%arg0: i32) -> (i32, i32) {
    %c0_i32 = arith.constant 0 : i32
    %c0_i32_0 = arith.constant 0 : i32
    %c0_i32_1 = arith.constant 0 : i32
    return %c0_i32, %c0_i32_0 : i32, i32
  }
  func.func @transform_2(%arg0: i32) -> (i32, i32) {
    %c0_i32 = arith.constant 0 : i32
    %c0_i32_0 = arith.constant 0 : i32
    %c0_i32_1 = arith.constant 0 : i32
    return %c0_i32, %c0_i32_0 : i32, i32
  }
  func.func @transform_3(%arg0: i32) -> (i32, i32) {
    %c0_i32 = arith.constant 0 : i32
    %c0_i32_0 = arith.constant 0 : i32
    %c0_i32_1 = arith.constant 0 : i32
    return %c0_i32, %c0_i32_0 : i32, i32
  }
  func.func @transform_4(%arg0: i32) -> (i32, i32) {
    %c0_i32 = arith.constant 0 : i32
    %c0_i32_0 = arith.constant 0 : i32
    %c0_i32_1 = arith.constant 0 : i32
    return %c0_i32, %c0_i32_0 : i32, i32
  }
  func.func @transform_5(%arg0: i32) -> (i32, i32) {
    %c0_i32 = arith.constant 0 : i32
    %c0_i32_0 = arith.constant 0 : i32
    %c0_i32_1 = arith.constant 0 : i32
    return %c0_i32, %c0_i32_0 : i32, i32
  }
  func.func @transform_6(%arg0: i32) -> (i32, i32) {
    %c0_i32 = arith.constant 0 : i32
    %c0_i32_0 = arith.constant 0 : i32
    %c0_i32_1 = arith.constant 0 : i32
    return %c0_i32, %c0_i32_0 : i32, i32
  }
  func.func @transform_7(%arg0: i32) -> (i32, i32) {
    %c0_i32 = arith.constant 0 : i32
    %c0_i32_0 = arith.constant 0 : i32
    %c0_i32_1 = arith.constant 0 : i32
    return %c0_i32, %c0_i32_0 : i32, i32
  }
}

module attributes {stable_mosaic.version = 11 : i64} {
  func.func @_attn_kernel(%arg0: i32, %arg1: memref<8x8x8xf32, #tpu.memory_space<vmem>>, %arg2: memref<8x8x8xf32, #tpu.memory_space<vmem>>, %arg3: memref<8x8x8xf32, #tpu.memory_space<vmem>>, %arg4: memref<8x8x8xf32, #tpu.memory_space<vmem>>) attributes {dimension_semantics = [#tpu.dimension_semantics<arbitrary>], iteration_bounds = array<i64: 1>, scalar_prefetch = 0 : i64, scratch_operands = 0 : i64, tpu.core_type = #tpu.core_type<tc>, window_params = [{pipeline_mode = #tpu.pipeline_mode<synchronous>, transform_indices = @transform_0, window_bounds = array<i64: 8, 8, 8>}, {pipeline_mode = #tpu.pipeline_mode<synchronous>, transform_indices = @transform_1, window_bounds = array<i64: 8, 8, 8>}, {pipeline_mode = #tpu.pipeline_mode<synchronous>, transform_indices = @transform_2, window_bounds = array<i64: 8, 8, 8>}, {pipeline_mode = #tpu.pipeline_mode<synchronous>, transform_indices = @transform_3, window_bounds = array<i64: 8, 8, 8>}]} {
    %c0 = arith.constant 0 : index
    %c0_0 = arith.constant 0 : index
    %c0_1 = arith.constant 0 : index
    %0 = vector.load %arg1[%c0, %c0_0, %c0_1] : memref<8x8x8xf32, #tpu.memory_space<vmem>>, vector<8x8x8xf32>
    %c0_2 = arith.constant 0 : index
    %c0_3 = arith.constant 0 : index
    %c0_4 = arith.constant 0 : index
    %1 = vector.load %arg2[%c0_2, %c0_3, %c0_4] : memref<8x8x8xf32, #tpu.memory_space<vmem>>, vector<8x8x8xf32>
    %c0_5 = arith.constant 0 : index
    %c0_6 = arith.constant 0 : index
    %c0_7 = arith.constant 0 : index
    %2 = vector.load %arg3[%c0_5, %c0_6, %c0_7] : memref<8x8x8xf32, #tpu.memory_space<vmem>>, vector<8x8x8xf32>
    "tpu.trace_start"() <{level = 10 : i32, message = "bld,bsd->bls"}> : () -> ()
    %cst = arith.constant dense<0.000000e+00> : vector<8x8x8xf32>
    %3 = tpu.matmul %0, %1, %cst {dimension_numbers = #tpu.dot_dimension_numbers<[2], [2], [1], [1], [0, 0, 0, 1, 1, 1], [0], [0]>} : vector<8x8x8xf32>, vector<8x8x8xf32>, vector<8x8x8xf32> -> vector<8x8x8xf32>
    "tpu.trace_stop"() : () -> ()
    %cst_8 = arith.constant 0.353553385 : f32
    %4 = vector.broadcast %cst_8 : f32 to vector<8x8x8xf32>
    %5 = arith.mulf %3, %4 : vector<8x8x8xf32>
    %cst_9 = arith.constant dense<0xFF800000> : vector<8x8xf32>
    %6 = vector.multi_reduction <maximumf>, %5, %cst_9 [2] : vector<8x8x8xf32> to vector<8x8xf32>
    %7 = vector.shape_cast %6 : vector<8x8xf32> to vector<8x8x1xf32>
    %8 = vector.broadcast %7 : vector<8x8x1xf32> to vector<8x8x8xf32>
    %9 = arith.subf %5, %8 : vector<8x8x8xf32>
    %10 = math.exp %9 : vector<8x8x8xf32>
    %cst_10 = arith.constant dense<0.000000e+00> : vector<8x8xf32>
    %11 = vector.multi_reduction <add>, %10, %cst_10 [2] : vector<8x8x8xf32> to vector<8x8xf32>
    %12 = vector.shape_cast %11 : vector<8x8xf32> to vector<8x8x1xf32>
    %13 = tpu.reciprocal %12 {approx = true} : vector<8x8x1xf32> -> vector<8x8x1xf32>
    %14 = vector.broadcast %13 : vector<8x8x1xf32> to vector<8x8x8xf32>
    %15 = arith.mulf %10, %14 : vector<8x8x8xf32>
    "tpu.trace_start"() <{level = 10 : i32, message = "bls,bsd->bld"}> : () -> ()
    %cst_11 = arith.constant dense<0.000000e+00> : vector<8x8x8xf32>
    %16 = tpu.matmul %15, %2, %cst_11 {dimension_numbers = #tpu.dot_dimension_numbers<[2], [1], [1], [2], [0, 0, 0, 1, 1, 2], [0], [0]>} : vector<8x8x8xf32>, vector<8x8x8xf32>, vector<8x8x8xf32> -> vector<8x8x8xf32>
    "tpu.trace_stop"() : () -> ()
    %c0_12 = arith.constant 0 : index
    %c0_13 = arith.constant 0 : index
    %c0_14 = arith.constant 0 : index
    %17 = vector.load %arg4[%c0_12, %c0_13, %c0_14] : memref<8x8x8xf32, #tpu.memory_space<vmem>>, vector<8x8x8xf32>
    tpu.vector_store %arg4[%c0_12, %c0_13, %c0_14], %16 {strides = array<i32>} : memref<8x8x8xf32, #tpu.memory_space<vmem>>, vector<8x8x8xf32>,
    return
  }
  func.func @transform_0(%arg0: i32) -> (i32, i32, i32) {
    %c0_i32 = arith.constant 0 : i32
    %c0_i32_0 = arith.constant 0 : i32
    %c0_i32_1 = arith.constant 0 : i32
    %c0_i32_2 = arith.constant 0 : i32
    return %c0_i32, %c0_i32_0, %c0_i32_1 : i32, i32, i32
  }
  func.func @transform_1(%arg0: i32) -> (i32, i32, i32) {
    %c0_i32 = arith.constant 0 : i32
    %c0_i32_0 = arith.constant 0 : i32
    %c0_i32_1 = arith.constant 0 : i32
    %c0_i32_2 = arith.constant 0 : i32
    return %c0_i32, %c0_i32_0, %c0_i32_1 : i32, i32, i32
  }
  func.func @transform_2(%arg0: i32) -> (i32, i32, i32) {
    %c0_i32 = arith.constant 0 : i32
    %c0_i32_0 = arith.constant 0 : i32
    %c0_i32_1 = arith.constant 0 : i32
    %c0_i32_2 = arith.constant 0 : i32
    return %c0_i32, %c0_i32_0, %c0_i32_1 : i32, i32, i32
  }
  func.func @transform_3(%arg0: i32) -> (i32, i32, i32) {
    %c0_i32 = arith.constant 0 : i32
    %c0_i32_0 = arith.constant 0 : i32
    %c0_i32_1 = arith.constant 0 : i32
    %c0_i32_2 = arith.constant 0 : i32
    return %c0_i32, %c0_i32_0, %c0_i32_1 : i32, i32, i32
  }
}

module attributes {stable_mosaic.version = 11 : i64} {
  func.func @_proj_res_ln_kernel(%arg0: i32, %arg1: memref<16x32xf32, #tpu.memory_space<vmem>>, %arg2: memref<16x32xf32, #tpu.memory_space<vmem>>, %arg3: memref<32x32xf32, #tpu.memory_space<vmem>>, %arg4: memref<1x32xf32, #tpu.memory_space<vmem>>, %arg5: memref<1x32xf32, #tpu.memory_space<vmem>>, %arg6: memref<1x32xf32, #tpu.memory_space<vmem>>, %arg7: memref<16x32xf32, #tpu.memory_space<vmem>>) attributes {dimension_semantics = [#tpu.dimension_semantics<arbitrary>], iteration_bounds = array<i64: 1>, scalar_prefetch = 0 : i64, scratch_operands = 0 : i64, tpu.core_type = #tpu.core_type<tc>, window_params = [{pipeline_mode = #tpu.pipeline_mode<synchronous>, transform_indices = @transform_0, window_bounds = array<i64: 16, 32>}, {pipeline_mode = #tpu.pipeline_mode<synchronous>, transform_indices = @transform_1, window_bounds = array<i64: 16, 32>}, {pipeline_mode = #tpu.pipeline_mode<synchronous>, transform_indices = @transform_2, window_bounds = array<i64: 32, 32>}, {pipeline_mode = #tpu.pipeline_mode<synchronous>, transform_indices = @transform_3, window_bounds = array<i64: 1, 32>}, {pipeline_mode = #tpu.pipeline_mode<synchronous>, transform_indices = @transform_4, window_bounds = array<i64: 1, 32>}, {pipeline_mode = #tpu.pipeline_mode<synchronous>, transform_indices = @transform_5, window_bounds = array<i64: 1, 32>}, {pipeline_mode = #tpu.pipeline_mode<synchronous>, transform_indices = @transform_6, window_bounds = array<i64: 16, 32>}]} {
    %c0 = arith.constant 0 : index
    %c0_0 = arith.constant 0 : index
    %0 = vector.load %arg1[%c0, %c0_0] : memref<16x32xf32, #tpu.memory_space<vmem>>, vector<16x32xf32>
    %c0_1 = arith.constant 0 : index
    %c0_2 = arith.constant 0 : index
    %1 = vector.load %arg3[%c0_1, %c0_2] : memref<32x32xf32, #tpu.memory_space<vmem>>, vector<32x32xf32>
    %cst = arith.constant dense<0.000000e+00> : vector<16x32xf32>
    %2 = tpu.matmul %0, %1, %cst {dimension_numbers = #tpu.dot_dimension_numbers<[1], [0], [0], [1], [0, 0, 1, 1], [], []>} : vector<16x32xf32>, vector<32x32xf32>, vector<16x32xf32> -> vector<16x32xf32>
    %c0_3 = arith.constant 0 : index
    %c0_4 = arith.constant 0 : index
    %3 = vector.load %arg4[%c0_3, %c0_4] : memref<1x32xf32, #tpu.memory_space<vmem>>, vector<1x32xf32>
    %4 = vector.broadcast %3 : vector<1x32xf32> to vector<16x32xf32>
    %5 = arith.addf %2, %4 : vector<16x32xf32>
    %c0_5 = arith.constant 0 : index
    %c0_6 = arith.constant 0 : index
    %6 = vector.load %arg2[%c0_5, %c0_6] : memref<16x32xf32, #tpu.memory_space<vmem>>, vector<16x32xf32>
    %7 = arith.addf %5, %6 : vector<16x32xf32>
    %c0_7 = arith.constant 0 : index
    %c0_8 = arith.constant 0 : index
    %8 = vector.load %arg5[%c0_7, %c0_8] : memref<1x32xf32, #tpu.memory_space<vmem>>, vector<1x32xf32>
    %c0_9 = arith.constant 0 : index
    %c0_10 = arith.constant 0 : index
    %9 = vector.load %arg6[%c0_9, %c0_10] : memref<1x32xf32, #tpu.memory_space<vmem>>, vector<1x32xf32>
    %cst_11 = arith.constant dense<0.000000e+00> : vector<16xf32>
    %10 = vector.multi_reduction <add>, %7, %cst_11 [1] : vector<16x32xf32> to vector<16xf32>
    %11 = vector.shape_cast %10 : vector<16xf32> to vector<16x1xf32>
    %cst_12 = arith.constant 3.200000e+01 : f32
    %12 = vector.broadcast %cst_12 : f32 to vector<16x1xf32>
    %13 = arith.divf %11, %12 : vector<16x1xf32>
    %14 = vector.broadcast %13 : vector<16x1xf32> to vector<16x32xf32>
    %15 = arith.subf %7, %14 : vector<16x32xf32>
    %16 = arith.mulf %15, %15 : vector<16x32xf32>
    %cst_13 = arith.constant dense<0.000000e+00> : vector<16xf32>
    %17 = vector.multi_reduction <add>, %16, %cst_13 [1] : vector<16x32xf32> to vector<16xf32>
    %18 = vector.shape_cast %17 : vector<16xf32> to vector<16x1xf32>
    %cst_14 = arith.constant 3.200000e+01 : f32
    %19 = vector.broadcast %cst_14 : f32 to vector<16x1xf32>
    %20 = arith.divf %18, %19 : vector<16x1xf32>
    %cst_15 = arith.constant 9.99999974E-6 : f32
    %21 = vector.broadcast %cst_15 : f32 to vector<16x1xf32>
    %22 = arith.addf %20, %21 : vector<16x1xf32>
    %23 = math.rsqrt %22 : vector<16x1xf32>
    %24 = vector.broadcast %23 : vector<16x1xf32> to vector<16x32xf32>
    %25 = arith.mulf %15, %24 : vector<16x32xf32>
    %26 = vector.broadcast %8 : vector<1x32xf32> to vector<16x32xf32>
    %27 = arith.mulf %25, %26 : vector<16x32xf32>
    %28 = vector.broadcast %9 : vector<1x32xf32> to vector<16x32xf32>
    %29 = arith.addf %27, %28 : vector<16x32xf32>
    %c0_16 = arith.constant 0 : index
    %c0_17 = arith.constant 0 : index
    %30 = vector.load %arg7[%c0_16, %c0_17] : memref<16x32xf32, #tpu.memory_space<vmem>>, vector<16x32xf32>
    tpu.vector_store %arg7[%c0_16, %c0_17], %29 {strides = array<i32>} : memref<16x32xf32, #tpu.memory_space<vmem>>, vector<16x32xf32>,
    return
  }
  func.func @transform_0(%arg0: i32) -> (i32, i32) {
    %c0_i32 = arith.constant 0 : i32
    %c0_i32_0 = arith.constant 0 : i32
    %c0_i32_1 = arith.constant 0 : i32
    return %c0_i32, %c0_i32_0 : i32, i32
  }
  func.func @transform_1(%arg0: i32) -> (i32, i32) {
    %c0_i32 = arith.constant 0 : i32
    %c0_i32_0 = arith.constant 0 : i32
    %c0_i32_1 = arith.constant 0 : i32
    return %c0_i32, %c0_i32_0 : i32, i32
  }
  func.func @transform_2(%arg0: i32) -> (i32, i32) {
    %c0_i32 = arith.constant 0 : i32
    %c0_i32_0 = arith.constant 0 : i32
    %c0_i32_1 = arith.constant 0 : i32
    return %c0_i32, %c0_i32_0 : i32, i32
  }
  func.func @transform_3(%arg0: i32) -> (i32, i32) {
    %c0_i32 = arith.constant 0 : i32
    %c0_i32_0 = arith.constant 0 : i32
    %c0_i32_1 = arith.constant 0 : i32
    return %c0_i32, %c0_i32_0 : i32, i32
  }
  func.func @transform_4(%arg0: i32) -> (i32, i32) {
    %c0_i32 = arith.constant 0 : i32
    %c0_i32_0 = arith.constant 0 : i32
    %c0_i32_1 = arith.constant 0 : i32
    return %c0_i32, %c0_i32_0 : i32, i32
  }
  func.func @transform_5(%arg0: i32) -> (i32, i32) {
    %c0_i32 = arith.constant 0 : i32
    %c0_i32_0 = arith.constant 0 : i32
    %c0_i32_1 = arith.constant 0 : i32
    return %c0_i32, %c0_i32_0 : i32, i32
  }
  func.func @transform_6(%arg0: i32) -> (i32, i32) {
    %c0_i32 = arith.constant 0 : i32
    %c0_i32_0 = arith.constant 0 : i32
    %c0_i32_1 = arith.constant 0 : i32
    return %c0_i32, %c0_i32_0 : i32, i32
  }
}

module attributes {stable_mosaic.version = 11 : i64} {
  func.func @_ffn_res_ln_kernel(%arg0: i32, %arg1: memref<16x32xf32, #tpu.memory_space<vmem>>, %arg2: memref<32x32xf32, #tpu.memory_space<vmem>>, %arg3: memref<1x32xf32, #tpu.memory_space<vmem>>, %arg4: memref<32x32xf32, #tpu.memory_space<vmem>>, %arg5: memref<1x32xf32, #tpu.memory_space<vmem>>, %arg6: memref<1x32xf32, #tpu.memory_space<vmem>>, %arg7: memref<1x32xf32, #tpu.memory_space<vmem>>, %arg8: memref<16x32xf32, #tpu.memory_space<vmem>>) attributes {dimension_semantics = [#tpu.dimension_semantics<arbitrary>], iteration_bounds = array<i64: 1>, scalar_prefetch = 0 : i64, scratch_operands = 0 : i64, tpu.core_type = #tpu.core_type<tc>, window_params = [{pipeline_mode = #tpu.pipeline_mode<synchronous>, transform_indices = @transform_0, window_bounds = array<i64: 16, 32>}, {pipeline_mode = #tpu.pipeline_mode<synchronous>, transform_indices = @transform_1, window_bounds = array<i64: 32, 32>}, {pipeline_mode = #tpu.pipeline_mode<synchronous>, transform_indices = @transform_2, window_bounds = array<i64: 1, 32>}, {pipeline_mode = #tpu.pipeline_mode<synchronous>, transform_indices = @transform_3, window_bounds = array<i64: 32, 32>}, {pipeline_mode = #tpu.pipeline_mode<synchronous>, transform_indices = @transform_4, window_bounds = array<i64: 1, 32>}, {pipeline_mode = #tpu.pipeline_mode<synchronous>, transform_indices = @transform_5, window_bounds = array<i64: 1, 32>}, {pipeline_mode = #tpu.pipeline_mode<synchronous>, transform_indices = @transform_6, window_bounds = array<i64: 1, 32>}, {pipeline_mode = #tpu.pipeline_mode<synchronous>, transform_indices = @transform_7, window_bounds = array<i64: 16, 32>}]} {
    %c0 = arith.constant 0 : index
    %c0_0 = arith.constant 0 : index
    %0 = vector.load %arg1[%c0, %c0_0] : memref<16x32xf32, #tpu.memory_space<vmem>>, vector<16x32xf32>
    %c0_1 = arith.constant 0 : index
    %c0_2 = arith.constant 0 : index
    %1 = vector.load %arg2[%c0_1, %c0_2] : memref<32x32xf32, #tpu.memory_space<vmem>>, vector<32x32xf32>
    %cst = arith.constant dense<0.000000e+00> : vector<16x32xf32>
    %2 = tpu.matmul %0, %1, %cst {dimension_numbers = #tpu.dot_dimension_numbers<[1], [0], [0], [1], [0, 0, 1, 1], [], []>} : vector<16x32xf32>, vector<32x32xf32>, vector<16x32xf32> -> vector<16x32xf32>
    %c0_3 = arith.constant 0 : index
    %c0_4 = arith.constant 0 : index
    %3 = vector.load %arg3[%c0_3, %c0_4] : memref<1x32xf32, #tpu.memory_space<vmem>>, vector<1x32xf32>
    %4 = vector.broadcast %3 : vector<1x32xf32> to vector<16x32xf32>
    %5 = arith.addf %2, %4 : vector<16x32xf32>
    %cst_5 = arith.constant 5.000000e-01 : f32
    %6 = vector.broadcast %cst_5 : f32 to vector<16x32xf32>
    %7 = arith.mulf %6, %5 : vector<16x32xf32>
    %cst_6 = arith.constant 0.707106769 : f32
    %8 = vector.broadcast %cst_6 : f32 to vector<16x32xf32>
    %9 = arith.mulf %5, %8 : vector<16x32xf32>
    %10 = math.erf %9 : vector<16x32xf32>
    %cst_7 = arith.constant 1.000000e+00 : f32
    %11 = vector.broadcast %cst_7 : f32 to vector<16x32xf32>
    %12 = arith.addf %11, %10 : vector<16x32xf32>
    %13 = arith.mulf %7, %12 : vector<16x32xf32>
    %c0_8 = arith.constant 0 : index
    %c0_9 = arith.constant 0 : index
    %14 = vector.load %arg4[%c0_8, %c0_9] : memref<32x32xf32, #tpu.memory_space<vmem>>, vector<32x32xf32>
    %cst_10 = arith.constant dense<0.000000e+00> : vector<16x32xf32>
    %15 = tpu.matmul %13, %14, %cst_10 {dimension_numbers = #tpu.dot_dimension_numbers<[1], [0], [0], [1], [0, 0, 1, 1], [], []>} : vector<16x32xf32>, vector<32x32xf32>, vector<16x32xf32> -> vector<16x32xf32>
    %c0_11 = arith.constant 0 : index
    %c0_12 = arith.constant 0 : index
    %16 = vector.load %arg5[%c0_11, %c0_12] : memref<1x32xf32, #tpu.memory_space<vmem>>, vector<1x32xf32>
    %17 = vector.broadcast %16 : vector<1x32xf32> to vector<16x32xf32>
    %18 = arith.addf %15, %17 : vector<16x32xf32>
    %19 = arith.addf %0, %18 : vector<16x32xf32>
    %c0_13 = arith.constant 0 : index
    %c0_14 = arith.constant 0 : index
    %20 = vector.load %arg6[%c0_13, %c0_14] : memref<1x32xf32, #tpu.memory_space<vmem>>, vector<1x32xf32>
    %c0_15 = arith.constant 0 : index
    %c0_16 = arith.constant 0 : index
    %21 = vector.load %arg7[%c0_15, %c0_16] : memref<1x32xf32, #tpu.memory_space<vmem>>, vector<1x32xf32>
    %cst_17 = arith.constant dense<0.000000e+00> : vector<16xf32>
    %22 = vector.multi_reduction <add>, %19, %cst_17 [1] : vector<16x32xf32> to vector<16xf32>
    %23 = vector.shape_cast %22 : vector<16xf32> to vector<16x1xf32>
    %cst_18 = arith.constant 3.200000e+01 : f32
    %24 = vector.broadcast %cst_18 : f32 to vector<16x1xf32>
    %25 = arith.divf %23, %24 : vector<16x1xf32>
    %26 = vector.broadcast %25 : vector<16x1xf32> to vector<16x32xf32>
    %27 = arith.subf %19, %26 : vector<16x32xf32>
    %28 = arith.mulf %27, %27 : vector<16x32xf32>
    %cst_19 = arith.constant dense<0.000000e+00> : vector<16xf32>
    %29 = vector.multi_reduction <add>, %28, %cst_19 [1] : vector<16x32xf32> to vector<16xf32>
    %30 = vector.shape_cast %29 : vector<16xf32> to vector<16x1xf32>
    %cst_20 = arith.constant 3.200000e+01 : f32
    %31 = vector.broadcast %cst_20 : f32 to vector<16x1xf32>
    %32 = arith.divf %30, %31 : vector<16x1xf32>
    %cst_21 = arith.constant 9.99999974E-6 : f32
    %33 = vector.broadcast %cst_21 : f32 to vector<16x1xf32>
    %34 = arith.addf %32, %33 : vector<16x1xf32>
    %35 = math.rsqrt %34 : vector<16x1xf32>
    %36 = vector.broadcast %35 : vector<16x1xf32> to vector<16x32xf32>
    %37 = arith.mulf %27, %36 : vector<16x32xf32>
    %38 = vector.broadcast %20 : vector<1x32xf32> to vector<16x32xf32>
    %39 = arith.mulf %37, %38 : vector<16x32xf32>
    %40 = vector.broadcast %21 : vector<1x32xf32> to vector<16x32xf32>
    %41 = arith.addf %39, %40 : vector<16x32xf32>
    %c0_22 = arith.constant 0 : index
    %c0_23 = arith.constant 0 : index
    %42 = vector.load %arg8[%c0_22, %c0_23] : memref<16x32xf32, #tpu.memory_space<vmem>>, vector<16x32xf32>
    tpu.vector_store %arg8[%c0_22, %c0_23], %41 {strides = array<i32>} : memref<16x32xf32, #tpu.memory_space<vmem>>, vector<16x32xf32>,
    return
  }
  func.func @transform_0(%arg0: i32) -> (i32, i32) {
    %c0_i32 = arith.constant 0 : i32
    %c0_i32_0 = arith.constant 0 : i32
    %c0_i32_1 = arith.constant 0 : i32
    return %c0_i32, %c0_i32_0 : i32, i32
  }
  func.func @transform_1(%arg0: i32) -> (i32, i32) {
    %c0_i32 = arith.constant 0 : i32
    %c0_i32_0 = arith.constant 0 : i32
    %c0_i32_1 = arith.constant 0 : i32
    return %c0_i32, %c0_i32_0 : i32, i32
  }
  func.func @transform_2(%arg0: i32) -> (i32, i32) {
    %c0_i32 = arith.constant 0 : i32
    %c0_i32_0 = arith.constant 0 : i32
    %c0_i32_1 = arith.constant 0 : i32
    return %c0_i32, %c0_i32_0 : i32, i32
  }
  func.func @transform_3(%arg0: i32) -> (i32, i32) {
    %c0_i32 = arith.constant 0 : i32
    %c0_i32_0 = arith.constant 0 : i32
    %c0_i32_1 = arith.constant 0 : i32
    return %c0_i32, %c0_i32_0 : i32, i32
  }
  func.func @transform_4(%arg0: i32) -> (i32, i32) {
    %c0_i32 = arith.constant 0 : i32
    %c0_i32_0 = arith.constant 0 : i32
    %c0_i32_1 = arith.constant 0 : i32
    return %c0_i32, %c0_i32_0 : i32, i32
  }
  func.func @transform_5(%arg0: i32) -> (i32, i32) {
    %c0_i32 = arith.constant 0 : i32
    %c0_i32_0 = arith.constant 0 : i32
    %c0_i32_1 = arith.constant 0 : i32
    return %c0_i32, %c0_i32_0 : i32, i32
  }
  func.func @transform_6(%arg0: i32) -> (i32, i32) {
    %c0_i32 = arith.constant 0 : i32
    %c0_i32_0 = arith.constant 0 : i32
    %c0_i32_1 = arith.constant 0 : i32
    return %c0_i32, %c0_i32_0 : i32, i32
  }
  func.func @transform_7(%arg0: i32) -> (i32, i32) {
    %c0_i32 = arith.constant 0 : i32
    %c0_i32_0 = arith.constant 0 : i32
    %c0_i32_1 = arith.constant 0 : i32
    return %c0_i32, %c0_i32_0 : i32, i32
  }
}

module attributes {stable_mosaic.version = 11 : i64} {
  func.func @_qkv_kernel(%arg0: i32, %arg1: memref<10x32xf32, #tpu.memory_space<vmem>>, %arg2: memref<10x32xf32, #tpu.memory_space<vmem>>, %arg3: memref<32x32xf32, #tpu.memory_space<vmem>>, %arg4: memref<1x32xf32, #tpu.memory_space<vmem>>, %arg5: memref<32x64xf32, #tpu.memory_space<vmem>>, %arg6: memref<1x64xf32, #tpu.memory_space<vmem>>, %arg7: memref<10x32xf32, #tpu.memory_space<vmem>>, %arg8: memref<10x64xf32, #tpu.memory_space<vmem>>) attributes {dimension_semantics = [#tpu.dimension_semantics<arbitrary>], iteration_bounds = array<i64: 1>, scalar_prefetch = 0 : i64, scratch_operands = 0 : i64, tpu.core_type = #tpu.core_type<tc>, window_params = [{pipeline_mode = #tpu.pipeline_mode<synchronous>, transform_indices = @transform_0, window_bounds = array<i64: 10, 32>}, {pipeline_mode = #tpu.pipeline_mode<synchronous>, transform_indices = @transform_1, window_bounds = array<i64: 10, 32>}, {pipeline_mode = #tpu.pipeline_mode<synchronous>, transform_indices = @transform_2, window_bounds = array<i64: 32, 32>}, {pipeline_mode = #tpu.pipeline_mode<synchronous>, transform_indices = @transform_3, window_bounds = array<i64: 1, 32>}, {pipeline_mode = #tpu.pipeline_mode<synchronous>, transform_indices = @transform_4, window_bounds = array<i64: 32, 64>}, {pipeline_mode = #tpu.pipeline_mode<synchronous>, transform_indices = @transform_5, window_bounds = array<i64: 1, 64>}, {pipeline_mode = #tpu.pipeline_mode<synchronous>, transform_indices = @transform_6, window_bounds = array<i64: 10, 32>}, {pipeline_mode = #tpu.pipeline_mode<synchronous>, transform_indices = @transform_7, window_bounds = array<i64: 10, 64>}]} {
    %c0 = arith.constant 0 : index
    %c0_0 = arith.constant 0 : index
    %0 = vector.load %arg1[%c0, %c0_0] : memref<10x32xf32, #tpu.memory_space<vmem>>, vector<10x32xf32>
    %c0_1 = arith.constant 0 : index
    %c0_2 = arith.constant 0 : index
    %1 = vector.load %arg3[%c0_1, %c0_2] : memref<32x32xf32, #tpu.memory_space<vmem>>, vector<32x32xf32>
    %cst = arith.constant dense<0.000000e+00> : vector<10x32xf32>
    %2 = tpu.matmul %0, %1, %cst {dimension_numbers = #tpu.dot_dimension_numbers<[1], [0], [0], [1], [0, 0, 1, 1], [], []>} : vector<10x32xf32>, vector<32x32xf32>, vector<10x32xf32> -> vector<10x32xf32>
    %c0_3 = arith.constant 0 : index
    %c0_4 = arith.constant 0 : index
    %3 = vector.load %arg4[%c0_3, %c0_4] : memref<1x32xf32, #tpu.memory_space<vmem>>, vector<1x32xf32>
    %4 = vector.broadcast %3 : vector<1x32xf32> to vector<10x32xf32>
    %5 = arith.addf %2, %4 : vector<10x32xf32>
    %c0_5 = arith.constant 0 : index
    %c0_6 = arith.constant 0 : index
    %6 = vector.load %arg7[%c0_5, %c0_6] : memref<10x32xf32, #tpu.memory_space<vmem>>, vector<10x32xf32>
    tpu.vector_store %arg7[%c0_5, %c0_6], %5 {strides = array<i32>} : memref<10x32xf32, #tpu.memory_space<vmem>>, vector<10x32xf32>,
    %c0_7 = arith.constant 0 : index
    %c0_8 = arith.constant 0 : index
    %7 = vector.load %arg2[%c0_7, %c0_8] : memref<10x32xf32, #tpu.memory_space<vmem>>, vector<10x32xf32>
    %c0_9 = arith.constant 0 : index
    %c0_10 = arith.constant 0 : index
    %8 = vector.load %arg5[%c0_9, %c0_10] : memref<32x64xf32, #tpu.memory_space<vmem>>, vector<32x64xf32>
    %cst_11 = arith.constant dense<0.000000e+00> : vector<10x64xf32>
    %9 = tpu.matmul %7, %8, %cst_11 {dimension_numbers = #tpu.dot_dimension_numbers<[1], [0], [0], [1], [0, 0, 1, 1], [], []>} : vector<10x32xf32>, vector<32x64xf32>, vector<10x64xf32> -> vector<10x64xf32>
    %c0_12 = arith.constant 0 : index
    %c0_13 = arith.constant 0 : index
    %10 = vector.load %arg6[%c0_12, %c0_13] : memref<1x64xf32, #tpu.memory_space<vmem>>, vector<1x64xf32>
    %11 = vector.broadcast %10 : vector<1x64xf32> to vector<10x64xf32>
    %12 = arith.addf %9, %11 : vector<10x64xf32>
    %c0_14 = arith.constant 0 : index
    %c0_15 = arith.constant 0 : index
    %13 = vector.load %arg8[%c0_14, %c0_15] : memref<10x64xf32, #tpu.memory_space<vmem>>, vector<10x64xf32>
    tpu.vector_store %arg8[%c0_14, %c0_15], %12 {strides = array<i32>} : memref<10x64xf32, #tpu.memory_space<vmem>>, vector<10x64xf32>,
    return
  }
  func.func @transform_0(%arg0: i32) -> (i32, i32) {
    %c0_i32 = arith.constant 0 : i32
    %c0_i32_0 = arith.constant 0 : i32
    %c0_i32_1 = arith.constant 0 : i32
    return %c0_i32, %c0_i32_0 : i32, i32
  }
  func.func @transform_1(%arg0: i32) -> (i32, i32) {
    %c0_i32 = arith.constant 0 : i32
    %c0_i32_0 = arith.constant 0 : i32
    %c0_i32_1 = arith.constant 0 : i32
    return %c0_i32, %c0_i32_0 : i32, i32
  }
  func.func @transform_2(%arg0: i32) -> (i32, i32) {
    %c0_i32 = arith.constant 0 : i32
    %c0_i32_0 = arith.constant 0 : i32
    %c0_i32_1 = arith.constant 0 : i32
    return %c0_i32, %c0_i32_0 : i32, i32
  }
  func.func @transform_3(%arg0: i32) -> (i32, i32) {
    %c0_i32 = arith.constant 0 : i32
    %c0_i32_0 = arith.constant 0 : i32
    %c0_i32_1 = arith.constant 0 : i32
    return %c0_i32, %c0_i32_0 : i32, i32
  }
  func.func @transform_4(%arg0: i32) -> (i32, i32) {
    %c0_i32 = arith.constant 0 : i32
    %c0_i32_0 = arith.constant 0 : i32
    %c0_i32_1 = arith.constant 0 : i32
    return %c0_i32, %c0_i32_0 : i32, i32
  }
  func.func @transform_5(%arg0: i32) -> (i32, i32) {
    %c0_i32 = arith.constant 0 : i32
    %c0_i32_0 = arith.constant 0 : i32
    %c0_i32_1 = arith.constant 0 : i32
    return %c0_i32, %c0_i32_0 : i32, i32
  }
  func.func @transform_6(%arg0: i32) -> (i32, i32) {
    %c0_i32 = arith.constant 0 : i32
    %c0_i32_0 = arith.constant 0 : i32
    %c0_i32_1 = arith.constant 0 : i32
    return %c0_i32, %c0_i32_0 : i32, i32
  }
  func.func @transform_7(%arg0: i32) -> (i32, i32) {
    %c0_i32 = arith.constant 0 : i32
    %c0_i32_0 = arith.constant 0 : i32
    %c0_i32_1 = arith.constant 0 : i32
    return %c0_i32, %c0_i32_0 : i32, i32
  }
}

module attributes {stable_mosaic.version = 11 : i64} {
  func.func @_conv_bn_elu_kernel(%arg0: i32, %arg1: memref<20x96xf32, #tpu.memory_space<vmem>>, %arg2: memref<96x32xf32, #tpu.memory_space<vmem>>, %arg3: memref<1x32xf32, #tpu.memory_space<vmem>>, %arg4: memref<1x32xf32, #tpu.memory_space<vmem>>, %arg5: memref<1x32xf32, #tpu.memory_space<vmem>>, %arg6: memref<20x32xf32, #tpu.memory_space<vmem>>) attributes {dimension_semantics = [#tpu.dimension_semantics<arbitrary>], iteration_bounds = array<i64: 1>, scalar_prefetch = 0 : i64, scratch_operands = 0 : i64, tpu.core_type = #tpu.core_type<tc>, window_params = [{pipeline_mode = #tpu.pipeline_mode<synchronous>, transform_indices = @transform_0, window_bounds = array<i64: 20, 96>}, {pipeline_mode = #tpu.pipeline_mode<synchronous>, transform_indices = @transform_1, window_bounds = array<i64: 96, 32>}, {pipeline_mode = #tpu.pipeline_mode<synchronous>, transform_indices = @transform_2, window_bounds = array<i64: 1, 32>}, {pipeline_mode = #tpu.pipeline_mode<synchronous>, transform_indices = @transform_3, window_bounds = array<i64: 1, 32>}, {pipeline_mode = #tpu.pipeline_mode<synchronous>, transform_indices = @transform_4, window_bounds = array<i64: 1, 32>}, {pipeline_mode = #tpu.pipeline_mode<synchronous>, transform_indices = @transform_5, window_bounds = array<i64: 20, 32>}]} {
    %c0 = arith.constant 0 : index
    %c0_0 = arith.constant 0 : index
    %0 = vector.load %arg1[%c0, %c0_0] : memref<20x96xf32, #tpu.memory_space<vmem>>, vector<20x96xf32>
    %c0_1 = arith.constant 0 : index
    %c0_2 = arith.constant 0 : index
    %1 = vector.load %arg2[%c0_1, %c0_2] : memref<96x32xf32, #tpu.memory_space<vmem>>, vector<96x32xf32>
    %cst = arith.constant dense<0.000000e+00> : vector<20x32xf32>
    %2 = tpu.matmul %0, %1, %cst {dimension_numbers = #tpu.dot_dimension_numbers<[1], [0], [0], [1], [0, 0, 1, 1], [], []>} : vector<20x96xf32>, vector<96x32xf32>, vector<20x32xf32> -> vector<20x32xf32>
    %c0_3 = arith.constant 0 : index
    %c0_4 = arith.constant 0 : index
    %3 = vector.load %arg3[%c0_3, %c0_4] : memref<1x32xf32, #tpu.memory_space<vmem>>, vector<1x32xf32>
    %4 = vector.broadcast %3 : vector<1x32xf32> to vector<20x32xf32>
    %5 = arith.addf %2, %4 : vector<20x32xf32>
    %cst_5 = arith.constant dense<0.000000e+00> : vector<32xf32>
    %6 = vector.multi_reduction <add>, %5, %cst_5 [0] : vector<20x32xf32> to vector<32xf32>
    %7 = vector.shape_cast %6 : vector<32xf32> to vector<1x32xf32>
    %cst_6 = arith.constant 2.000000e+01 : f32
    %8 = vector.broadcast %cst_6 : f32 to vector<1x32xf32>
    %9 = arith.divf %7, %8 : vector<1x32xf32>
    %10 = vector.broadcast %9 : vector<1x32xf32> to vector<20x32xf32>
    %11 = arith.subf %5, %10 : vector<20x32xf32>
    %12 = vector.broadcast %9 : vector<1x32xf32> to vector<20x32xf32>
    %13 = arith.subf %5, %12 : vector<20x32xf32>
    %14 = arith.mulf %11, %13 : vector<20x32xf32>
    %cst_7 = arith.constant dense<0.000000e+00> : vector<32xf32>
    %15 = vector.multi_reduction <add>, %14, %cst_7 [0] : vector<20x32xf32> to vector<32xf32>
    %16 = vector.shape_cast %15 : vector<32xf32> to vector<1x32xf32>
    %cst_8 = arith.constant 2.000000e+01 : f32
    %17 = vector.broadcast %cst_8 : f32 to vector<1x32xf32>
    %18 = arith.divf %16, %17 : vector<1x32xf32>
    %19 = vector.broadcast %9 : vector<1x32xf32> to vector<20x32xf32>
    %20 = arith.subf %5, %19 : vector<20x32xf32>
    %cst_9 = arith.constant 9.99999974E-6 : f32
    %21 = vector.broadcast %cst_9 : f32 to vector<1x32xf32>
    %22 = arith.addf %18, %21 : vector<1x32xf32>
    %23 = math.rsqrt %22 : vector<1x32xf32>
    %24 = vector.broadcast %23 : vector<1x32xf32> to vector<20x32xf32>
    %25 = arith.mulf %20, %24 : vector<20x32xf32>
    %c0_10 = arith.constant 0 : index
    %c0_11 = arith.constant 0 : index
    %26 = vector.load %arg4[%c0_10, %c0_11] : memref<1x32xf32, #tpu.memory_space<vmem>>, vector<1x32xf32>
    %27 = vector.broadcast %26 : vector<1x32xf32> to vector<20x32xf32>
    %28 = arith.mulf %25, %27 : vector<20x32xf32>
    %c0_12 = arith.constant 0 : index
    %c0_13 = arith.constant 0 : index
    %29 = vector.load %arg5[%c0_12, %c0_13] : memref<1x32xf32, #tpu.memory_space<vmem>>, vector<1x32xf32>
    %30 = vector.broadcast %29 : vector<1x32xf32> to vector<20x32xf32>
    %31 = arith.addf %28, %30 : vector<20x32xf32>
    %cst_14 = arith.constant 0.000000e+00 : f32
    %32 = vector.broadcast %cst_14 : f32 to vector<20x32xf32>
    %33 = arith.cmpf ogt, %31, %32 : vector<20x32xf32>
    %34 = math.exp %31 : vector<20x32xf32>
    %cst_15 = arith.constant 1.000000e+00 : f32
    %35 = vector.broadcast %cst_15 : f32 to vector<20x32xf32>
    %36 = arith.subf %34, %35 : vector<20x32xf32>
    %37 = arith.select %33, %31, %36 : vector<20x32xi1>, vector<20x32xf32>
    %c0_16 = arith.constant 0 : index
    %c0_17 = arith.constant 0 : index
    %38 = vector.load %arg6[%c0_16, %c0_17] : memref<20x32xf32, #tpu.memory_space<vmem>>, vector<20x32xf32>
    tpu.vector_store %arg6[%c0_16, %c0_17], %37 {strides = array<i32>} : memref<20x32xf32, #tpu.memory_space<vmem>>, vector<20x32xf32>,
    return
  }
  func.func @transform_0(%arg0: i32) -> (i32, i32) {
    %c0_i32 = arith.constant 0 : i32
    %c0_i32_0 = arith.constant 0 : i32
    %c0_i32_1 = arith.constant 0 : i32
    return %c0_i32, %c0_i32_0 : i32, i32
  }
  func.func @transform_1(%arg0: i32) -> (i32, i32) {
    %c0_i32 = arith.constant 0 : i32
    %c0_i32_0 = arith.constant 0 : i32
    %c0_i32_1 = arith.constant 0 : i32
    return %c0_i32, %c0_i32_0 : i32, i32
  }
  func.func @transform_2(%arg0: i32) -> (i32, i32) {
    %c0_i32 = arith.constant 0 : i32
    %c0_i32_0 = arith.constant 0 : i32
    %c0_i32_1 = arith.constant 0 : i32
    return %c0_i32, %c0_i32_0 : i32, i32
  }
  func.func @transform_3(%arg0: i32) -> (i32, i32) {
    %c0_i32 = arith.constant 0 : i32
    %c0_i32_0 = arith.constant 0 : i32
    %c0_i32_1 = arith.constant 0 : i32
    return %c0_i32, %c0_i32_0 : i32, i32
  }
  func.func @transform_4(%arg0: i32) -> (i32, i32) {
    %c0_i32 = arith.constant 0 : i32
    %c0_i32_0 = arith.constant 0 : i32
    %c0_i32_1 = arith.constant 0 : i32
    return %c0_i32, %c0_i32_0 : i32, i32
  }
  func.func @transform_5(%arg0: i32) -> (i32, i32) {
    %c0_i32 = arith.constant 0 : i32
    %c0_i32_0 = arith.constant 0 : i32
    %c0_i32_1 = arith.constant 0 : i32
    return %c0_i32, %c0_i32_0 : i32, i32
  }
}

module attributes {stable_mosaic.version = 11 : i64} {
  func.func @_attn_kernel(%arg0: i32, %arg1: memref<8x5x8xf32, #tpu.memory_space<vmem>>, %arg2: memref<8x5x8xf32, #tpu.memory_space<vmem>>, %arg3: memref<8x5x8xf32, #tpu.memory_space<vmem>>, %arg4: memref<8x5x8xf32, #tpu.memory_space<vmem>>) attributes {dimension_semantics = [#tpu.dimension_semantics<arbitrary>], iteration_bounds = array<i64: 1>, scalar_prefetch = 0 : i64, scratch_operands = 0 : i64, tpu.core_type = #tpu.core_type<tc>, window_params = [{pipeline_mode = #tpu.pipeline_mode<synchronous>, transform_indices = @transform_0, window_bounds = array<i64: 8, 5, 8>}, {pipeline_mode = #tpu.pipeline_mode<synchronous>, transform_indices = @transform_1, window_bounds = array<i64: 8, 5, 8>}, {pipeline_mode = #tpu.pipeline_mode<synchronous>, transform_indices = @transform_2, window_bounds = array<i64: 8, 5, 8>}, {pipeline_mode = #tpu.pipeline_mode<synchronous>, transform_indices = @transform_3, window_bounds = array<i64: 8, 5, 8>}]} {
    %c0 = arith.constant 0 : index
    %c0_0 = arith.constant 0 : index
    %c0_1 = arith.constant 0 : index
    %0 = vector.load %arg1[%c0, %c0_0, %c0_1] : memref<8x5x8xf32, #tpu.memory_space<vmem>>, vector<8x5x8xf32>
    %c0_2 = arith.constant 0 : index
    %c0_3 = arith.constant 0 : index
    %c0_4 = arith.constant 0 : index
    %1 = vector.load %arg2[%c0_2, %c0_3, %c0_4] : memref<8x5x8xf32, #tpu.memory_space<vmem>>, vector<8x5x8xf32>
    %c0_5 = arith.constant 0 : index
    %c0_6 = arith.constant 0 : index
    %c0_7 = arith.constant 0 : index
    %2 = vector.load %arg3[%c0_5, %c0_6, %c0_7] : memref<8x5x8xf32, #tpu.memory_space<vmem>>, vector<8x5x8xf32>
    "tpu.trace_start"() <{level = 10 : i32, message = "bld,bsd->bls"}> : () -> ()
    %cst = arith.constant dense<0.000000e+00> : vector<8x5x5xf32>
    %3 = tpu.matmul %0, %1, %cst {dimension_numbers = #tpu.dot_dimension_numbers<[2], [2], [1], [1], [0, 0, 0, 1, 1, 1], [0], [0]>} : vector<8x5x8xf32>, vector<8x5x8xf32>, vector<8x5x5xf32> -> vector<8x5x5xf32>
    "tpu.trace_stop"() : () -> ()
    %cst_8 = arith.constant 0.353553385 : f32
    %4 = vector.broadcast %cst_8 : f32 to vector<8x5x5xf32>
    %5 = arith.mulf %3, %4 : vector<8x5x5xf32>
    %cst_9 = arith.constant dense<0xFF800000> : vector<8x5xf32>
    %6 = vector.multi_reduction <maximumf>, %5, %cst_9 [2] : vector<8x5x5xf32> to vector<8x5xf32>
    %7 = vector.shape_cast %6 : vector<8x5xf32> to vector<8x5x1xf32>
    %8 = vector.broadcast %7 : vector<8x5x1xf32> to vector<8x5x5xf32>
    %9 = arith.subf %5, %8 : vector<8x5x5xf32>
    %10 = math.exp %9 : vector<8x5x5xf32>
    %cst_10 = arith.constant dense<0.000000e+00> : vector<8x5xf32>
    %11 = vector.multi_reduction <add>, %10, %cst_10 [2] : vector<8x5x5xf32> to vector<8x5xf32>
    %12 = vector.shape_cast %11 : vector<8x5xf32> to vector<8x5x1xf32>
    %13 = tpu.reciprocal %12 {approx = true} : vector<8x5x1xf32> -> vector<8x5x1xf32>
    %14 = vector.broadcast %13 : vector<8x5x1xf32> to vector<8x5x5xf32>
    %15 = arith.mulf %10, %14 : vector<8x5x5xf32>
    "tpu.trace_start"() <{level = 10 : i32, message = "bls,bsd->bld"}> : () -> ()
    %cst_11 = arith.constant dense<0.000000e+00> : vector<8x5x8xf32>
    %16 = tpu.matmul %15, %2, %cst_11 {dimension_numbers = #tpu.dot_dimension_numbers<[2], [1], [1], [2], [0, 0, 0, 1, 1, 2], [0], [0]>} : vector<8x5x5xf32>, vector<8x5x8xf32>, vector<8x5x8xf32> -> vector<8x5x8xf32>
    "tpu.trace_stop"() : () -> ()
    %c0_12 = arith.constant 0 : index
    %c0_13 = arith.constant 0 : index
    %c0_14 = arith.constant 0 : index
    %17 = vector.load %arg4[%c0_12, %c0_13, %c0_14] : memref<8x5x8xf32, #tpu.memory_space<vmem>>, vector<8x5x8xf32>
    tpu.vector_store %arg4[%c0_12, %c0_13, %c0_14], %16 {strides = array<i32>} : memref<8x5x8xf32, #tpu.memory_space<vmem>>, vector<8x5x8xf32>,
    return
  }
  func.func @transform_0(%arg0: i32) -> (i32, i32, i32) {
    %c0_i32 = arith.constant 0 : i32
    %c0_i32_0 = arith.constant 0 : i32
    %c0_i32_1 = arith.constant 0 : i32
    %c0_i32_2 = arith.constant 0 : i32
    return %c0_i32, %c0_i32_0, %c0_i32_1 : i32, i32, i32
  }
  func.func @transform_1(%arg0: i32) -> (i32, i32, i32) {
    %c0_i32 = arith.constant 0 : i32
    %c0_i32_0 = arith.constant 0 : i32
    %c0_i32_1 = arith.constant 0 : i32
    %c0_i32_2 = arith.constant 0 : i32
    return %c0_i32, %c0_i32_0, %c0_i32_1 : i32, i32, i32
  }
  func.func @transform_2(%arg0: i32) -> (i32, i32, i32) {
    %c0_i32 = arith.constant 0 : i32
    %c0_i32_0 = arith.constant 0 : i32
    %c0_i32_1 = arith.constant 0 : i32
    %c0_i32_2 = arith.constant 0 : i32
    return %c0_i32, %c0_i32_0, %c0_i32_1 : i32, i32, i32
  }
  func.func @transform_3(%arg0: i32) -> (i32, i32, i32) {
    %c0_i32 = arith.constant 0 : i32
    %c0_i32_0 = arith.constant 0 : i32
    %c0_i32_1 = arith.constant 0 : i32
    %c0_i32_2 = arith.constant 0 : i32
    return %c0_i32, %c0_i32_0, %c0_i32_1 : i32, i32, i32
  }
}

module attributes {stable_mosaic.version = 11 : i64} {
  func.func @_proj_res_ln_kernel(%arg0: i32, %arg1: memref<10x32xf32, #tpu.memory_space<vmem>>, %arg2: memref<10x32xf32, #tpu.memory_space<vmem>>, %arg3: memref<32x32xf32, #tpu.memory_space<vmem>>, %arg4: memref<1x32xf32, #tpu.memory_space<vmem>>, %arg5: memref<1x32xf32, #tpu.memory_space<vmem>>, %arg6: memref<1x32xf32, #tpu.memory_space<vmem>>, %arg7: memref<10x32xf32, #tpu.memory_space<vmem>>) attributes {dimension_semantics = [#tpu.dimension_semantics<arbitrary>], iteration_bounds = array<i64: 1>, scalar_prefetch = 0 : i64, scratch_operands = 0 : i64, tpu.core_type = #tpu.core_type<tc>, window_params = [{pipeline_mode = #tpu.pipeline_mode<synchronous>, transform_indices = @transform_0, window_bounds = array<i64: 10, 32>}, {pipeline_mode = #tpu.pipeline_mode<synchronous>, transform_indices = @transform_1, window_bounds = array<i64: 10, 32>}, {pipeline_mode = #tpu.pipeline_mode<synchronous>, transform_indices = @transform_2, window_bounds = array<i64: 32, 32>}, {pipeline_mode = #tpu.pipeline_mode<synchronous>, transform_indices = @transform_3, window_bounds = array<i64: 1, 32>}, {pipeline_mode = #tpu.pipeline_mode<synchronous>, transform_indices = @transform_4, window_bounds = array<i64: 1, 32>}, {pipeline_mode = #tpu.pipeline_mode<synchronous>, transform_indices = @transform_5, window_bounds = array<i64: 1, 32>}, {pipeline_mode = #tpu.pipeline_mode<synchronous>, transform_indices = @transform_6, window_bounds = array<i64: 10, 32>}]} {
    %c0 = arith.constant 0 : index
    %c0_0 = arith.constant 0 : index
    %0 = vector.load %arg1[%c0, %c0_0] : memref<10x32xf32, #tpu.memory_space<vmem>>, vector<10x32xf32>
    %c0_1 = arith.constant 0 : index
    %c0_2 = arith.constant 0 : index
    %1 = vector.load %arg3[%c0_1, %c0_2] : memref<32x32xf32, #tpu.memory_space<vmem>>, vector<32x32xf32>
    %cst = arith.constant dense<0.000000e+00> : vector<10x32xf32>
    %2 = tpu.matmul %0, %1, %cst {dimension_numbers = #tpu.dot_dimension_numbers<[1], [0], [0], [1], [0, 0, 1, 1], [], []>} : vector<10x32xf32>, vector<32x32xf32>, vector<10x32xf32> -> vector<10x32xf32>
    %c0_3 = arith.constant 0 : index
    %c0_4 = arith.constant 0 : index
    %3 = vector.load %arg4[%c0_3, %c0_4] : memref<1x32xf32, #tpu.memory_space<vmem>>, vector<1x32xf32>
    %4 = vector.broadcast %3 : vector<1x32xf32> to vector<10x32xf32>
    %5 = arith.addf %2, %4 : vector<10x32xf32>
    %c0_5 = arith.constant 0 : index
    %c0_6 = arith.constant 0 : index
    %6 = vector.load %arg2[%c0_5, %c0_6] : memref<10x32xf32, #tpu.memory_space<vmem>>, vector<10x32xf32>
    %7 = arith.addf %5, %6 : vector<10x32xf32>
    %c0_7 = arith.constant 0 : index
    %c0_8 = arith.constant 0 : index
    %8 = vector.load %arg5[%c0_7, %c0_8] : memref<1x32xf32, #tpu.memory_space<vmem>>, vector<1x32xf32>
    %c0_9 = arith.constant 0 : index
    %c0_10 = arith.constant 0 : index
    %9 = vector.load %arg6[%c0_9, %c0_10] : memref<1x32xf32, #tpu.memory_space<vmem>>, vector<1x32xf32>
    %cst_11 = arith.constant dense<0.000000e+00> : vector<10xf32>
    %10 = vector.multi_reduction <add>, %7, %cst_11 [1] : vector<10x32xf32> to vector<10xf32>
    %11 = vector.shape_cast %10 : vector<10xf32> to vector<10x1xf32>
    %cst_12 = arith.constant 3.200000e+01 : f32
    %12 = vector.broadcast %cst_12 : f32 to vector<10x1xf32>
    %13 = arith.divf %11, %12 : vector<10x1xf32>
    %14 = vector.broadcast %13 : vector<10x1xf32> to vector<10x32xf32>
    %15 = arith.subf %7, %14 : vector<10x32xf32>
    %16 = arith.mulf %15, %15 : vector<10x32xf32>
    %cst_13 = arith.constant dense<0.000000e+00> : vector<10xf32>
    %17 = vector.multi_reduction <add>, %16, %cst_13 [1] : vector<10x32xf32> to vector<10xf32>
    %18 = vector.shape_cast %17 : vector<10xf32> to vector<10x1xf32>
    %cst_14 = arith.constant 3.200000e+01 : f32
    %19 = vector.broadcast %cst_14 : f32 to vector<10x1xf32>
    %20 = arith.divf %18, %19 : vector<10x1xf32>
    %cst_15 = arith.constant 9.99999974E-6 : f32
    %21 = vector.broadcast %cst_15 : f32 to vector<10x1xf32>
    %22 = arith.addf %20, %21 : vector<10x1xf32>
    %23 = math.rsqrt %22 : vector<10x1xf32>
    %24 = vector.broadcast %23 : vector<10x1xf32> to vector<10x32xf32>
    %25 = arith.mulf %15, %24 : vector<10x32xf32>
    %26 = vector.broadcast %8 : vector<1x32xf32> to vector<10x32xf32>
    %27 = arith.mulf %25, %26 : vector<10x32xf32>
    %28 = vector.broadcast %9 : vector<1x32xf32> to vector<10x32xf32>
    %29 = arith.addf %27, %28 : vector<10x32xf32>
    %c0_16 = arith.constant 0 : index
    %c0_17 = arith.constant 0 : index
    %30 = vector.load %arg7[%c0_16, %c0_17] : memref<10x32xf32, #tpu.memory_space<vmem>>, vector<10x32xf32>
    tpu.vector_store %arg7[%c0_16, %c0_17], %29 {strides = array<i32>} : memref<10x32xf32, #tpu.memory_space<vmem>>, vector<10x32xf32>,
    return
  }
  func.func @transform_0(%arg0: i32) -> (i32, i32) {
    %c0_i32 = arith.constant 0 : i32
    %c0_i32_0 = arith.constant 0 : i32
    %c0_i32_1 = arith.constant 0 : i32
    return %c0_i32, %c0_i32_0 : i32, i32
  }
  func.func @transform_1(%arg0: i32) -> (i32, i32) {
    %c0_i32 = arith.constant 0 : i32
    %c0_i32_0 = arith.constant 0 : i32
    %c0_i32_1 = arith.constant 0 : i32
    return %c0_i32, %c0_i32_0 : i32, i32
  }
  func.func @transform_2(%arg0: i32) -> (i32, i32) {
    %c0_i32 = arith.constant 0 : i32
    %c0_i32_0 = arith.constant 0 : i32
    %c0_i32_1 = arith.constant 0 : i32
    return %c0_i32, %c0_i32_0 : i32, i32
  }
  func.func @transform_3(%arg0: i32) -> (i32, i32) {
    %c0_i32 = arith.constant 0 : i32
    %c0_i32_0 = arith.constant 0 : i32
    %c0_i32_1 = arith.constant 0 : i32
    return %c0_i32, %c0_i32_0 : i32, i32
  }
  func.func @transform_4(%arg0: i32) -> (i32, i32) {
    %c0_i32 = arith.constant 0 : i32
    %c0_i32_0 = arith.constant 0 : i32
    %c0_i32_1 = arith.constant 0 : i32
    return %c0_i32, %c0_i32_0 : i32, i32
  }
  func.func @transform_5(%arg0: i32) -> (i32, i32) {
    %c0_i32 = arith.constant 0 : i32
    %c0_i32_0 = arith.constant 0 : i32
    %c0_i32_1 = arith.constant 0 : i32
    return %c0_i32, %c0_i32_0 : i32, i32
  }
  func.func @transform_6(%arg0: i32) -> (i32, i32) {
    %c0_i32 = arith.constant 0 : i32
    %c0_i32_0 = arith.constant 0 : i32
    %c0_i32_1 = arith.constant 0 : i32
    return %c0_i32, %c0_i32_0 : i32, i32
  }
}

module attributes {stable_mosaic.version = 11 : i64} {
  func.func @_ffn_res_ln_kernel(%arg0: i32, %arg1: memref<10x32xf32, #tpu.memory_space<vmem>>, %arg2: memref<32x32xf32, #tpu.memory_space<vmem>>, %arg3: memref<1x32xf32, #tpu.memory_space<vmem>>, %arg4: memref<32x32xf32, #tpu.memory_space<vmem>>, %arg5: memref<1x32xf32, #tpu.memory_space<vmem>>, %arg6: memref<1x32xf32, #tpu.memory_space<vmem>>, %arg7: memref<1x32xf32, #tpu.memory_space<vmem>>, %arg8: memref<10x32xf32, #tpu.memory_space<vmem>>) attributes {dimension_semantics = [#tpu.dimension_semantics<arbitrary>], iteration_bounds = array<i64: 1>, scalar_prefetch = 0 : i64, scratch_operands = 0 : i64, tpu.core_type = #tpu.core_type<tc>, window_params = [{pipeline_mode = #tpu.pipeline_mode<synchronous>, transform_indices = @transform_0, window_bounds = array<i64: 10, 32>}, {pipeline_mode = #tpu.pipeline_mode<synchronous>, transform_indices = @transform_1, window_bounds = array<i64: 32, 32>}, {pipeline_mode = #tpu.pipeline_mode<synchronous>, transform_indices = @transform_2, window_bounds = array<i64: 1, 32>}, {pipeline_mode = #tpu.pipeline_mode<synchronous>, transform_indices = @transform_3, window_bounds = array<i64: 32, 32>}, {pipeline_mode = #tpu.pipeline_mode<synchronous>, transform_indices = @transform_4, window_bounds = array<i64: 1, 32>}, {pipeline_mode = #tpu.pipeline_mode<synchronous>, transform_indices = @transform_5, window_bounds = array<i64: 1, 32>}, {pipeline_mode = #tpu.pipeline_mode<synchronous>, transform_indices = @transform_6, window_bounds = array<i64: 1, 32>}, {pipeline_mode = #tpu.pipeline_mode<synchronous>, transform_indices = @transform_7, window_bounds = array<i64: 10, 32>}]} {
    %c0 = arith.constant 0 : index
    %c0_0 = arith.constant 0 : index
    %0 = vector.load %arg1[%c0, %c0_0] : memref<10x32xf32, #tpu.memory_space<vmem>>, vector<10x32xf32>
    %c0_1 = arith.constant 0 : index
    %c0_2 = arith.constant 0 : index
    %1 = vector.load %arg2[%c0_1, %c0_2] : memref<32x32xf32, #tpu.memory_space<vmem>>, vector<32x32xf32>
    %cst = arith.constant dense<0.000000e+00> : vector<10x32xf32>
    %2 = tpu.matmul %0, %1, %cst {dimension_numbers = #tpu.dot_dimension_numbers<[1], [0], [0], [1], [0, 0, 1, 1], [], []>} : vector<10x32xf32>, vector<32x32xf32>, vector<10x32xf32> -> vector<10x32xf32>
    %c0_3 = arith.constant 0 : index
    %c0_4 = arith.constant 0 : index
    %3 = vector.load %arg3[%c0_3, %c0_4] : memref<1x32xf32, #tpu.memory_space<vmem>>, vector<1x32xf32>
    %4 = vector.broadcast %3 : vector<1x32xf32> to vector<10x32xf32>
    %5 = arith.addf %2, %4 : vector<10x32xf32>
    %cst_5 = arith.constant 5.000000e-01 : f32
    %6 = vector.broadcast %cst_5 : f32 to vector<10x32xf32>
    %7 = arith.mulf %6, %5 : vector<10x32xf32>
    %cst_6 = arith.constant 0.707106769 : f32
    %8 = vector.broadcast %cst_6 : f32 to vector<10x32xf32>
    %9 = arith.mulf %5, %8 : vector<10x32xf32>
    %10 = math.erf %9 : vector<10x32xf32>
    %cst_7 = arith.constant 1.000000e+00 : f32
    %11 = vector.broadcast %cst_7 : f32 to vector<10x32xf32>
    %12 = arith.addf %11, %10 : vector<10x32xf32>
    %13 = arith.mulf %7, %12 : vector<10x32xf32>
    %c0_8 = arith.constant 0 : index
    %c0_9 = arith.constant 0 : index
    %14 = vector.load %arg4[%c0_8, %c0_9] : memref<32x32xf32, #tpu.memory_space<vmem>>, vector<32x32xf32>
    %cst_10 = arith.constant dense<0.000000e+00> : vector<10x32xf32>
    %15 = tpu.matmul %13, %14, %cst_10 {dimension_numbers = #tpu.dot_dimension_numbers<[1], [0], [0], [1], [0, 0, 1, 1], [], []>} : vector<10x32xf32>, vector<32x32xf32>, vector<10x32xf32> -> vector<10x32xf32>
    %c0_11 = arith.constant 0 : index
    %c0_12 = arith.constant 0 : index
    %16 = vector.load %arg5[%c0_11, %c0_12] : memref<1x32xf32, #tpu.memory_space<vmem>>, vector<1x32xf32>
    %17 = vector.broadcast %16 : vector<1x32xf32> to vector<10x32xf32>
    %18 = arith.addf %15, %17 : vector<10x32xf32>
    %19 = arith.addf %0, %18 : vector<10x32xf32>
    %c0_13 = arith.constant 0 : index
    %c0_14 = arith.constant 0 : index
    %20 = vector.load %arg6[%c0_13, %c0_14] : memref<1x32xf32, #tpu.memory_space<vmem>>, vector<1x32xf32>
    %c0_15 = arith.constant 0 : index
    %c0_16 = arith.constant 0 : index
    %21 = vector.load %arg7[%c0_15, %c0_16] : memref<1x32xf32, #tpu.memory_space<vmem>>, vector<1x32xf32>
    %cst_17 = arith.constant dense<0.000000e+00> : vector<10xf32>
    %22 = vector.multi_reduction <add>, %19, %cst_17 [1] : vector<10x32xf32> to vector<10xf32>
    %23 = vector.shape_cast %22 : vector<10xf32> to vector<10x1xf32>
    %cst_18 = arith.constant 3.200000e+01 : f32
    %24 = vector.broadcast %cst_18 : f32 to vector<10x1xf32>
    %25 = arith.divf %23, %24 : vector<10x1xf32>
    %26 = vector.broadcast %25 : vector<10x1xf32> to vector<10x32xf32>
    %27 = arith.subf %19, %26 : vector<10x32xf32>
    %28 = arith.mulf %27, %27 : vector<10x32xf32>
    %cst_19 = arith.constant dense<0.000000e+00> : vector<10xf32>
    %29 = vector.multi_reduction <add>, %28, %cst_19 [1] : vector<10x32xf32> to vector<10xf32>
    %30 = vector.shape_cast %29 : vector<10xf32> to vector<10x1xf32>
    %cst_20 = arith.constant 3.200000e+01 : f32
    %31 = vector.broadcast %cst_20 : f32 to vector<10x1xf32>
    %32 = arith.divf %30, %31 : vector<10x1xf32>
    %cst_21 = arith.constant 9.99999974E-6 : f32
    %33 = vector.broadcast %cst_21 : f32 to vector<10x1xf32>
    %34 = arith.addf %32, %33 : vector<10x1xf32>
    %35 = math.rsqrt %34 : vector<10x1xf32>
    %36 = vector.broadcast %35 : vector<10x1xf32> to vector<10x32xf32>
    %37 = arith.mulf %27, %36 : vector<10x32xf32>
    %38 = vector.broadcast %20 : vector<1x32xf32> to vector<10x32xf32>
    %39 = arith.mulf %37, %38 : vector<10x32xf32>
    %40 = vector.broadcast %21 : vector<1x32xf32> to vector<10x32xf32>
    %41 = arith.addf %39, %40 : vector<10x32xf32>
    %c0_22 = arith.constant 0 : index
    %c0_23 = arith.constant 0 : index
    %42 = vector.load %arg8[%c0_22, %c0_23] : memref<10x32xf32, #tpu.memory_space<vmem>>, vector<10x32xf32>
    tpu.vector_store %arg8[%c0_22, %c0_23], %41 {strides = array<i32>} : memref<10x32xf32, #tpu.memory_space<vmem>>, vector<10x32xf32>,
    return
  }
  func.func @transform_0(%arg0: i32) -> (i32, i32) {
    %c0_i32 = arith.constant 0 : i32
    %c0_i32_0 = arith.constant 0 : i32
    %c0_i32_1 = arith.constant 0 : i32
    return %c0_i32, %c0_i32_0 : i32, i32
  }
  func.func @transform_1(%arg0: i32) -> (i32, i32) {
    %c0_i32 = arith.constant 0 : i32
    %c0_i32_0 = arith.constant 0 : i32
    %c0_i32_1 = arith.constant 0 : i32
    return %c0_i32, %c0_i32_0 : i32, i32
  }
  func.func @transform_2(%arg0: i32) -> (i32, i32) {
    %c0_i32 = arith.constant 0 : i32
    %c0_i32_0 = arith.constant 0 : i32
    %c0_i32_1 = arith.constant 0 : i32
    return %c0_i32, %c0_i32_0 : i32, i32
  }
  func.func @transform_3(%arg0: i32) -> (i32, i32) {
    %c0_i32 = arith.constant 0 : i32
    %c0_i32_0 = arith.constant 0 : i32
    %c0_i32_1 = arith.constant 0 : i32
    return %c0_i32, %c0_i32_0 : i32, i32
  }
  func.func @transform_4(%arg0: i32) -> (i32, i32) {
    %c0_i32 = arith.constant 0 : i32
    %c0_i32_0 = arith.constant 0 : i32
    %c0_i32_1 = arith.constant 0 : i32
    return %c0_i32, %c0_i32_0 : i32, i32
  }
  func.func @transform_5(%arg0: i32) -> (i32, i32) {
    %c0_i32 = arith.constant 0 : i32
    %c0_i32_0 = arith.constant 0 : i32
    %c0_i32_1 = arith.constant 0 : i32
    return %c0_i32, %c0_i32_0 : i32, i32
  }
  func.func @transform_6(%arg0: i32) -> (i32, i32) {
    %c0_i32 = arith.constant 0 : i32
    %c0_i32_0 = arith.constant 0 : i32
    %c0_i32_1 = arith.constant 0 : i32
    return %c0_i32, %c0_i32_0 : i32, i32
  }
  func.func @transform_7(%arg0: i32) -> (i32, i32) {
    %c0_i32 = arith.constant 0 : i32
    %c0_i32_0 = arith.constant 0 : i32
    %c0_i32_1 = arith.constant 0 : i32
    return %c0_i32, %c0_i32_0 : i32, i32
  }
}

module attributes {stable_mosaic.version = 11 : i64} {
  func.func @_ln_kernel(%arg0: i32, %arg1: memref<10x32xf32, #tpu.memory_space<vmem>>, %arg2: memref<1x32xf32, #tpu.memory_space<vmem>>, %arg3: memref<1x32xf32, #tpu.memory_space<vmem>>, %arg4: memref<10x32xf32, #tpu.memory_space<vmem>>) attributes {dimension_semantics = [#tpu.dimension_semantics<arbitrary>], iteration_bounds = array<i64: 1>, scalar_prefetch = 0 : i64, scratch_operands = 0 : i64, tpu.core_type = #tpu.core_type<tc>, window_params = [{pipeline_mode = #tpu.pipeline_mode<synchronous>, transform_indices = @transform_0, window_bounds = array<i64: 10, 32>}, {pipeline_mode = #tpu.pipeline_mode<synchronous>, transform_indices = @transform_1, window_bounds = array<i64: 1, 32>}, {pipeline_mode = #tpu.pipeline_mode<synchronous>, transform_indices = @transform_2, window_bounds = array<i64: 1, 32>}, {pipeline_mode = #tpu.pipeline_mode<synchronous>, transform_indices = @transform_3, window_bounds = array<i64: 10, 32>}]} {
    %c0 = arith.constant 0 : index
    %c0_0 = arith.constant 0 : index
    %0 = vector.load %arg1[%c0, %c0_0] : memref<10x32xf32, #tpu.memory_space<vmem>>, vector<10x32xf32>
    %c0_1 = arith.constant 0 : index
    %c0_2 = arith.constant 0 : index
    %1 = vector.load %arg2[%c0_1, %c0_2] : memref<1x32xf32, #tpu.memory_space<vmem>>, vector<1x32xf32>
    %c0_3 = arith.constant 0 : index
    %c0_4 = arith.constant 0 : index
    %2 = vector.load %arg3[%c0_3, %c0_4] : memref<1x32xf32, #tpu.memory_space<vmem>>, vector<1x32xf32>
    %cst = arith.constant dense<0.000000e+00> : vector<10xf32>
    %3 = vector.multi_reduction <add>, %0, %cst [1] : vector<10x32xf32> to vector<10xf32>
    %4 = vector.shape_cast %3 : vector<10xf32> to vector<10x1xf32>
    %cst_5 = arith.constant 3.200000e+01 : f32
    %5 = vector.broadcast %cst_5 : f32 to vector<10x1xf32>
    %6 = arith.divf %4, %5 : vector<10x1xf32>
    %7 = vector.broadcast %6 : vector<10x1xf32> to vector<10x32xf32>
    %8 = arith.subf %0, %7 : vector<10x32xf32>
    %9 = arith.mulf %8, %8 : vector<10x32xf32>
    %cst_6 = arith.constant dense<0.000000e+00> : vector<10xf32>
    %10 = vector.multi_reduction <add>, %9, %cst_6 [1] : vector<10x32xf32> to vector<10xf32>
    %11 = vector.shape_cast %10 : vector<10xf32> to vector<10x1xf32>
    %cst_7 = arith.constant 3.200000e+01 : f32
    %12 = vector.broadcast %cst_7 : f32 to vector<10x1xf32>
    %13 = arith.divf %11, %12 : vector<10x1xf32>
    %cst_8 = arith.constant 9.99999974E-6 : f32
    %14 = vector.broadcast %cst_8 : f32 to vector<10x1xf32>
    %15 = arith.addf %13, %14 : vector<10x1xf32>
    %16 = math.rsqrt %15 : vector<10x1xf32>
    %17 = vector.broadcast %16 : vector<10x1xf32> to vector<10x32xf32>
    %18 = arith.mulf %8, %17 : vector<10x32xf32>
    %19 = vector.broadcast %1 : vector<1x32xf32> to vector<10x32xf32>
    %20 = arith.mulf %18, %19 : vector<10x32xf32>
    %21 = vector.broadcast %2 : vector<1x32xf32> to vector<10x32xf32>
    %22 = arith.addf %20, %21 : vector<10x32xf32>
    %c0_9 = arith.constant 0 : index
    %c0_10 = arith.constant 0 : index
    %23 = vector.load %arg4[%c0_9, %c0_10] : memref<10x32xf32, #tpu.memory_space<vmem>>, vector<10x32xf32>
    tpu.vector_store %arg4[%c0_9, %c0_10], %22 {strides = array<i32>} : memref<10x32xf32, #tpu.memory_space<vmem>>, vector<10x32xf32>,
    return
  }
  func.func @transform_0(%arg0: i32) -> (i32, i32) {
    %c0_i32 = arith.constant 0 : i32
    %c0_i32_0 = arith.constant 0 : i32
    %c0_i32_1 = arith.constant 0 : i32
    return %c0_i32, %c0_i32_0 : i32, i32
  }
  func.func @transform_1(%arg0: i32) -> (i32, i32) {
    %c0_i32 = arith.constant 0 : i32
    %c0_i32_0 = arith.constant 0 : i32
    %c0_i32_1 = arith.constant 0 : i32
    return %c0_i32, %c0_i32_0 : i32, i32
  }
  func.func @transform_2(%arg0: i32) -> (i32, i32) {
    %c0_i32 = arith.constant 0 : i32
    %c0_i32_0 = arith.constant 0 : i32
    %c0_i32_1 = arith.constant 0 : i32
    return %c0_i32, %c0_i32_0 : i32, i32
  }
  func.func @transform_3(%arg0: i32) -> (i32, i32) {
    %c0_i32 = arith.constant 0 : i32
    %c0_i32_0 = arith.constant 0 : i32
    %c0_i32_1 = arith.constant 0 : i32
    return %c0_i32, %c0_i32_0 : i32, i32
  }
}

module attributes {stable_mosaic.version = 11 : i64} {
  func.func @_attn_kernel(%arg0: i32, %arg1: memref<8x8x8xf32, #tpu.memory_space<vmem>>, %arg2: memref<8x8x8xf32, #tpu.memory_space<vmem>>, %arg3: memref<8x8x8xf32, #tpu.memory_space<vmem>>, %arg4: memref<8x8x8xf32, #tpu.memory_space<vmem>>) attributes {dimension_semantics = [#tpu.dimension_semantics<arbitrary>], iteration_bounds = array<i64: 1>, scalar_prefetch = 0 : i64, scratch_operands = 0 : i64, tpu.core_type = #tpu.core_type<tc>, window_params = [{pipeline_mode = #tpu.pipeline_mode<synchronous>, transform_indices = @transform_0, window_bounds = array<i64: 8, 8, 8>}, {pipeline_mode = #tpu.pipeline_mode<synchronous>, transform_indices = @transform_1, window_bounds = array<i64: 8, 8, 8>}, {pipeline_mode = #tpu.pipeline_mode<synchronous>, transform_indices = @transform_2, window_bounds = array<i64: 8, 8, 8>}, {pipeline_mode = #tpu.pipeline_mode<synchronous>, transform_indices = @transform_3, window_bounds = array<i64: 8, 8, 8>}]} {
    %c0 = arith.constant 0 : index
    %c0_0 = arith.constant 0 : index
    %c0_1 = arith.constant 0 : index
    %0 = vector.load %arg1[%c0, %c0_0, %c0_1] : memref<8x8x8xf32, #tpu.memory_space<vmem>>, vector<8x8x8xf32>
    %c0_2 = arith.constant 0 : index
    %c0_3 = arith.constant 0 : index
    %c0_4 = arith.constant 0 : index
    %1 = vector.load %arg2[%c0_2, %c0_3, %c0_4] : memref<8x8x8xf32, #tpu.memory_space<vmem>>, vector<8x8x8xf32>
    %c0_5 = arith.constant 0 : index
    %c0_6 = arith.constant 0 : index
    %c0_7 = arith.constant 0 : index
    %2 = vector.load %arg3[%c0_5, %c0_6, %c0_7] : memref<8x8x8xf32, #tpu.memory_space<vmem>>, vector<8x8x8xf32>
    "tpu.trace_start"() <{level = 10 : i32, message = "bld,bsd->bls"}> : () -> ()
    %cst = arith.constant dense<0.000000e+00> : vector<8x8x8xf32>
    %3 = tpu.matmul %0, %1, %cst {dimension_numbers = #tpu.dot_dimension_numbers<[2], [2], [1], [1], [0, 0, 0, 1, 1, 1], [0], [0]>} : vector<8x8x8xf32>, vector<8x8x8xf32>, vector<8x8x8xf32> -> vector<8x8x8xf32>
    "tpu.trace_stop"() : () -> ()
    %cst_8 = arith.constant 0.353553385 : f32
    %4 = vector.broadcast %cst_8 : f32 to vector<8x8x8xf32>
    %5 = arith.mulf %3, %4 : vector<8x8x8xf32>
    %6 = tpu.iota {dimensions = array<i32: 0>} : vector<8x8xi32>
    %7 = tpu.iota {dimensions = array<i32: 1>} : vector<8x8xi32>
    %8 = arith.cmpi sgt, %7, %6 : vector<8x8xi32>
    %9 = vector.shape_cast %8 : vector<8x8xi1> to vector<1x8x8xi1>
    %cst_9 = arith.constant 0xFF800000 : f32
    %10 = vector.shape_cast %9 : vector<1x8x8xi1> to vector<1x8x8xi1>
    %11 = vector.broadcast %10 : vector<1x8x8xi1> to vector<8x8x8xi1>
    %12 = vector.broadcast %cst_9 : f32 to vector<8x8x8xf32>
    %13 = arith.select %11, %12, %5 : vector<8x8x8xi1>, vector<8x8x8xf32>
    %cst_10 = arith.constant dense<0xFF800000> : vector<8x8xf32>
    %14 = vector.multi_reduction <maximumf>, %13, %cst_10 [2] : vector<8x8x8xf32> to vector<8x8xf32>
    %15 = vector.shape_cast %14 : vector<8x8xf32> to vector<8x8x1xf32>
    %16 = vector.broadcast %15 : vector<8x8x1xf32> to vector<8x8x8xf32>
    %17 = arith.subf %13, %16 : vector<8x8x8xf32>
    %18 = math.exp %17 : vector<8x8x8xf32>
    %cst_11 = arith.constant dense<0.000000e+00> : vector<8x8xf32>
    %19 = vector.multi_reduction <add>, %18, %cst_11 [2] : vector<8x8x8xf32> to vector<8x8xf32>
    %20 = vector.shape_cast %19 : vector<8x8xf32> to vector<8x8x1xf32>
    %21 = tpu.reciprocal %20 {approx = true} : vector<8x8x1xf32> -> vector<8x8x1xf32>
    %22 = vector.broadcast %21 : vector<8x8x1xf32> to vector<8x8x8xf32>
    %23 = arith.mulf %18, %22 : vector<8x8x8xf32>
    "tpu.trace_start"() <{level = 10 : i32, message = "bls,bsd->bld"}> : () -> ()
    %cst_12 = arith.constant dense<0.000000e+00> : vector<8x8x8xf32>
    %24 = tpu.matmul %23, %2, %cst_12 {dimension_numbers = #tpu.dot_dimension_numbers<[2], [1], [1], [2], [0, 0, 0, 1, 1, 2], [0], [0]>} : vector<8x8x8xf32>, vector<8x8x8xf32>, vector<8x8x8xf32> -> vector<8x8x8xf32>
    "tpu.trace_stop"() : () -> ()
    %c0_13 = arith.constant 0 : index
    %c0_14 = arith.constant 0 : index
    %c0_15 = arith.constant 0 : index
    %25 = vector.load %arg4[%c0_13, %c0_14, %c0_15] : memref<8x8x8xf32, #tpu.memory_space<vmem>>, vector<8x8x8xf32>
    tpu.vector_store %arg4[%c0_13, %c0_14, %c0_15], %24 {strides = array<i32>} : memref<8x8x8xf32, #tpu.memory_space<vmem>>, vector<8x8x8xf32>,
    return
  }
  func.func @transform_0(%arg0: i32) -> (i32, i32, i32) {
    %c0_i32 = arith.constant 0 : i32
    %c0_i32_0 = arith.constant 0 : i32
    %c0_i32_1 = arith.constant 0 : i32
    %c0_i32_2 = arith.constant 0 : i32
    return %c0_i32, %c0_i32_0, %c0_i32_1 : i32, i32, i32
  }
  func.func @transform_1(%arg0: i32) -> (i32, i32, i32) {
    %c0_i32 = arith.constant 0 : i32
    %c0_i32_0 = arith.constant 0 : i32
    %c0_i32_1 = arith.constant 0 : i32
    %c0_i32_2 = arith.constant 0 : i32
    return %c0_i32, %c0_i32_0, %c0_i32_1 : i32, i32, i32
  }
  func.func @transform_2(%arg0: i32) -> (i32, i32, i32) {
    %c0_i32 = arith.constant 0 : i32
    %c0_i32_0 = arith.constant 0 : i32
    %c0_i32_1 = arith.constant 0 : i32
    %c0_i32_2 = arith.constant 0 : i32
    return %c0_i32, %c0_i32_0, %c0_i32_1 : i32, i32, i32
  }
  func.func @transform_3(%arg0: i32) -> (i32, i32, i32) {
    %c0_i32 = arith.constant 0 : i32
    %c0_i32_0 = arith.constant 0 : i32
    %c0_i32_1 = arith.constant 0 : i32
    %c0_i32_2 = arith.constant 0 : i32
    return %c0_i32, %c0_i32_0, %c0_i32_1 : i32, i32, i32
  }
}

module attributes {stable_mosaic.version = 11 : i64} {
  func.func @_attn_kernel(%arg0: i32, %arg1: memref<8x8x8xf32, #tpu.memory_space<vmem>>, %arg2: memref<8x5x8xf32, #tpu.memory_space<vmem>>, %arg3: memref<8x5x8xf32, #tpu.memory_space<vmem>>, %arg4: memref<8x8x8xf32, #tpu.memory_space<vmem>>) attributes {dimension_semantics = [#tpu.dimension_semantics<arbitrary>], iteration_bounds = array<i64: 1>, scalar_prefetch = 0 : i64, scratch_operands = 0 : i64, tpu.core_type = #tpu.core_type<tc>, window_params = [{pipeline_mode = #tpu.pipeline_mode<synchronous>, transform_indices = @transform_0, window_bounds = array<i64: 8, 8, 8>}, {pipeline_mode = #tpu.pipeline_mode<synchronous>, transform_indices = @transform_1, window_bounds = array<i64: 8, 5, 8>}, {pipeline_mode = #tpu.pipeline_mode<synchronous>, transform_indices = @transform_2, window_bounds = array<i64: 8, 5, 8>}, {pipeline_mode = #tpu.pipeline_mode<synchronous>, transform_indices = @transform_3, window_bounds = array<i64: 8, 8, 8>}]} {
    %c0 = arith.constant 0 : index
    %c0_0 = arith.constant 0 : index
    %c0_1 = arith.constant 0 : index
    %0 = vector.load %arg1[%c0, %c0_0, %c0_1] : memref<8x8x8xf32, #tpu.memory_space<vmem>>, vector<8x8x8xf32>
    %c0_2 = arith.constant 0 : index
    %c0_3 = arith.constant 0 : index
    %c0_4 = arith.constant 0 : index
    %1 = vector.load %arg2[%c0_2, %c0_3, %c0_4] : memref<8x5x8xf32, #tpu.memory_space<vmem>>, vector<8x5x8xf32>
    %c0_5 = arith.constant 0 : index
    %c0_6 = arith.constant 0 : index
    %c0_7 = arith.constant 0 : index
    %2 = vector.load %arg3[%c0_5, %c0_6, %c0_7] : memref<8x5x8xf32, #tpu.memory_space<vmem>>, vector<8x5x8xf32>
    "tpu.trace_start"() <{level = 10 : i32, message = "bld,bsd->bls"}> : () -> ()
    %cst = arith.constant dense<0.000000e+00> : vector<8x8x5xf32>
    %3 = tpu.matmul %0, %1, %cst {dimension_numbers = #tpu.dot_dimension_numbers<[2], [2], [1], [1], [0, 0, 0, 1, 1, 1], [0], [0]>} : vector<8x8x8xf32>, vector<8x5x8xf32>, vector<8x8x5xf32> -> vector<8x8x5xf32>
    "tpu.trace_stop"() : () -> ()
    %cst_8 = arith.constant 0.353553385 : f32
    %4 = vector.broadcast %cst_8 : f32 to vector<8x8x5xf32>
    %5 = arith.mulf %3, %4 : vector<8x8x5xf32>
    %cst_9 = arith.constant dense<0xFF800000> : vector<8x8xf32>
    %6 = vector.multi_reduction <maximumf>, %5, %cst_9 [2] : vector<8x8x5xf32> to vector<8x8xf32>
    %7 = vector.shape_cast %6 : vector<8x8xf32> to vector<8x8x1xf32>
    %8 = vector.broadcast %7 : vector<8x8x1xf32> to vector<8x8x5xf32>
    %9 = arith.subf %5, %8 : vector<8x8x5xf32>
    %10 = math.exp %9 : vector<8x8x5xf32>
    %cst_10 = arith.constant dense<0.000000e+00> : vector<8x8xf32>
    %11 = vector.multi_reduction <add>, %10, %cst_10 [2] : vector<8x8x5xf32> to vector<8x8xf32>
    %12 = vector.shape_cast %11 : vector<8x8xf32> to vector<8x8x1xf32>
    %13 = tpu.reciprocal %12 {approx = true} : vector<8x8x1xf32> -> vector<8x8x1xf32>
    %14 = vector.broadcast %13 : vector<8x8x1xf32> to vector<8x8x5xf32>
    %15 = arith.mulf %10, %14 : vector<8x8x5xf32>
    "tpu.trace_start"() <{level = 10 : i32, message = "bls,bsd->bld"}> : () -> ()
    %cst_11 = arith.constant dense<0.000000e+00> : vector<8x8x8xf32>
    %16 = tpu.matmul %15, %2, %cst_11 {dimension_numbers = #tpu.dot_dimension_numbers<[2], [1], [1], [2], [0, 0, 0, 1, 1, 2], [0], [0]>} : vector<8x8x5xf32>, vector<8x5x8xf32>, vector<8x8x8xf32> -> vector<8x8x8xf32>
    "tpu.trace_stop"() : () -> ()
    %c0_12 = arith.constant 0 : index
    %c0_13 = arith.constant 0 : index
    %c0_14 = arith.constant 0 : index
    %17 = vector.load %arg4[%c0_12, %c0_13, %c0_14] : memref<8x8x8xf32, #tpu.memory_space<vmem>>, vector<8x8x8xf32>
    tpu.vector_store %arg4[%c0_12, %c0_13, %c0_14], %16 {strides = array<i32>} : memref<8x8x8xf32, #tpu.memory_space<vmem>>, vector<8x8x8xf32>,
    return
  }
  func.func @transform_0(%arg0: i32) -> (i32, i32, i32) {
    %c0_i32 = arith.constant 0 : i32
    %c0_i32_0 = arith.constant 0 : i32
    %c0_i32_1 = arith.constant 0 : i32
    %c0_i32_2 = arith.constant 0 : i32
    return %c0_i32, %c0_i32_0, %c0_i32_1 : i32, i32, i32
  }
  func.func @transform_1(%arg0: i32) -> (i32, i32, i32) {
    %c0_i32 = arith.constant 0 : i32
    %c0_i32_0 = arith.constant 0 : i32
    %c0_i32_1 = arith.constant 0 : i32
    %c0_i32_2 = arith.constant 0 : i32
    return %c0_i32, %c0_i32_0, %c0_i32_1 : i32, i32, i32
  }
  func.func @transform_2(%arg0: i32) -> (i32, i32, i32) {
    %c0_i32 = arith.constant 0 : i32
    %c0_i32_0 = arith.constant 0 : i32
    %c0_i32_1 = arith.constant 0 : i32
    %c0_i32_2 = arith.constant 0 : i32
    return %c0_i32, %c0_i32_0, %c0_i32_1 : i32, i32, i32
  }
  func.func @transform_3(%arg0: i32) -> (i32, i32, i32) {
    %c0_i32 = arith.constant 0 : i32
    %c0_i32_0 = arith.constant 0 : i32
    %c0_i32_1 = arith.constant 0 : i32
    %c0_i32_2 = arith.constant 0 : i32
    return %c0_i32, %c0_i32_0, %c0_i32_1 : i32, i32, i32
  }
}

module attributes {stable_mosaic.version = 11 : i64} {
  func.func @_qkv_kernel(%arg0: i32, %arg1: memref<16x32xf32, #tpu.memory_space<vmem>>, %arg2: memref<10x32xf32, #tpu.memory_space<vmem>>, %arg3: memref<32x32xf32, #tpu.memory_space<vmem>>, %arg4: memref<1x32xf32, #tpu.memory_space<vmem>>, %arg5: memref<32x64xf32, #tpu.memory_space<vmem>>, %arg6: memref<1x64xf32, #tpu.memory_space<vmem>>, %arg7: memref<16x32xf32, #tpu.memory_space<vmem>>, %arg8: memref<10x64xf32, #tpu.memory_space<vmem>>) attributes {dimension_semantics = [#tpu.dimension_semantics<arbitrary>], iteration_bounds = array<i64: 1>, scalar_prefetch = 0 : i64, scratch_operands = 0 : i64, tpu.core_type = #tpu.core_type<tc>, window_params = [{pipeline_mode = #tpu.pipeline_mode<synchronous>, transform_indices = @transform_0, window_bounds = array<i64: 16, 32>}, {pipeline_mode = #tpu.pipeline_mode<synchronous>, transform_indices = @transform_1, window_bounds = array<i64: 10, 32>}, {pipeline_mode = #tpu.pipeline_mode<synchronous>, transform_indices = @transform_2, window_bounds = array<i64: 32, 32>}, {pipeline_mode = #tpu.pipeline_mode<synchronous>, transform_indices = @transform_3, window_bounds = array<i64: 1, 32>}, {pipeline_mode = #tpu.pipeline_mode<synchronous>, transform_indices = @transform_4, window_bounds = array<i64: 32, 64>}, {pipeline_mode = #tpu.pipeline_mode<synchronous>, transform_indices = @transform_5, window_bounds = array<i64: 1, 64>}, {pipeline_mode = #tpu.pipeline_mode<synchronous>, transform_indices = @transform_6, window_bounds = array<i64: 16, 32>}, {pipeline_mode = #tpu.pipeline_mode<synchronous>, transform_indices = @transform_7, window_bounds = array<i64: 10, 64>}]} {
    %c0 = arith.constant 0 : index
    %c0_0 = arith.constant 0 : index
    %0 = vector.load %arg1[%c0, %c0_0] : memref<16x32xf32, #tpu.memory_space<vmem>>, vector<16x32xf32>
    %c0_1 = arith.constant 0 : index
    %c0_2 = arith.constant 0 : index
    %1 = vector.load %arg3[%c0_1, %c0_2] : memref<32x32xf32, #tpu.memory_space<vmem>>, vector<32x32xf32>
    %cst = arith.constant dense<0.000000e+00> : vector<16x32xf32>
    %2 = tpu.matmul %0, %1, %cst {dimension_numbers = #tpu.dot_dimension_numbers<[1], [0], [0], [1], [0, 0, 1, 1], [], []>} : vector<16x32xf32>, vector<32x32xf32>, vector<16x32xf32> -> vector<16x32xf32>
    %c0_3 = arith.constant 0 : index
    %c0_4 = arith.constant 0 : index
    %3 = vector.load %arg4[%c0_3, %c0_4] : memref<1x32xf32, #tpu.memory_space<vmem>>, vector<1x32xf32>
    %4 = vector.broadcast %3 : vector<1x32xf32> to vector<16x32xf32>
    %5 = arith.addf %2, %4 : vector<16x32xf32>
    %c0_5 = arith.constant 0 : index
    %c0_6 = arith.constant 0 : index
    %6 = vector.load %arg7[%c0_5, %c0_6] : memref<16x32xf32, #tpu.memory_space<vmem>>, vector<16x32xf32>
    tpu.vector_store %arg7[%c0_5, %c0_6], %5 {strides = array<i32>} : memref<16x32xf32, #tpu.memory_space<vmem>>, vector<16x32xf32>,
    %c0_7 = arith.constant 0 : index
    %c0_8 = arith.constant 0 : index
    %7 = vector.load %arg2[%c0_7, %c0_8] : memref<10x32xf32, #tpu.memory_space<vmem>>, vector<10x32xf32>
    %c0_9 = arith.constant 0 : index
    %c0_10 = arith.constant 0 : index
    %8 = vector.load %arg5[%c0_9, %c0_10] : memref<32x64xf32, #tpu.memory_space<vmem>>, vector<32x64xf32>
    %cst_11 = arith.constant dense<0.000000e+00> : vector<10x64xf32>
    %9 = tpu.matmul %7, %8, %cst_11 {dimension_numbers = #tpu.dot_dimension_numbers<[1], [0], [0], [1], [0, 0, 1, 1], [], []>} : vector<10x32xf32>, vector<32x64xf32>, vector<10x64xf32> -> vector<10x64xf32>
    %c0_12 = arith.constant 0 : index
    %c0_13 = arith.constant 0 : index
    %10 = vector.load %arg6[%c0_12, %c0_13] : memref<1x64xf32, #tpu.memory_space<vmem>>, vector<1x64xf32>
    %11 = vector.broadcast %10 : vector<1x64xf32> to vector<10x64xf32>
    %12 = arith.addf %9, %11 : vector<10x64xf32>
    %c0_14 = arith.constant 0 : index
    %c0_15 = arith.constant 0 : index
    %13 = vector.load %arg8[%c0_14, %c0_15] : memref<10x64xf32, #tpu.memory_space<vmem>>, vector<10x64xf32>
    tpu.vector_store %arg8[%c0_14, %c0_15], %12 {strides = array<i32>} : memref<10x64xf32, #tpu.memory_space<vmem>>, vector<10x64xf32>,
    return
  }
  func.func @transform_0(%arg0: i32) -> (i32, i32) {
    %c0_i32 = arith.constant 0 : i32
    %c0_i32_0 = arith.constant 0 : i32
    %c0_i32_1 = arith.constant 0 : i32
    return %c0_i32, %c0_i32_0 : i32, i32
  }
  func.func @transform_1(%arg0: i32) -> (i32, i32) {
    %c0_i32 = arith.constant 0 : i32
    %c0_i32_0 = arith.constant 0 : i32
    %c0_i32_1 = arith.constant 0 : i32
    return %c0_i32, %c0_i32_0 : i32, i32
  }
  func.func @transform_2(%arg0: i32) -> (i32, i32) {
    %c0_i32 = arith.constant 0 : i32
    %c0_i32_0 = arith.constant 0 : i32
    %c0_i32_1 = arith.constant 0 : i32
    return %c0_i32, %c0_i32_0 : i32, i32
  }
  func.func @transform_3(%arg0: i32) -> (i32, i32) {
    %c0_i32 = arith.constant 0 : i32
    %c0_i32_0 = arith.constant 0 : i32
    %c0_i32_1 = arith.constant 0 : i32
    return %c0_i32, %c0_i32_0 : i32, i32
  }
  func.func @transform_4(%arg0: i32) -> (i32, i32) {
    %c0_i32 = arith.constant 0 : i32
    %c0_i32_0 = arith.constant 0 : i32
    %c0_i32_1 = arith.constant 0 : i32
    return %c0_i32, %c0_i32_0 : i32, i32
  }
  func.func @transform_5(%arg0: i32) -> (i32, i32) {
    %c0_i32 = arith.constant 0 : i32
    %c0_i32_0 = arith.constant 0 : i32
    %c0_i32_1 = arith.constant 0 : i32
    return %c0_i32, %c0_i32_0 : i32, i32
  }
  func.func @transform_6(%arg0: i32) -> (i32, i32) {
    %c0_i32 = arith.constant 0 : i32
    %c0_i32_0 = arith.constant 0 : i32
    %c0_i32_1 = arith.constant 0 : i32
    return %c0_i32, %c0_i32_0 : i32, i32
  }
  func.func @transform_7(%arg0: i32) -> (i32, i32) {
    %c0_i32 = arith.constant 0 : i32
    %c0_i32_0 = arith.constant 0 : i32
    %c0_i32_1 = arith.constant 0 : i32
    return %c0_i32, %c0_i32_0 : i32, i32
  }
}

module attributes {stable_mosaic.version = 11 : i64} {
  func.func @_ln_linear_kernel(%arg0: i32, %arg1: memref<16x32xf32, #tpu.memory_space<vmem>>, %arg2: memref<1x32xf32, #tpu.memory_space<vmem>>, %arg3: memref<1x32xf32, #tpu.memory_space<vmem>>, %arg4: memref<32x4xf32, #tpu.memory_space<vmem>>, %arg5: memref<1x4xf32, #tpu.memory_space<vmem>>, %arg6: memref<16x4xf32, #tpu.memory_space<vmem>>) attributes {dimension_semantics = [#tpu.dimension_semantics<arbitrary>], iteration_bounds = array<i64: 1>, scalar_prefetch = 0 : i64, scratch_operands = 0 : i64, tpu.core_type = #tpu.core_type<tc>, window_params = [{pipeline_mode = #tpu.pipeline_mode<synchronous>, transform_indices = @transform_0, window_bounds = array<i64: 16, 32>}, {pipeline_mode = #tpu.pipeline_mode<synchronous>, transform_indices = @transform_1, window_bounds = array<i64: 1, 32>}, {pipeline_mode = #tpu.pipeline_mode<synchronous>, transform_indices = @transform_2, window_bounds = array<i64: 1, 32>}, {pipeline_mode = #tpu.pipeline_mode<synchronous>, transform_indices = @transform_3, window_bounds = array<i64: 32, 4>}, {pipeline_mode = #tpu.pipeline_mode<synchronous>, transform_indices = @transform_4, window_bounds = array<i64: 1, 4>}, {pipeline_mode = #tpu.pipeline_mode<synchronous>, transform_indices = @transform_5, window_bounds = array<i64: 16, 4>}]} {
    %c0 = arith.constant 0 : index
    %c0_0 = arith.constant 0 : index
    %0 = vector.load %arg1[%c0, %c0_0] : memref<16x32xf32, #tpu.memory_space<vmem>>, vector<16x32xf32>
    %c0_1 = arith.constant 0 : index
    %c0_2 = arith.constant 0 : index
    %1 = vector.load %arg2[%c0_1, %c0_2] : memref<1x32xf32, #tpu.memory_space<vmem>>, vector<1x32xf32>
    %c0_3 = arith.constant 0 : index
    %c0_4 = arith.constant 0 : index
    %2 = vector.load %arg3[%c0_3, %c0_4] : memref<1x32xf32, #tpu.memory_space<vmem>>, vector<1x32xf32>
    %cst = arith.constant dense<0.000000e+00> : vector<16xf32>
    %3 = vector.multi_reduction <add>, %0, %cst [1] : vector<16x32xf32> to vector<16xf32>
    %4 = vector.shape_cast %3 : vector<16xf32> to vector<16x1xf32>
    %cst_5 = arith.constant 3.200000e+01 : f32
    %5 = vector.broadcast %cst_5 : f32 to vector<16x1xf32>
    %6 = arith.divf %4, %5 : vector<16x1xf32>
    %7 = vector.broadcast %6 : vector<16x1xf32> to vector<16x32xf32>
    %8 = arith.subf %0, %7 : vector<16x32xf32>
    %9 = arith.mulf %8, %8 : vector<16x32xf32>
    %cst_6 = arith.constant dense<0.000000e+00> : vector<16xf32>
    %10 = vector.multi_reduction <add>, %9, %cst_6 [1] : vector<16x32xf32> to vector<16xf32>
    %11 = vector.shape_cast %10 : vector<16xf32> to vector<16x1xf32>
    %cst_7 = arith.constant 3.200000e+01 : f32
    %12 = vector.broadcast %cst_7 : f32 to vector<16x1xf32>
    %13 = arith.divf %11, %12 : vector<16x1xf32>
    %cst_8 = arith.constant 9.99999974E-6 : f32
    %14 = vector.broadcast %cst_8 : f32 to vector<16x1xf32>
    %15 = arith.addf %13, %14 : vector<16x1xf32>
    %16 = math.rsqrt %15 : vector<16x1xf32>
    %17 = vector.broadcast %16 : vector<16x1xf32> to vector<16x32xf32>
    %18 = arith.mulf %8, %17 : vector<16x32xf32>
    %19 = vector.broadcast %1 : vector<1x32xf32> to vector<16x32xf32>
    %20 = arith.mulf %18, %19 : vector<16x32xf32>
    %21 = vector.broadcast %2 : vector<1x32xf32> to vector<16x32xf32>
    %22 = arith.addf %20, %21 : vector<16x32xf32>
    %c0_9 = arith.constant 0 : index
    %c0_10 = arith.constant 0 : index
    %23 = vector.load %arg4[%c0_9, %c0_10] : memref<32x4xf32, #tpu.memory_space<vmem>>, vector<32x4xf32>
    %cst_11 = arith.constant dense<0.000000e+00> : vector<16x4xf32>
    %24 = tpu.matmul %22, %23, %cst_11 {dimension_numbers = #tpu.dot_dimension_numbers<[1], [0], [0], [1], [0, 0, 1, 1], [], []>} : vector<16x32xf32>, vector<32x4xf32>, vector<16x4xf32> -> vector<16x4xf32>
    %c0_12 = arith.constant 0 : index
    %c0_13 = arith.constant 0 : index
    %25 = vector.load %arg5[%c0_12, %c0_13] : memref<1x4xf32, #tpu.memory_space<vmem>>, vector<1x4xf32>
    %26 = vector.broadcast %25 : vector<1x4xf32> to vector<16x4xf32>
    %27 = arith.addf %24, %26 : vector<16x4xf32>
    %c0_14 = arith.constant 0 : index
    %c0_15 = arith.constant 0 : index
    %28 = vector.load %arg6[%c0_14, %c0_15] : memref<16x4xf32, #tpu.memory_space<vmem>>, vector<16x4xf32>
    tpu.vector_store %arg6[%c0_14, %c0_15], %27 {strides = array<i32>} : memref<16x4xf32, #tpu.memory_space<vmem>>, vector<16x4xf32>,
    return
  }
  func.func @transform_0(%arg0: i32) -> (i32, i32) {
    %c0_i32 = arith.constant 0 : i32
    %c0_i32_0 = arith.constant 0 : i32
    %c0_i32_1 = arith.constant 0 : i32
    return %c0_i32, %c0_i32_0 : i32, i32
  }
  func.func @transform_1(%arg0: i32) -> (i32, i32) {
    %c0_i32 = arith.constant 0 : i32
    %c0_i32_0 = arith.constant 0 : i32
    %c0_i32_1 = arith.constant 0 : i32
    return %c0_i32, %c0_i32_0 : i32, i32
  }
  func.func @transform_2(%arg0: i32) -> (i32, i32) {
    %c0_i32 = arith.constant 0 : i32
    %c0_i32_0 = arith.constant 0 : i32
    %c0_i32_1 = arith.constant 0 : i32
    return %c0_i32, %c0_i32_0 : i32, i32
  }
  func.func @transform_3(%arg0: i32) -> (i32, i32) {
    %c0_i32 = arith.constant 0 : i32
    %c0_i32_0 = arith.constant 0 : i32
    %c0_i32_1 = arith.constant 0 : i32
    return %c0_i32, %c0_i32_0 : i32, i32
  }
  func.func @transform_4(%arg0: i32) -> (i32, i32) {
    %c0_i32 = arith.constant 0 : i32
    %c0_i32_0 = arith.constant 0 : i32
    %c0_i32_1 = arith.constant 0 : i32
    return %c0_i32, %c0_i32_0 : i32, i32
  }
  func.func @transform_5(%arg0: i32) -> (i32, i32) {
    %c0_i32 = arith.constant 0 : i32
    %c0_i32_0 = arith.constant 0 : i32
    %c0_i32_1 = arith.constant 0 : i32
    return %c0_i32, %c0_i32_0 : i32, i32
  }
}

</mosaic_0001>

<bundles_post_ra>
// kernel: informer_forward.20
= control target key start
LH: loop header
LB: loop body
LE: loop exit
PB: predicated region body
PF: predicated region fallthrough
CT: control target
= control target key end

     0   :  { %vm35_vm0 = vcmask 1043456   ;;  %vm28_vm1 = vcmask 97280   ;;  %vm147_vm2 = vmmov 1   ;;  %vm118_vm4 = vcmask 261120   ;;  %s200_s1 = inlined_call_operand.vmem [shape: f32[12,32], index: 1, kind: input, shape index: {}]   ;;  %s201_s0 = inlined_call_operand.vmem [shape: f32[16,12], index: 0, kind: input, shape index: {}]   ;;  %s202_s2 = inlined_call_operand.vmem [shape: f32[1,32], index: 2, kind: input, shape index: {}]   ;;  %s203_s3 = inlined_call_operand.vmem [shape: f32[16,32], index: 3, kind: input, shape index: {}]   ;;  %s204_s4 = inlined_call_operand.vmem [shape: f32[16,32], index: 4, kind: output, shape index: {}]  }
   0x1   :  { %v19_v0 = vld [vmem:[%s200_s1] sm:$0xff]  ;;  %v20_v1 = vld [vmem:[%s200_s1 + $0x8] sm:$0xf]  ;;  %vm141_vm3 = vmpackc.low %vm35_vm0, %vm147_vm2 }
   0x2   :  { %v140_v2 = vpack.c.bf16 %v20_v1, %v19_v0  ;;  %v17_v3 = vld [vmem:[%s201_s0] sm:$0xff]  ;;  %v18_v4 = vld [vmem:[%s201_s0 + $0x8] sm:$0xff] }
   0x3   :  { %137 = vmatprep.mubr.msk.f32.mxu0 %vm28_vm1, %v17_v3  ;;  %v125_v5 = vld [vmem:[%s202_s2] ss:$0 sm:$0xff]  ;;  %v115_v7 = vld [vmem:[%s203_s3 + $0x8] sm:$0xff] }
   0x4   :  { %142 = vmatprep.subr.msk.bf16.mxu0 %vm141_vm3, %v140_v2  ;;  %v114_v10 = vld [vmem:[%s203_s3] sm:$0xff] }
   0x5   :  { %145 = vmatpush3.bf16.msk.msra.mxu0 %vm141_vm3, %v140_v2 }
   0x8   :  { %138 = vmatmul.mubr.msk.f32.vlgmr.msra.gmra.mrb[0].mxu0 %vm28_vm1, %v18_v4 }
  0xdb   :  { %v139_v6 = vpop.f32.mrb[0].mxu0 }
  0xdc   :  { %v111_v8 = vadd.f32 %v139_v6, %v125_v5  ;;  %v105_v9 = vpop.f32.mrb[1].mxu0 }
  0xdd   :  { %v106_v11 = vadd.f32 %v125_v5, %v105_v9 }
  0xde   :  { %v117_v12 = vadd.f32 %v115_v7, %v111_v8 }
  0xdf   :  { %v116_v13 = vadd.f32 %v114_v10, %v106_v11 }
  0xe0   :  { %120 = vst.msk [vmem:[%s204_s4 + $0x8] sm:$0xff] %vm118_vm4, %v117_v12 }
  0xe1   :  { %119 = vst.msk [vmem:[%s204_s4] sm:$0xff] %vm118_vm4, %v116_v13 }

// kernel: informer_forward.23
= control target key start
LH: loop header
LB: loop body
LE: loop exit
PB: predicated region body
PF: predicated region fallthrough
CT: control target
= control target key end

     0   :  { %vm36_vm0 = vcmask 261120   ;;  %s289_s2 = inlined_call_operand.vmem [shape: f32[32,32], index: 2, kind: input, shape index: {}]   ;;  %s290_s0 = inlined_call_operand.vmem [shape: f32[16,32], index: 0, kind: input, shape index: {}]   ;;  %s291_s3 = inlined_call_operand.vmem [shape: f32[1,32], index: 3, kind: input, shape index: {}]   ;;  %s292_s1 = inlined_call_operand.vmem [shape: f32[16,32], index: 1, kind: input, shape index: {}]   ;;  %s293_s4 = inlined_call_operand.vmem [shape: f32[1,32], index: 4, kind: input, shape index: {}]   ;;  %s294_s5 = inlined_call_operand.vmem [shape: f32[1,32], index: 5, kind: input, shape index: {}]   ;;  %s295_s6 = inlined_call_operand.vmem [shape: f32[16,32], index: 6, kind: output, shape index: {}]  }
   0x1   :  { %v25_v0 = vld [vmem:[%s289_s2] sm:$0xff]  ;;  %v26_v1 = vld [vmem:[%s289_s2 + $0x8] sm:$0xff]  ;;  %v27_v2 = vld [vmem:[%s289_s2 + $0x10] sm:$0xff] }
   0x2   :  { %v195_v3 = vpack.c.bf16 %v26_v1, %v25_v0  ;;  %v28_v4 = vld [vmem:[%s289_s2 + $0x18] sm:$0xff]  ;;  %v23_v5 = vld [vmem:[%s290_s0] sm:$0xff]  ;;  %v24_v7 = vld [vmem:[%s290_s0 + $0x8] sm:$0xff] }
   0x3   :  { %v199_v6 = vpack.c.bf16 %v28_v4, %v27_v2  ;;  %192 = vmatprep.mubr.msk.f32.mxu0 %vm36_vm0, %v23_v5  ;;  %v173_v8 = vld [vmem:[%s291_s3] ss:$0 sm:$0xff]  ;;  %v119_v14 = vld [vmem:[%s292_s1 + $0x8] sm:$0xff] }
   0x4   :  { %196 = vmatprep.subr.bf16.mxu0 %v195_v3  ;;  %v118_v11 = vld [vmem:[%s292_s1] sm:$0xff] }
   0x5   :  { %198 = vmatpush3.bf16.msra.mxu0 %v195_v3  ;;  %v176_v36 = vld [vmem:[%s293_s4] ss:$0 sm:$0xff] }
   0x6   :  { %200 = vmatprep.subr.bf16.mxu0 %v199_v6  ;;  %v177_v38 = vld [vmem:[%s294_s5] ss:$0 sm:$0xff] }
   0x9   :  { %202 = vmatpush3.bf16.msra.mxu0 %v199_v6 }
   0xc   :  { %193 = vmatmul.mubr.msk.f32.vlgmr.msra.gmra.mrb[0].mxu0 %vm36_vm0, %v24_v7 }
  0xdf   :  { %v194_v9 = vpop.f32.mrb[0].mxu0 }
  0xe0   :  { %v109_v10 = vpop.f32.mrb[1].mxu0  ;;  %v115_v12 = vadd.f32 %v194_v9, %v173_v8 }
  0xe1   :  { %v110_v13 = vadd.f32 %v173_v8, %v109_v10 }
  0xe2   :  { %v121_v17 = vadd.f32 %v119_v14, %v115_v12 }
  0xe3   :  { %v120_v15 = vadd.f32 %v118_v11, %v110_v13 }
  0xe4   :  { %v127_v18 = vsel %vm36_vm0, %v121_v17, 0.0 }
  0xe5   :  { %v124_v16 = vsel %vm36_vm0, %v120_v15, 0.0 }
  0xe6   :  { %125 = vadd.xlane.f32.xlu0 %v124_v16 }
  0xea   :  { %128 = vadd.xlane.f32.xlu0 %v127_v18 }
 0x173   :  { %v126_v19 = vpop.xlane.xlu0 %125 }
 0x174   :  { %v131_v20 = vmul.f32 0.03125, %v126_v19 }
 0x176   :  { %v133_v21 = vsub.f32 %v120_v15, %v131_v20 }
 0x177   :  { %v129_v22 = vpop.xlane.xlu0 %128 }
 0x178   :  { %v132_v23 = vmul.f32 0.03125, %v129_v22  ;;  %v135_v24 = vmul.f32 %v133_v21, %v133_v21 }
 0x17a   :  { %v134_v25 = vsub.f32 %v121_v17, %v132_v23  ;;  %v137_v26 = vsel %vm36_vm0, %v135_v24, 0.0 }
 0x17b   :  { %138 = vadd.xlane.f32.xlu1 %v137_v26 }
 0x17c   :  { %v136_v27 = vmul.f32 %v134_v25, %v134_v25 }
 0x17e   :  { %v140_v28 = vsel %vm36_vm0, %v136_v27, 0.0 }
 0x17f   :  { %141 = vadd.xlane.f32.xlu1 %v140_v28 }
 0x208   :  { %v139_v29 = vpop.xlane.xlu1 %138 }
 0x209   :  { %v143_v30 = vmul.f32 0.03125, %v139_v29 }
 0x20b   :  { %v145_v31 = vadd.f32 1e-05, %v143_v30 }
 0x20c   :  { %v142_v32 = vpop.xlane.xlu1 %141 }
 0x20d   :  { %203 = vrsqrt.f32 %v145_v31  ;;  %v144_v33 = vmul.f32 0.03125, %v142_v32 }
 0x20f   :  { %v146_v34 = vadd.f32 1e-05, %v144_v33 }
 0x211   :  { %205 = vrsqrt.f32 %v146_v34 }
 0x217   :  { %v204_v35 = vpop.eup %203 }
 0x218   :  { %v149_v37 = vmul.f32 %v204_v35, %v133_v21 }
 0x21a   :  { %v157_v39 = vmul.f32 %v176_v36, %v149_v37 }
 0x21b   :  { %v206_v40 = vpop.eup %205 }
 0x21c   :  { %v165_v41 = vadd.f32 %v177_v38, %v157_v39  ;;  %v150_v42 = vmul.f32 %v206_v40, %v134_v25 }
 0x21e   :  { %167 = vst.msk [vmem:[%s295_s6] sm:$0xff] %vm36_vm0, %v165_v41  ;;  %v158_v43 = vmul.f32 %v176_v36, %v150_v42 }
 0x220   :  { %v166_v44 = vadd.f32 %v177_v38, %v158_v43 }
 0x222   :  { %168 = vst.msk [vmem:[%s295_s6 + $0x8] sm:$0xff] %vm36_vm0, %v166_v44 }

// kernel: informer_forward.21
= control target key start
LH: loop header
LB: loop body
LE: loop exit
PB: predicated region body
PF: predicated region fallthrough
CT: control target
= control target key end

     0   :  { %vm38_vm0 = vcmask 261120   ;;  %vm216_vm1 = vcmask 523264   ;;  %s383_s2 = inlined_call_operand.vmem [shape: f32[32,32], index: 2, kind: input, shape index: {}]   ;;  %s384_s4 = inlined_call_operand.vmem [shape: f32[32,64], index: 4, kind: input, shape index: {}]   ;;  %s385_s0 = inlined_call_operand.vmem [shape: f32[16,32], index: 0, kind: input, shape index: {}, may-alias: {0,1}]   ;;  %s386_s1 = inlined_call_operand.vmem [shape: f32[16,32], index: 1, kind: input, shape index: {}, may-alias: {0,1}]   ;;  %s387_s3 = inlined_call_operand.vmem [shape: f32[1,32], index: 3, kind: input, shape index: {}]   ;;  %s388_s5 = inlined_call_operand.vmem [shape: f32[1,64], index: 5, kind: input, shape index: {}]   ;;  %s389_s6 = inlined_call_operand.vmem [shape: f32[16,32], index: 6, kind: output, shape index: {0}]   ;;  %s390_s7 = inlined_call_operand.vmem [shape: f32[16,64], index: 7, kind: output, shape index: {1}]  }
   0x1   :  { %v27_v0 = vld [vmem:[%s383_s2] sm:$0xff]  ;;  %v28_v1 = vld [vmem:[%s383_s2 + $0x8] sm:$0xff]  ;;  %v29_v5 = vld [vmem:[%s383_s2 + $0x10] sm:$0xff] }
   0x2   :  { %v124_v2 = vld [vmem:[%s384_s4] sm:$0xff]  ;;  %v267_v3 = vpack.c.bf16 %v28_v1, %v27_v0  ;;  %v125_v4 = vld [vmem:[%s384_s4 + $0x8] sm:$0xff]  ;;  %v30_v6 = vld [vmem:[%s383_s2 + $0x18] sm:$0xff] }
   0x3   :  { %v275_v7 = vpack.c.bf16 %v125_v4, %v124_v2  ;;  %v271_v8 = vpack.c.bf16 %v30_v6, %v29_v5  ;;  %v126_v9 = vld [vmem:[%s384_s4 + $0x10] sm:$0xff]  ;;  %v127_v10 = vld [vmem:[%s384_s4 + $0x18] sm:$0xff]  ;;  %v25_v11 = vld [vmem:[%s385_s0] sm:$0xff] }
   0x4   :  { %268 = vmatprep.subr.bf16.mxu0 %v267_v3  ;;  %v279_v12 = vpack.c.bf16 %v127_v10, %v126_v9  ;;  %253 = vmatprep.mubr.msk.f32.mxu0 %vm38_vm0, %v25_v11  ;;  %v122_v13 = vld [vmem:[%s386_s1] sm:$0xff]  ;;  %v26_v14 = vld [vmem:[%s385_s0 + $0x8] sm:$0xff] }
   0x5   :  { %276 = vmatprep.subr.bf16.mxu1 %v275_v7  ;;  %270 = vmatpush3.bf16.msra.mxu0 %v267_v3  ;;  %v123_v15 = vld [vmem:[%s386_s1 + $0x8] sm:$0xff]  ;;  %v227_v16 = vld [vmem:[%s387_s3] ss:$0 sm:$0xff] }
   0x6   :  { %278 = vmatpush3.bf16.msra.mxu1 %v275_v7  ;;  %272 = vmatprep.subr.bf16.mxu0 %v271_v8  ;;  %v230_v17 = vld [vmem:[%s388_s5] ss:$0 sm:$0xff] }
   0x7   :  { %280 = vmatprep.subr.bf16.mxu1 %v279_v12  ;;  %264 = vmatprep.mubr.msk.f32.mxu1 %vm38_vm0, %v122_v13 }
   0x9   :  { %274 = vmatpush3.bf16.msra.mxu0 %v271_v8 }
   0xa   :  { %282 = vmatpush3.bf16.msra.mxu1 %v279_v12 }
   0xc   :  { %254 = vmatmul.mubr.msk.f32.vlgmr.msra.gmra.mrb[0].mxu0 %vm38_vm0, %v26_v14 }
   0xd   :  { %265 = vmatmul.mubr.msk.f32.vlgmr.msra.gmra.mrb[0].mxu1 %vm38_vm0, %v123_v15 }
  0xdf   :  { %v255_v18 = vpop.f32.mrb[0].mxu0 }
  0xe0   :  { %v117_v19 = vadd.f32 %v255_v18, %v227_v16  ;;  %v266_v20 = vpop.f32.mrb[0].mxu1  ;;  %v111_v21 = vpop.f32.mrb[1].mxu0 }
  0xe1   :  { %v213_v22 = vadd.f32 %v266_v20, %v230_v17  ;;  %v112_v23 = vadd.f32 %v227_v16, %v111_v21  ;;  %v207_v24 = vpop.f32.mrb[1].mxu1 }
  0xe2   :  { %121 = vst.msk [vmem:[%s389_s6 + $0x8] sm:$0xff] %vm38_vm0, %v117_v19  ;;  %v208_v25 = vadd.f32 %v230_v17, %v207_v24 }
  0xe3   :  { %218 = vst.msk [vmem:[%s390_s7 + $0x8] sm:$0xff] %vm216_vm1, %v213_v22 }
  0xe4   :  { %120 = vst.msk [vmem:[%s389_s6] sm:$0xff] %vm38_vm0, %v112_v23 }
  0xe5   :  { %217 = vst.msk [vmem:[%s390_s7] sm:$0xff] %vm216_vm1, %v208_v25 }

// kernel: informer_forward.22
= control target key start
LH: loop header
LB: loop body
LE: loop exit
PB: predicated region body
PF: predicated region fallthrough
CT: control target
= control target key end

     0   :  { %vm38_vm0 = vcmask 64512   ;;  %v1509_v0 = vmov 0.0   ;;  %vm1510_vm1 = vmmov 0   ;;  %s1735_s1 = inlined_call_operand.vmem [shape: f32[8,8,8], index: 1, kind: input, shape index: {}]   ;;  %s1736_s0 = inlined_call_operand.vmem [shape: f32[8,8,8], index: 0, kind: input, shape index: {}]   ;;  %s1737_s2 = inlined_call_operand.vmem [shape: f32[8,8,8], index: 2, kind: input, shape index: {}]   ;;  %s1738_s3 = inlined_call_operand.vmem [shape: f32[8,8,8], index: 3, kind: output, shape index: {}]  }
   0x1   :  { %1395 = vmatprep.subr.mxu0 %v1509_v0  ;;  %v22_v1 = vld [vmem:[%s1735_s1] sm:$0xff]  ;;  %1397 = vmatprep.mubr.msk.f32.mxu0 %vm1510_vm1, %v1509_v0  ;;  %v23_v2 = vld [vmem:[%s1735_s1 + $0x8] sm:$0xff]  ;;  %v24_v4 = vld [vmem:[%s1735_s1 + $0x10] sm:$0xff] }
   0x2   :  { %1396 = vmatpush3.xpose.msk.msra.mxu0 %vm38_vm0, %v22_v1  ;;  %v14_v3 = vld [vmem:[%s1736_s0] sm:$0xff]  ;;  %1400 = vmatprep.subr.mxu1 %v1509_v0  ;;  %v15_v5 = vld [vmem:[%s1736_s0 + $0x8] sm:$0xff]  ;;  %v25_v6 = vld [vmem:[%s1735_s1 + $0x18] sm:$0xff] }
   0x3   :  { %1405 = vmatprep.subr.mxu0 %v1509_v0  ;;  %1401 = vmatpush3.xpose.msk.msra.mxu1 %vm38_vm0, %v23_v2  ;;  %v16_v7 = vld [vmem:[%s1736_s0 + $0x10] sm:$0xff]  ;;  %v26_v8 = vld [vmem:[%s1735_s1 + $0x20] sm:$0xff]  ;;  %v17_v9 = vld [vmem:[%s1736_s0 + $0x18] sm:$0xff] }
   0x4   :  { %1402 = vmatprep.mubr.msk.f32.mxu1 %vm1510_vm1, %v1509_v0  ;;  %1410 = vmatprep.subr.mxu1 %v1509_v0  ;;  %v27_v10 = vld [vmem:[%s1735_s1 + $0x28] sm:$0xff]  ;;  %v18_v11 = vld [vmem:[%s1736_s0 + $0x20] sm:$0xff]  ;;  %v28_v12 = vld [vmem:[%s1735_s1 + $0x30] sm:$0xff] }
   0x5   :  { %1398 = vmatmul.mubr.msk.f32.vlgmr.msra.gmra.mrb[0].mxu0 %vm38_vm0, %v14_v3  ;;  %v19_v13 = vld [vmem:[%s1736_s0 + $0x28] sm:$0xff]  ;;  %v29_v14 = vld [vmem:[%s1735_s1 + $0x38] sm:$0xff]  ;;  %v20_v15 = vld [vmem:[%s1736_s0 + $0x30] sm:$0xff] }
   0x6   :  { %1406 = vmatpush3.xpose.msk.msra.mxu0 %vm38_vm0, %v24_v4  ;;  %1407 = vmatprep.mubr.msk.f32.mxu0 %vm1510_vm1, %v1509_v0  ;;  %v21_v16 = vld [vmem:[%s1736_s0 + $0x38] sm:$0xff] }
   0x7   :  { %1403 = vmatmul.mubr.msk.f32.vlgmr.msra.gmra.mrb[0].mxu1 %vm38_vm0, %v15_v5  ;;  %1415 = vmatprep.subr.mxu0 %v1509_v0 }
   0x8   :  { %1411 = vmatpush3.xpose.msk.msra.mxu1 %vm38_vm0, %v25_v6  ;;  %1412 = vmatprep.mubr.msk.f32.mxu1 %vm1510_vm1, %v1509_v0 }
   0x9   :  { %1408 = vmatmul.mubr.msk.f32.vlgmr.msra.gmra.mrb[2].mxu0 %vm38_vm0, %v16_v7  ;;  %1420 = vmatprep.subr.mxu1 %v1509_v0 }
   0xa   :  { %1416 = vmatpush3.xpose.msk.msra.mxu0 %vm38_vm0, %v26_v8  ;;  %1417 = vmatprep.mubr.msk.f32.mxu0 %vm1510_vm1, %v1509_v0 }
   0xb   :  { %1413 = vmatmul.mubr.msk.f32.vlgmr.msra.gmra.mrb[2].mxu1 %vm38_vm0, %v17_v9  ;;  %1425 = vmatprep.subr.mxu0 %v1509_v0 }
   0xc   :  { %1421 = vmatpush3.xpose.msk.msra.mxu1 %vm38_vm0, %v27_v10  ;;  %1422 = vmatprep.mubr.msk.f32.mxu1 %vm1510_vm1, %v1509_v0 }
   0xd   :  { %1418 = vmatmul.mubr.msk.f32.vlgmr.msra.gmra.mrb[4].mxu0 %vm38_vm0, %v18_v11  ;;  %1430 = vmatprep.subr.mxu1 %v1509_v0 }
   0xe   :  { %1426 = vmatpush3.xpose.msk.msra.mxu0 %vm38_vm0, %v28_v12  ;;  %1427 = vmatprep.mubr.msk.f32.mxu0 %vm1510_vm1, %v1509_v0 }
   0xf   :  { %1423 = vmatmul.mubr.msk.f32.vlgmr.msra.gmra.mrb[4].mxu1 %vm38_vm0, %v19_v13  ;;  %1435 = vmatprep.subr.mxu0 %v1509_v0 }
  0x10   :  { %1431 = vmatpush3.xpose.msk.msra.mxu1 %vm38_vm0, %v29_v14  ;;  %1432 = vmatprep.mubr.msk.f32.mxu1 %vm1510_vm1, %v1509_v0 }
  0x11   :  { %1428 = vmatmul.mubr.msk.f32.vlgmr.msra.gmra.mrb[6].mxu0 %vm38_vm0, %v20_v15  ;;  %1440 = vmatprep.subr.mxu1 %v1509_v0 }
  0x12   :  { %1437 = vmatprep.mubr.msk.f32.mxu0 %vm1510_vm1, %v1509_v0 }
  0x13   :  { %1433 = vmatmul.mubr.msk.f32.vlgmr.msra.gmra.mrb[6].mxu1 %vm38_vm0, %v21_v16 }
  0x14   :  { %1442 = vmatprep.mubr.msk.f32.mxu1 %vm1510_vm1, %v1509_v0 }
  0xd8   :  { %v111_v17 = vpop.f32.mrb[0].mxu0 }
  0xd9   :  { %v647_v18 = vmul.f32 0.35355338, %v111_v17  ;;  %v1399_v19 = vpop.f32.mrb[1].mxu0 }
  0xda   :  { %v187_v20 = vpop.f32.mrb[0].mxu1 }
  0xdb   :  { %v648_v21 = vmul.f32 0.35355338, %v187_v20  ;;  %v655_v22 = vsel %vm38_vm0, %v647_v18, -inf  ;;  %v1404_v23 = vpop.f32.mrb[1].mxu1 }
  0xdc   :  { %656 = vmax.xlane.f32.xlu0 %v655_v22  ;;  %v263_v24 = vpop.f32.mrb[2].mxu0 }
  0xdd   :  { %v649_v25 = vmul.f32 0.35355338, %v263_v24  ;;  %v1409_v26 = vpop.f32.mrb[3].mxu0  ;;  %v658_v27 = vsel %vm38_vm0, %v648_v21, -inf }
  0xde   :  { %v339_v28 = vpop.f32.mrb[2].mxu1  ;;  %v30_v26 = vld [vmem:[%s1737_s2] sm:$0xff] }
  0xdf   :  { %v650_v29 = vmul.f32 0.35355338, %v339_v28  ;;  %v661_v30 = vsel %vm38_vm0, %v649_v25, -inf  ;;  %v1414_v31 = vpop.f32.mrb[3].mxu1  ;;  %1436 = vmatpush3.msra.mxu0 %v30_v26 }
  0xe0   :  { %659 = vmax.xlane.f32.xlu0 %v658_v27  ;;  %662 = vmax.xlane.f32.xlu1 %v661_v30  ;;  %v415_v32 = vpop.f32.mrb[4].mxu0  ;;  %v31_v27 = vld [vmem:[%s1737_s2 + $0x8] sm:$0xff] }
  0xe1   :  { %v651_v33 = vmul.f32 0.35355338, %v415_v32  ;;  %v1419_v34 = vpop.f32.mrb[5].mxu0  ;;  %v664_v35 = vsel %vm38_vm0, %v650_v29, -inf  ;;  %1445 = vmatprep.subr.mxu0 %v1509_v0  ;;  %1441 = vmatpush3.msra.mxu1 %v31_v27 }
  0xe2   :  { %v491_v36 = vpop.f32.mrb[4].mxu1  ;;  %1450 = vmatprep.subr.mxu1 %v1509_v0 }
  0xe3   :  { %v652_v37 = vmul.f32 0.35355338, %v491_v36  ;;  %v667_v38 = vsel %vm38_vm0, %v651_v33, -inf  ;;  %v1424_v39 = vpop.f32.mrb[5].mxu1  ;;  %v32_v36 = vld [vmem:[%s1737_s2 + $0x10] sm:$0xff] }
  0xe4   :  { %665 = vmax.xlane.f32.xlu1 %v664_v35  ;;  %668 = vmax.xlane.f32.xlu0 %v667_v38  ;;  %v567_v40 = vpop.f32.mrb[6].mxu0 }
  0xe5   :  { %v653_v41 = vmul.f32 0.35355338, %v567_v40  ;;  %v670_v42 = vsel %vm38_vm0, %v652_v37, -inf  ;;  %v1429_v43 = vpop.f32.mrb[7].mxu0 }
  0xe6   :  { %v643_v44 = vpop.f32.mrb[6].mxu1 }
  0xe7   :  { %v654_v45 = vmul.f32 0.35355338, %v643_v44  ;;  %v673_v46 = vsel %vm38_vm0, %v653_v41, -inf  ;;  %v1434_v47 = vpop.f32.mrb[7].mxu1  ;;  %v34_v44 = vld [vmem:[%s1737_s2 + $0x20] sm:$0xff] }
  0xe8   :  { %671 = vmax.xlane.f32.xlu1 %v670_v42  ;;  %674 = vmax.xlane.f32.xlu0 %v673_v46  ;;  %v33_v42 = vld [vmem:[%s1737_s2 + $0x18] sm:$0xff] }
  0xe9   :  { %v676_v48 = vsel %vm38_vm0, %v654_v45, -inf }
  0xec   :  { %677 = vmax.xlane.f32.xlu1 %v676_v48  ;;  %v35_v48 = vld [vmem:[%s1737_s2 + $0x28] sm:$0xff] }
 0x169   :  { %v657_v49 = vpop.xlane.xlu0 %656 }
 0x16a   :  { %v679_v50 = vsub.f32 %v647_v18, %v657_v49 }
 0x16c   :  { %v687_v51 = vmul.f32 1.442695, %v679_v50  ;;  %v36_v50 = vld [vmem:[%s1737_s2 + $0x30] sm:$0xff] }
 0x16d   :  { %v660_v52 = vpop.xlane.xlu0 %659  ;;  %v663_v53 = vpop.xlane.xlu1 %662 }
 0x16e   :  { %1477 = vpow2.f32 %v687_v51  ;;  %v680_v54 = vsub.f32 %v648_v21, %v660_v52  ;;  %v681_v55 = vsub.f32 %v649_v25, %v663_v53 }
 0x170   :  { %v689_v56 = vmul.f32 1.442695, %v680_v54  ;;  %v691_v57 = vmul.f32 1.442695, %v681_v55  ;;  %v37_v54 = vld [vmem:[%s1737_s2 + $0x38] sm:$0xff] }
 0x171   :  { %v666_v58 = vpop.xlane.xlu1 %665  ;;  %v669_v59 = vpop.xlane.xlu0 %668 }
 0x172   :  { %1479 = vpow2.f32 %v689_v56  ;;  %v682_v60 = vsub.f32 %v650_v29, %v666_v58  ;;  %v683_v61 = vsub.f32 %v651_v33, %v669_v59 }
 0x173   :  { %1481 = vpow2.f32 %v691_v57 }
 0x174   :  { %v693_v62 = vmul.f32 1.442695, %v682_v60  ;;  %v695_v63 = vmul.f32 1.442695, %v683_v61 }
 0x175   :  { %v672_v1 = vpop.xlane.xlu1 %671  ;;  %v675_v2 = vpop.xlane.xlu0 %674 }
 0x176   :  { %1483 = vpow2.f32 %v693_v62  ;;  %v684_v3 = vsub.f32 %v652_v37, %v672_v1  ;;  %v685_v4 = vsub.f32 %v653_v41, %v675_v2 }
 0x177   :  { %1485 = vpow2.f32 %v695_v63 }
 0x178   :  { %v1478_v5 = vpop.eup %1477  ;;  %v697_v6 = vmul.f32 1.442695, %v684_v3  ;;  %v699_v7 = vmul.f32 1.442695, %v685_v4 }
 0x179   :  { %v678_v8 = vpop.xlane.xlu1 %677  ;;  %v703_v9 = vsel %vm38_vm0, %v1478_v5, 0.0 }
 0x17a   :  { %1487 = vpow2.f32 %v697_v6  ;;  %v686_v10 = vsub.f32 %v654_v45, %v678_v8  ;;  %704 = vadd.xlane.f32.xlu0 %v703_v9 }
 0x17b   :  { %1489 = vpow2.f32 %v699_v7 }
 0x17c   :  { %v1480_v11 = vpop.eup %1479  ;;  %v701_v12 = vmul.f32 1.442695, %v686_v10 }
 0x17d   :  { %v1482_v13 = vpop.eup %1481  ;;  %v706_v14 = vsel %vm38_vm0, %v1480_v11, 0.0 }
 0x17e   :  { %1491 = vpow2.f32 %v701_v12  ;;  %707 = vadd.xlane.f32.xlu1 %v706_v14  ;;  %v709_v15 = vsel %vm38_vm0, %v1482_v13, 0.0 }
 0x17f   :  { %710 = vadd.xlane.f32.xlu0 %v709_v15 }
 0x180   :  { %v1484_v16 = vpop.eup %1483 }
 0x181   :  { %v1486_v17 = vpop.eup %1485  ;;  %v712_v18 = vsel %vm38_vm0, %v1484_v16, 0.0 }
 0x182   :  { %713 = vadd.xlane.f32.xlu1 %v712_v18  ;;  %v715_v19 = vsel %vm38_vm0, %v1486_v17, 0.0 }
 0x183   :  { %716 = vadd.xlane.f32.xlu0 %v715_v19 }
 0x184   :  { %v1638_v20 = vpop.eup %1487 }
 0x185   :  { %v1640_v21 = vpop.eup %1489  ;;  %v718_v22 = vsel %vm38_vm0, %v1638_v20, 0.0 }
 0x186   :  { %719 = vadd.xlane.f32.xlu1 %v718_v22  ;;  %v721_v23 = vsel %vm38_vm0, %v1640_v21, 0.0 }
 0x187   :  { %722 = vadd.xlane.f32.xlu0 %v721_v23 }
 0x188   :  { %v1646_v24 = vpop.eup %1491 }
 0x189   :  { %v724_v25 = vsel %vm38_vm0, %v1646_v24, 0.0 }
 0x18a   :  { %725 = vadd.xlane.f32.xlu1 %v724_v25 }
 0x207   :  { %v705_v28 = vpop.xlane.xlu0 %704 }
 0x208   :  { %1493 = vrcp.f32 %v705_v28 }
 0x20b   :  { %v708_v29 = vpop.xlane.xlu1 %707 }
 0x20c   :  { %1495 = vrcp.f32 %v708_v29  ;;  %v711_v30 = vpop.xlane.xlu0 %710 }
 0x20d   :  { %1497 = vrcp.f32 %v711_v30 }
 0x20f   :  { %v714_v31 = vpop.xlane.xlu1 %713 }
 0x210   :  { %1499 = vrcp.f32 %v714_v31  ;;  %v717_v32 = vpop.xlane.xlu0 %716 }
 0x211   :  { %1501 = vrcp.f32 %v717_v32 }
 0x212   :  { %v1494_v33 = vpop.eup %1493 }
 0x213   :  { %v735_v34 = vmul.f32 %v1494_v33, %v1478_v5  ;;  %v720_v35 = vpop.xlane.xlu1 %719 }
 0x214   :  { %1503 = vrcp.f32 %v720_v35  ;;  %v723_v37 = vpop.xlane.xlu0 %722 }
 0x215   :  { %1505 = vrcp.f32 %v723_v37  ;;  %1438 = vmatmul.mubr.msk.f32.vlgmr.msra.gmra.mrb[8].mxu0 %vm38_vm0, %v735_v34 }
 0x216   :  { %v1496_v38 = vpop.eup %1495  ;;  %1446 = vmatpush3.msra.mxu0 %v32_v36  ;;  %1447 = vmatprep.mubr.msk.f32.mxu0 %vm1510_vm1, %v1509_v0 }
 0x217   :  { %v1498_v39 = vpop.eup %1497  ;;  %v736_v40 = vmul.f32 %v1496_v38, %v1480_v11  ;;  %v726_v41 = vpop.xlane.xlu1 %725  ;;  %1455 = vmatprep.subr.mxu0 %v1509_v0 }
 0x218   :  { %v737_v43 = vmul.f32 %v1498_v39, %v1482_v13  ;;  %1507 = vrcp.f32 %v726_v41 }
 0x219   :  { %1443 = vmatmul.mubr.msk.f32.vlgmr.msra.gmra.mrb[8].mxu1 %vm38_vm0, %v736_v40 }
 0x21a   :  { %v1500_v45 = vpop.eup %1499  ;;  %1448 = vmatmul.mubr.msk.f32.vlgmr.msra.gmra.mrb[10].mxu0 %vm38_vm0, %v737_v43  ;;  %1451 = vmatpush3.msra.mxu1 %v33_v42 }
 0x21b   :  { %v1502_v46 = vpop.eup %1501  ;;  %v738_v47 = vmul.f32 %v1500_v45, %v1484_v16  ;;  %1452 = vmatprep.mubr.msk.f32.mxu1 %vm1510_vm1, %v1509_v0  ;;  %1456 = vmatpush3.msra.mxu0 %v34_v44 }
 0x21c   :  { %v739_v49 = vmul.f32 %v1502_v46, %v1486_v17  ;;  %1457 = vmatprep.mubr.msk.f32.mxu0 %vm1510_vm1, %v1509_v0  ;;  %1460 = vmatprep.subr.mxu1 %v1509_v0 }
 0x21d   :  { %1453 = vmatmul.mubr.msk.f32.vlgmr.msra.gmra.mrb[10].mxu1 %vm38_vm0, %v738_v47  ;;  %1465 = vmatprep.subr.mxu0 %v1509_v0 }
 0x21e   :  { %v1504_v51 = vpop.eup %1503  ;;  %1458 = vmatmul.mubr.msk.f32.vlgmr.msra.gmra.mrb[12].mxu0 %vm38_vm0, %v739_v49  ;;  %1461 = vmatpush3.msra.mxu1 %v35_v48 }
 0x21f   :  { %v1506_v52 = vpop.eup %1505  ;;  %v740_v53 = vmul.f32 %v1504_v51, %v1638_v20  ;;  %1462 = vmatprep.mubr.msk.f32.mxu1 %vm1510_vm1, %v1509_v0  ;;  %1466 = vmatpush3.msra.mxu0 %v36_v50 }
 0x220   :  { %v741_v55 = vmul.f32 %v1506_v52, %v1640_v21  ;;  %1467 = vmatprep.mubr.msk.f32.mxu0 %vm1510_vm1, %v1509_v0  ;;  %1470 = vmatprep.subr.mxu1 %v1509_v0 }
 0x221   :  { %1463 = vmatmul.mubr.msk.f32.vlgmr.msra.gmra.mrb[12].mxu1 %vm38_vm0, %v740_v53 }
 0x222   :  { %v1508_v56 = vpop.eup %1507  ;;  %1468 = vmatmul.mubr.msk.f32.vlgmr.msra.gmra.mrb[14].mxu0 %vm38_vm0, %v741_v55  ;;  %1471 = vmatpush3.msra.mxu1 %v37_v54 }
 0x223   :  { %v742_v57 = vmul.f32 %v1508_v56, %v1646_v24  ;;  %1472 = vmatprep.mubr.msk.f32.mxu1 %vm1510_vm1, %v1509_v0 }
 0x225   :  { %1473 = vmatmul.mubr.msk.f32.vlgmr.msra.gmra.mrb[14].mxu1 %vm38_vm0, %v742_v57 }
 0x2e8   :  { %v812_v58 = vpop.f32.mrb[8].mxu0 }
 0x2e9   :  { %1327 = vst.msk [vmem:[%s1738_s3] sm:$0xff] %vm38_vm0, %v812_v58  ;;  %v1439_v59 = vpop.f32.mrb[9].mxu0 }
 0x2ec   :  { %v885_v60 = vpop.f32.mrb[8].mxu1 }
 0x2ed   :  { %1328 = vst.msk [vmem:[%s1738_s3 + $0x8] sm:$0xff] %vm38_vm0, %v885_v60  ;;  %v958_v61 = vpop.f32.mrb[10].mxu0  ;;  %v1444_v62 = vpop.f32.mrb[9].mxu1 }
 0x2ee   :  { %1329 = vst.msk [vmem:[%s1738_s3 + $0x10] sm:$0xff] %vm38_vm0, %v958_v61  ;;  %v1449_v0 = vpop.f32.mrb[11].mxu0 }
 0x2f0   :  { %v1031_v63 = vpop.f32.mrb[10].mxu1 }
 0x2f1   :  { %1330 = vst.msk [vmem:[%s1738_s3 + $0x18] sm:$0xff] %vm38_vm0, %v1031_v63  ;;  %v1104_v1 = vpop.f32.mrb[12].mxu0  ;;  %v1454_v2 = vpop.f32.mrb[11].mxu1 }
 0x2f2   :  { %1331 = vst.msk [vmem:[%s1738_s3 + $0x20] sm:$0xff] %vm38_vm0, %v1104_v1  ;;  %v1459_v3 = vpop.f32.mrb[13].mxu0 }
 0x2f4   :  { %v1177_v4 = vpop.f32.mrb[12].mxu1 }
 0x2f5   :  { %1332 = vst.msk [vmem:[%s1738_s3 + $0x28] sm:$0xff] %vm38_vm0, %v1177_v4  ;;  %v1250_v5 = vpop.f32.mrb[14].mxu0  ;;  %v1464_v6 = vpop.f32.mrb[13].mxu1 }
 0x2f6   :  { %1333 = vst.msk [vmem:[%s1738_s3 + $0x30] sm:$0xff] %vm38_vm0, %v1250_v5  ;;  %v1469_v7 = vpop.f32.mrb[15].mxu0 }
 0x2f8   :  { %v1323_v8 = vpop.f32.mrb[14].mxu1 }
 0x2f9   :  { %1334 = vst.msk [vmem:[%s1738_s3 + $0x38] sm:$0xff] %vm38_vm0, %v1323_v8  ;;  %v1474_v9 = vpop.f32.mrb[15].mxu1 }

// kernel: informer_forward.26
= control target key start
LH: loop header
LB: loop body
LE: loop exit
PB: predicated region body
PF: predicated region fallthrough
CT: control target
= control target key end

     0   :  { %vm38_vm0 = vcmask 261120   ;;  %vm121_vm1 = vcmask 254976   ;;  %vm219_vm2 = vcmask 517120   ;;  %vm217_vm3 = vcmask 523264   ;;  %s384_s2 = inlined_call_operand.vmem [shape: f32[32,32], index: 2, kind: input, shape index: {}]   ;;  %s385_s4 = inlined_call_operand.vmem [shape: f32[32,64], index: 4, kind: input, shape index: {}]   ;;  %s386_s0 = inlined_call_operand.vmem [shape: f32[10,32], index: 0, kind: input, shape index: {}, may-alias: {0,1}]   ;;  %s387_s1 = inlined_call_operand.vmem [shape: f32[10,32], index: 1, kind: input, shape index: {}, may-alias: {0,1}]   ;;  %s388_s3 = inlined_call_operand.vmem [shape: f32[1,32], index: 3, kind: input, shape index: {}]   ;;  %s389_s5 = inlined_call_operand.vmem [shape: f32[1,64], index: 5, kind: input, shape index: {}]   ;;  %s390_s6 = inlined_call_operand.vmem [shape: f32[10,32], index: 6, kind: output, shape index: {0}]   ;;  %s391_s7 = inlined_call_operand.vmem [shape: f32[10,64], index: 7, kind: output, shape index: {1}]  }
   0x1   :  { %v27_v0 = vld [vmem:[%s384_s2] sm:$0xff]  ;;  %v28_v1 = vld [vmem:[%s384_s2 + $0x8] sm:$0xff]  ;;  %v29_v5 = vld [vmem:[%s384_s2 + $0x10] sm:$0xff] }
   0x2   :  { %v125_v2 = vld [vmem:[%s385_s4] sm:$0xff]  ;;  %v269_v3 = vpack.c.bf16 %v28_v1, %v27_v0  ;;  %v126_v4 = vld [vmem:[%s385_s4 + $0x8] sm:$0xff]  ;;  %v30_v6 = vld [vmem:[%s384_s2 + $0x18] sm:$0xff] }
   0x3   :  { %v277_v7 = vpack.c.bf16 %v126_v4, %v125_v2  ;;  %v273_v8 = vpack.c.bf16 %v30_v6, %v29_v5  ;;  %v127_v9 = vld [vmem:[%s385_s4 + $0x10] sm:$0xff]  ;;  %v128_v10 = vld [vmem:[%s385_s4 + $0x18] sm:$0xff]  ;;  %v25_v11 = vld [vmem:[%s386_s0] sm:$0xff] }
   0x4   :  { %270 = vmatprep.subr.bf16.mxu0 %v269_v3  ;;  %v281_v12 = vpack.c.bf16 %v128_v10, %v127_v9  ;;  %255 = vmatprep.mubr.msk.f32.mxu0 %vm38_vm0, %v25_v11  ;;  %v123_v13 = vld [vmem:[%s387_s1] sm:$0xff]  ;;  %v26_v14 = vld [vmem:[%s386_s0 + $0x8] sm:$0x3] }
   0x5   :  { %278 = vmatprep.subr.bf16.mxu1 %v277_v7  ;;  %272 = vmatpush3.bf16.msra.mxu0 %v269_v3  ;;  %v124_v15 = vld [vmem:[%s387_s1 + $0x8] sm:$0x3]  ;;  %v229_v16 = vld [vmem:[%s388_s3] ss:$0 sm:$0xff] }
   0x6   :  { %280 = vmatpush3.bf16.msra.mxu1 %v277_v7  ;;  %274 = vmatprep.subr.bf16.mxu0 %v273_v8  ;;  %v232_v17 = vld [vmem:[%s389_s5] ss:$0 sm:$0xff] }
   0x7   :  { %282 = vmatprep.subr.bf16.mxu1 %v281_v12  ;;  %266 = vmatprep.mubr.msk.f32.mxu1 %vm38_vm0, %v123_v13 }
   0x9   :  { %276 = vmatpush3.bf16.msra.mxu0 %v273_v8 }
   0xa   :  { %284 = vmatpush3.bf16.msra.mxu1 %v281_v12 }
   0xc   :  { %256 = vmatmul.mubr.msk.f32.vlgmr.msra.gmra.mrb[0].mxu0 %vm38_vm0, %v26_v14 }
   0xd   :  { %267 = vmatmul.mubr.msk.f32.vlgmr.msra.gmra.mrb[0].mxu1 %vm38_vm0, %v124_v15 }
  0xdf   :  { %v257_v18 = vpop.f32.mrb[0].mxu0 }
  0xe0   :  { %v117_v19 = vadd.f32 %v257_v18, %v229_v16  ;;  %v268_v20 = vpop.f32.mrb[0].mxu1  ;;  %v111_v21 = vpop.f32.mrb[1].mxu0 }
  0xe1   :  { %v214_v22 = vadd.f32 %v268_v20, %v232_v17  ;;  %v112_v23 = vadd.f32 %v229_v16, %v111_v21  ;;  %v208_v24 = vpop.f32.mrb[1].mxu1 }
  0xe2   :  { %122 = vst.msk [vmem:[%s390_s6 + $0x8] sm:$0x3] %vm121_vm1, %v117_v19  ;;  %v209_v25 = vadd.f32 %v232_v17, %v208_v24 }
  0xe3   :  { %220 = vst.msk [vmem:[%s391_s7 + $0x8] sm:$0x3] %vm219_vm2, %v214_v22 }
  0xe4   :  { %120 = vst.msk [vmem:[%s390_s6] sm:$0xff] %vm38_vm0, %v112_v23 }
  0xe5   :  { %218 = vst.msk [vmem:[%s391_s7] sm:$0xff] %vm217_vm3, %v209_v25 }

// kernel: informer_forward.24
= control target key start
LH: loop header
LB: loop body
LE: loop exit
PB: predicated region body
PF: predicated region fallthrough
CT: control target
= control target key end

     0   :  { %vm39_vm0 = vcmask 261120   ;;  %s440_s1 = inlined_call_operand.vmem [shape: f32[32,32], index: 1, kind: input, shape index: {}]   ;;  %s441_s0 = inlined_call_operand.vmem [shape: f32[16,32], index: 0, kind: input, shape index: {}]   ;;  %s442_s3 = inlined_call_operand.vmem [shape: f32[32,32], index: 3, kind: input, shape index: {}]   ;;  %s443_s2 = inlined_call_operand.vmem [shape: f32[1,32], index: 2, kind: input, shape index: {}]   ;;  %s444_s4 = inlined_call_operand.vmem [shape: f32[1,32], index: 4, kind: input, shape index: {}]   ;;  %s445_s5 = inlined_call_operand.vmem [shape: f32[1,32], index: 5, kind: input, shape index: {}]   ;;  %s446_s6 = inlined_call_operand.vmem [shape: f32[1,32], index: 6, kind: input, shape index: {}]   ;;  %s447_s7 = inlined_call_operand.vmem [shape: f32[16,32], index: 7, kind: output, shape index: {}]  }
   0x1   :  { %v28_v0 = vld [vmem:[%s440_s1] sm:$0xff]  ;;  %v29_v1 = vld [vmem:[%s440_s1 + $0x8] sm:$0xff]  ;;  %v30_v2 = vld [vmem:[%s440_s1 + $0x10] sm:$0xff] }
   0x2   :  { %v318_v3 = vpack.c.bf16 %v29_v1, %v28_v0  ;;  %v31_v4 = vld [vmem:[%s440_s1 + $0x18] sm:$0xff]  ;;  %v26_v5 = vld [vmem:[%s441_s0] sm:$0xff]  ;;  %v27_v7 = vld [vmem:[%s441_s0 + $0x8] sm:$0xff] }
   0x3   :  { %v322_v6 = vpack.c.bf16 %v31_v4, %v30_v2  ;;  %304 = vmatprep.mubr.msk.f32.mxu0 %vm39_vm0, %v26_v5  ;;  %v131_v8 = vld [vmem:[%s442_s3] sm:$0xff]  ;;  %v132_v9 = vld [vmem:[%s442_s3 + $0x8] sm:$0xff]  ;;  %v133_v11 = vld [vmem:[%s442_s3 + $0x10] sm:$0xff] }
   0x4   :  { %319 = vmatprep.subr.bf16.mxu0 %v318_v3  ;;  %v326_v10 = vpack.c.bf16 %v132_v9, %v131_v8  ;;  %v134_v12 = vld [vmem:[%s442_s3 + $0x18] sm:$0xff]  ;;  %v276_v14 = vld [vmem:[%s443_s2] ss:$0 sm:$0xff] }
   0x5   :  { %321 = vmatpush3.bf16.msra.mxu0 %v318_v3  ;;  %v330_v13 = vpack.c.bf16 %v134_v12, %v133_v11  ;;  %v279_v29 = vld [vmem:[%s444_s4] ss:$0 sm:$0xff] }
   0x6   :  { %323 = vmatprep.subr.bf16.mxu0 %v322_v6  ;;  %327 = vmatprep.subr.bf16.mxu1 %v326_v10  ;;  %v282_v55 = vld [vmem:[%s445_s5] ss:$0 sm:$0xff] }
   0x7   :  { %329 = vmatpush3.bf16.msra.mxu1 %v326_v10  ;;  %v283_v57 = vld [vmem:[%s446_s6] ss:$0 sm:$0xff] }
   0x8   :  { %331 = vmatprep.subr.bf16.mxu1 %v330_v13 }
   0x9   :  { %325 = vmatpush3.bf16.msra.mxu0 %v322_v6 }
   0xb   :  { %333 = vmatpush3.bf16.msra.mxu1 %v330_v13 }
   0xc   :  { %305 = vmatmul.mubr.msk.f32.vlgmr.msra.gmra.mrb[0].mxu0 %vm39_vm0, %v27_v7 }
  0xdf   :  { %v306_v15 = vpop.f32.mrb[0].mxu0 }
  0xe0   :  { %v118_v16 = vadd.f32 %v306_v15, %v276_v14  ;;  %v112_v17 = vpop.f32.mrb[1].mxu0 }
  0xe1   :  { %v113_v18 = vadd.f32 %v276_v14, %v112_v17 }
  0xe2   :  { %v124_v19 = vmul.f32 0.70710677, %v118_v16  ;;  %v122_v26 = vmul.f32 0.5, %v118_v16 }
  0xe3   :  { %v123_v20 = vmul.f32 0.70710677, %v113_v18  ;;  %v121_v24 = vmul.f32 0.5, %v113_v18 }
  0xe4   :  { %334 = verf.f32 %v124_v19 }
  0xe5   :  { %336 = verf.f32 %v123_v20 }
  0xee   :  { %v335_v21 = vpop.eup %334 }
  0xef   :  { %v337_v22 = vpop.eup %336  ;;  %v128_v23 = vadd.f32 1.0, %v335_v21 }
  0xf0   :  { %v127_v25 = vadd.f32 1.0, %v337_v22 }
  0xf1   :  { %v130_v28 = vmul.f32 %v128_v23, %v122_v26 }
  0xf2   :  { %v129_v27 = vmul.f32 %v127_v25, %v121_v24 }
  0xf4   :  { %315 = vmatprep.mubr.msk.f32.mxu1 %vm39_vm0, %v129_v27 }
  0xf5   :  { %316 = vmatmul.mubr.msk.f32.vlgmr.msra.gmra.mrb[0].mxu1 %vm39_vm0, %v130_v28 }
 0x1c8   :  { %v317_v30 = vpop.f32.mrb[0].mxu1 }
 0x1c9   :  { %v214_v31 = vpop.f32.mrb[1].mxu1  ;;  %v220_v32 = vadd.f32 %v317_v30, %v279_v29 }
 0x1ca   :  { %v215_v33 = vadd.f32 %v279_v29, %v214_v31 }
 0x1cb   :  { %v224_v36 = vadd.f32 %v220_v32, %v27_v7 }
 0x1cc   :  { %v223_v34 = vadd.f32 %v215_v33, %v26_v5 }
 0x1cd   :  { %v230_v37 = vsel %vm39_vm0, %v224_v36, 0.0 }
 0x1ce   :  { %v227_v35 = vsel %vm39_vm0, %v223_v34, 0.0 }
 0x1cf   :  { %228 = vadd.xlane.f32.xlu0 %v227_v35 }
 0x1d3   :  { %231 = vadd.xlane.f32.xlu0 %v230_v37 }
 0x25c   :  { %v229_v38 = vpop.xlane.xlu0 %228 }
 0x25d   :  { %v234_v39 = vmul.f32 0.03125, %v229_v38 }
 0x25f   :  { %v236_v40 = vsub.f32 %v223_v34, %v234_v39 }
 0x260   :  { %v232_v41 = vpop.xlane.xlu0 %231 }
 0x261   :  { %v235_v42 = vmul.f32 0.03125, %v232_v41  ;;  %v238_v43 = vmul.f32 %v236_v40, %v236_v40 }
 0x263   :  { %v237_v44 = vsub.f32 %v224_v36, %v235_v42  ;;  %v240_v45 = vsel %vm39_vm0, %v238_v43, 0.0 }
 0x264   :  { %241 = vadd.xlane.f32.xlu1 %v240_v45 }
 0x265   :  { %v239_v46 = vmul.f32 %v237_v44, %v237_v44 }
 0x267   :  { %v243_v47 = vsel %vm39_vm0, %v239_v46, 0.0 }
 0x268   :  { %244 = vadd.xlane.f32.xlu1 %v243_v47 }
 0x2f1   :  { %v242_v48 = vpop.xlane.xlu1 %241 }
 0x2f2   :  { %v246_v49 = vmul.f32 0.03125, %v242_v48 }
 0x2f4   :  { %v248_v50 = vadd.f32 1e-05, %v246_v49 }
 0x2f5   :  { %v245_v51 = vpop.xlane.xlu1 %244 }
 0x2f6   :  { %338 = vrsqrt.f32 %v248_v50  ;;  %v247_v52 = vmul.f32 0.03125, %v245_v51 }
 0x2f8   :  { %v249_v53 = vadd.f32 1e-05, %v247_v52 }
 0x2fa   :  { %340 = vrsqrt.f32 %v249_v53 }
 0x300   :  { %v339_v54 = vpop.eup %338 }
 0x301   :  { %v252_v56 = vmul.f32 %v339_v54, %v236_v40 }
 0x303   :  { %v260_v58 = vmul.f32 %v282_v55, %v252_v56 }
 0x304   :  { %v341_v59 = vpop.eup %340 }
 0x305   :  { %v268_v60 = vadd.f32 %v283_v57, %v260_v58  ;;  %v253_v61 = vmul.f32 %v341_v59, %v237_v44 }
 0x307   :  { %270 = vst.msk [vmem:[%s447_s7] sm:$0xff] %vm39_vm0, %v268_v60  ;;  %v261_v62 = vmul.f32 %v282_v55, %v253_v61 }
 0x309   :  { %v269_v63 = vadd.f32 %v283_v57, %v261_v62 }
 0x30b   :  { %271 = vst.msk [vmem:[%s447_s7 + $0x8] sm:$0xff] %vm39_vm0, %v269_v63 }

// kernel: informer_forward.25
= control target key start
LH: loop header
LB: loop body
LE: loop exit
PB: predicated region body
PF: predicated region fallthrough
CT: control target
= control target key end

     0   :  { %v310_v0 = vmov 0.0|0.0   ;;  %vm311_vm0 = vmmov 0   ;;  %v312_v6 = vmov 0.0   ;;  %vm42_vm1 = vcmask 785408   ;;  %s418_s1 = inlined_call_operand.vmem [shape: f32[96,32], index: 1, kind: input, shape index: {}]   ;;  %s419_s0 = inlined_call_operand.vmem [shape: f32[20,96], index: 0, kind: input, shape index: {}]   ;;  %s420_s2 = inlined_call_operand.vmem [shape: f32[1,32], index: 2, kind: input, shape index: {}]   ;;  %s421_s3 = inlined_call_operand.vmem [shape: f32[1,32], index: 3, kind: input, shape index: {}]   ;;  %s422_s4 = inlined_call_operand.vmem [shape: f32[1,32], index: 4, kind: input, shape index: {}]   ;;  %s423_s5 = inlined_call_operand.vmem [shape: f32[20,32], index: 5, kind: output, shape index: {}]  }
   0x1   :  { %269 = vmatprep.subr.bf16.mxu0 %v310_v0  ;;  %287 = vmatprep.subr.bf16.mxu1 %v310_v0  ;;  %v23_v1 = vld [vmem:[%s418_s1] sm:$0xff]  ;;  %v24_v2 = vld [vmem:[%s418_s1 + $0x8] sm:$0xff]  ;;  %v25_v3 = vld [vmem:[%s418_s1 + $0x10] sm:$0xff]  ;;  %vm132_vm2 = vcmask 261120   ;;  %vm136_vm3 = vcmask 257024  }
   0x2   :  { %v270_v4 = vpack.c.bf16 %v24_v2, %v23_v1  ;;  %v26_v5 = vld [vmem:[%s418_s1 + $0x18] sm:$0xff]  ;;  %260 = vmatprep.mubr.msk.f32.mxu0 %vm311_vm0, %v312_v6  ;;  %263 = vmatprep.mubr.msk.f32.mxu1 %vm311_vm0, %v312_v6  ;;  %v27_v8 = vld [vmem:[%s418_s1 + $0x20] sm:$0xff]  ;;  %v28_v9 = vld [vmem:[%s418_s1 + $0x28] sm:$0xff] }
   0x3   :  { %v273_v7 = vpack.c.bf16 %v26_v5, %v25_v3  ;;  %v276_v10 = vpack.c.bf16 %v28_v9, %v27_v8  ;;  %v29_v11 = vld [vmem:[%s418_s1 + $0x30] sm:$0xff]  ;;  %v30_v12 = vld [vmem:[%s418_s1 + $0x38] sm:$0xff]  ;;  %v31_v14 = vld [vmem:[%s418_s1 + $0x40] sm:$0xff] }
   0x4   :  { %271 = vmatpush3.bf16.msra.mxu0 %v270_v4  ;;  %293 = vmatpush3.bf16.msra.mxu1 %v270_v4  ;;  %v279_v13 = vpack.c.bf16 %v30_v12, %v29_v11  ;;  %v32_v15 = vld [vmem:[%s418_s1 + $0x48] sm:$0xff]  ;;  %v33_v17 = vld [vmem:[%s418_s1 + $0x50] sm:$0xff]  ;;  %v34_v18 = vld [vmem:[%s418_s1 + $0x58] sm:$0xff] }
   0x5   :  { %272 = vmatprep.subr.bf16.mxu0 %v310_v0  ;;  %288 = vmatprep.subr.bf16.mxu1 %v310_v0  ;;  %v282_v16 = vpack.c.bf16 %v32_v15, %v31_v14  ;;  %v285_v19 = vpack.c.bf16 %v34_v18, %v33_v17  ;;  %v20_v20 = vld [vmem:[%s419_s0] sm:$0xff]  ;;  %v21_v21 = vld [vmem:[%s419_s0 + $0x8] sm:$0xff]  ;;  %v22_v22 = vld [vmem:[%s419_s0 + $0x10] sm:$0xf] }
   0x6   :  { %v212_v23 = vld [vmem:[%s420_s2] ss:$0 sm:$0xff] }
   0x7   :  { %v216_v1 = vld [vmem:[%s421_s3] ss:$0 sm:$0xff] }
   0x8   :  { %274 = vmatpush3.bf16.msra.mxu0 %v273_v7  ;;  %294 = vmatpush3.bf16.msra.mxu1 %v273_v7  ;;  %v217_v5 = vld [vmem:[%s422_s4] ss:$0 sm:$0xff] }
   0x9   :  { %275 = vmatprep.subr.bf16.mxu0 %v310_v0  ;;  %289 = vmatprep.subr.bf16.mxu1 %v310_v0 }
   0xc   :  { %277 = vmatpush3.bf16.msra.mxu0 %v276_v10  ;;  %295 = vmatpush3.bf16.msra.mxu1 %v276_v10 }
   0xd   :  { %278 = vmatprep.subr.bf16.mxu0 %v310_v0  ;;  %290 = vmatprep.subr.bf16.mxu1 %v310_v0 }
  0x10   :  { %280 = vmatpush3.bf16.msra.mxu0 %v279_v13  ;;  %296 = vmatpush3.bf16.msra.mxu1 %v279_v13 }
  0x11   :  { %281 = vmatprep.subr.bf16.mxu0 %v310_v0  ;;  %291 = vmatprep.subr.bf16.mxu1 %v310_v0 }
  0x14   :  { %283 = vmatpush3.bf16.msra.mxu0 %v282_v16  ;;  %297 = vmatpush3.bf16.msra.mxu1 %v282_v16 }
  0x15   :  { %284 = vmatprep.subr.bf16.mxu0 %v310_v0  ;;  %292 = vmatprep.subr.bf16.mxu1 %v310_v0 }
  0x18   :  { %286 = vmatpush3.bf16.msra.mxu0 %v285_v19  ;;  %298 = vmatpush3.bf16.msra.mxu1 %v285_v19 }
  0x1b   :  { %261 = vmatmul.mubr.msk.f32.vlgmr.msra.gmra.mrb[0].mxu0 %vm42_vm1, %v20_v20  ;;  %264 = vmatmul.mubr.msk.f32.vlgmr.msra.gmra.mrb[0].mxu1 %vm42_vm1, %v21_v21 }
  0x1c   :  { %266 = vmatprep.mubr.msk.f32.mxu1 %vm311_vm0, %v312_v6 }
  0x1f   :  { %267 = vmatmul.mubr.msk.f32.gmra.mrb[2].mxu1 %vm42_vm1, %v22_v22 }
  0xee   :  { %v118_v24 = vpop.f32.mrb[0].mxu0  ;;  %v123_v25 = vpop.f32.mrb[0].mxu1 }
  0xef   :  { %v119_v26 = vadd.f32 %v212_v23, %v118_v24  ;;  %v124_v27 = vadd.f32 %v212_v23, %v123_v25  ;;  %v265_v28 = vpop.f32.mrb[1].mxu1  ;;  %v262_v29 = vpop.f32.mrb[1].mxu0 }
  0xf1   :  { %v133_v30 = vsel %vm132_vm2, %v119_v26, 0.0  ;;  %v134_v31 = vsel %vm132_vm2, %v124_v27, 0.0 }
  0xf2   :  { %v135_v32 = vadd.f32 %v134_v31, %v133_v30  ;;  %v128_v33 = vpop.f32.mrb[2].mxu1 }
  0xf3   :  { %v129_v34 = vadd.f32 %v212_v23, %v128_v33  ;;  %v268_v35 = vpop.f32.mrb[3].mxu1 }
  0xf5   :  { %v137_v36 = vsel %vm136_vm3, %v129_v34, 0.0 }
  0xf6   :  { %v138_v37 = vadd.f32 %v137_v36, %v135_v32 }
  0xf8   :  { %v139_v38 = vrot.slane %v138_v37, 4 }
  0xfa   :  { %v140_v39 = vadd.f32 %v139_v38, %v138_v37 }
  0xfc   :  { %v141_v40 = vrot.slane %v140_v39, 2 }
  0xfe   :  { %v142_v41 = vadd.f32 %v141_v40, %v140_v39 }
 0x100   :  { %v143_v42 = vrot.slane %v142_v41, 1 }
 0x102   :  { %v144_v43 = vadd.f32 %v143_v42, %v142_v41 }
 0x104   :  { %v146_v44 = vmul.f32 0.05, %v144_v43 }
 0x106   :  { %v147_v45 = vsub.f32 %v119_v26, %v146_v44  ;;  %v148_v46 = vsub.f32 %v124_v27, %v146_v44  ;;  %v149_v47 = vsub.f32 %v129_v34, %v146_v44 }
 0x108   :  { %v150_v48 = vmul.f32 %v147_v45, %v147_v45  ;;  %v151_v49 = vmul.f32 %v148_v46, %v148_v46  ;;  %v152_v50 = vmul.f32 %v149_v47, %v149_v47 }
 0x10a   :  { %v153_v51 = vsel %vm132_vm2, %v150_v48, 0.0  ;;  %v154_v52 = vsel %vm132_vm2, %v151_v49, 0.0  ;;  %v156_v54 = vsel %vm136_vm3, %v152_v50, 0.0 }
 0x10b   :  { %v155_v53 = vadd.f32 %v154_v52, %v153_v51 }
 0x10d   :  { %v157_v55 = vadd.f32 %v156_v54, %v155_v53 }
 0x10f   :  { %v158_v56 = vrot.slane %v157_v55, 4 }
 0x111   :  { %v159_v57 = vadd.f32 %v158_v56, %v157_v55 }
 0x113   :  { %v160_v58 = vrot.slane %v159_v57, 2 }
 0x115   :  { %v161_v59 = vadd.f32 %v160_v58, %v159_v57 }
 0x117   :  { %v162_v60 = vrot.slane %v161_v59, 1 }
 0x119   :  { %v163_v61 = vadd.f32 %v162_v60, %v161_v59 }
 0x11b   :  { %v164_v62 = vmul.f32 0.05, %v163_v61 }
 0x11d   :  { %v165_v63 = vadd.f32 1e-05, %v164_v62 }
 0x11f   :  { %302 = vrsqrt.f32 %v165_v63 }
 0x129   :  { %v303_v0 = vpop.eup %302 }
 0x12a   :  { %v167_v2 = vmul.f32 %v303_v0, %v147_v45  ;;  %v168_v3 = vmul.f32 %v303_v0, %v148_v46  ;;  %v169_v4 = vmul.f32 %v303_v0, %v149_v47 }
 0x12c   :  { %v177_v6 = vmul.f32 %v216_v1, %v167_v2  ;;  %v178_v7 = vmul.f32 %v216_v1, %v168_v3  ;;  %v179_v8 = vmul.f32 %v216_v1, %v169_v4 }
 0x12e   :  { %v187_v9 = vadd.f32 %v217_v5, %v177_v6  ;;  %v188_v10 = vadd.f32 %v217_v5, %v178_v7  ;;  %v189_v11 = vadd.f32 %v217_v5, %v179_v8 }
 0x130   :  { %v193_v12 = vmul.f32 1.442695, %v187_v9  ;;  %v195_v13 = vmul.f32 1.442695, %v188_v10  ;;  %v197_v14 = vmul.f32 1.442695, %v189_v11 }
 0x131   :  { %vm190_vm4 = vcmp.gt.f32.partialorder %v187_v9, 0.0  ;;  %vm191_vm5 = vcmp.gt.f32.partialorder %v188_v10, 0.0  ;;  %vm192_vm6 = vcmp.gt.f32.partialorder %v189_v11, 0.0 }
 0x132   :  { %304 = vpow2.f32 %v193_v12 }
 0x133   :  { %306 = vpow2.f32 %v195_v13 }
 0x134   :  { %308 = vpow2.f32 %v197_v14 }
 0x13c   :  { %v305_v15 = vpop.eup %304 }
 0x13d   :  { %v307_v16 = vpop.eup %306  ;;  %v218_v17 = vadd.f32 -1.0, %v305_v15 }
 0x13e   :  { %v309_v18 = vpop.eup %308  ;;  %v219_v19 = vadd.f32 -1.0, %v307_v16 }
 0x13f   :  { %v220_v20 = vadd.f32 -1.0, %v309_v18  ;;  %v202_v21 = vsel %vm190_vm4, %v187_v9, %v218_v17 }
 0x140   :  { %v203_v22 = vsel %vm191_vm5, %v188_v10, %v219_v19  ;;  %205 = vst.msk [vmem:[%s423_s5] sm:$0xff] %vm132_vm2, %v202_v21 }
 0x141   :  { %v204_v23 = vsel %vm192_vm6, %v189_v11, %v220_v20  ;;  %206 = vst.msk [vmem:[%s423_s5 + $0x8] sm:$0xff] %vm132_vm2, %v203_v22 }
 0x142   :  { %207 = vst.msk [vmem:[%s423_s5 + $0x10] sm:$0xf] %vm136_vm3, %v204_v23 }

// kernel: informer_forward.28
= control target key start
LH: loop header
LB: loop body
LE: loop exit
PB: predicated region body
PF: predicated region fallthrough
CT: control target
= control target key end

     0   :  { %vm36_vm0 = vcmask 261120   ;;  %vm127_vm1 = vcmask 254976   ;;  %s290_s2 = inlined_call_operand.vmem [shape: f32[32,32], index: 2, kind: input, shape index: {}]   ;;  %s291_s0 = inlined_call_operand.vmem [shape: f32[10,32], index: 0, kind: input, shape index: {}]   ;;  %s292_s3 = inlined_call_operand.vmem [shape: f32[1,32], index: 3, kind: input, shape index: {}]   ;;  %s293_s1 = inlined_call_operand.vmem [shape: f32[10,32], index: 1, kind: input, shape index: {}]   ;;  %s294_s4 = inlined_call_operand.vmem [shape: f32[1,32], index: 4, kind: input, shape index: {}]   ;;  %s295_s5 = inlined_call_operand.vmem [shape: f32[1,32], index: 5, kind: input, shape index: {}]   ;;  %s296_s6 = inlined_call_operand.vmem [shape: f32[10,32], index: 6, kind: output, shape index: {}]  }
   0x1   :  { %v25_v0 = vld [vmem:[%s290_s2] sm:$0xff]  ;;  %v26_v1 = vld [vmem:[%s290_s2 + $0x8] sm:$0xff]  ;;  %v27_v2 = vld [vmem:[%s290_s2 + $0x10] sm:$0xff] }
   0x2   :  { %v196_v3 = vpack.c.bf16 %v26_v1, %v25_v0  ;;  %v28_v4 = vld [vmem:[%s290_s2 + $0x18] sm:$0xff]  ;;  %v23_v5 = vld [vmem:[%s291_s0] sm:$0xff]  ;;  %v24_v7 = vld [vmem:[%s291_s0 + $0x8] sm:$0x3] }
   0x3   :  { %v200_v6 = vpack.c.bf16 %v28_v4, %v27_v2  ;;  %193 = vmatprep.mubr.msk.f32.mxu0 %vm36_vm0, %v23_v5  ;;  %v174_v8 = vld [vmem:[%s292_s3] ss:$0 sm:$0xff]  ;;  %v119_v14 = vld [vmem:[%s293_s1 + $0x8] sm:$0x3] }
   0x4   :  { %197 = vmatprep.subr.bf16.mxu0 %v196_v3  ;;  %v118_v11 = vld [vmem:[%s293_s1] sm:$0xff] }
   0x5   :  { %199 = vmatpush3.bf16.msra.mxu0 %v196_v3  ;;  %v177_v36 = vld [vmem:[%s294_s4] ss:$0 sm:$0xff] }
   0x6   :  { %201 = vmatprep.subr.bf16.mxu0 %v200_v6  ;;  %v178_v38 = vld [vmem:[%s295_s5] ss:$0 sm:$0xff] }
   0x9   :  { %203 = vmatpush3.bf16.msra.mxu0 %v200_v6 }
   0xc   :  { %194 = vmatmul.mubr.msk.f32.vlgmr.msra.gmra.mrb[0].mxu0 %vm36_vm0, %v24_v7 }
  0xdf   :  { %v195_v9 = vpop.f32.mrb[0].mxu0 }
  0xe0   :  { %v109_v10 = vpop.f32.mrb[1].mxu0  ;;  %v115_v12 = vadd.f32 %v195_v9, %v174_v8 }
  0xe1   :  { %v110_v13 = vadd.f32 %v174_v8, %v109_v10 }
  0xe2   :  { %v121_v17 = vadd.f32 %v119_v14, %v115_v12 }
  0xe3   :  { %v120_v15 = vadd.f32 %v118_v11, %v110_v13 }
  0xe4   :  { %v128_v18 = vsel %vm127_vm1, %v121_v17, 0.0 }
  0xe5   :  { %v124_v16 = vsel %vm36_vm0, %v120_v15, 0.0 }
  0xe6   :  { %125 = vadd.xlane.f32.xlu0 %v124_v16 }
  0xea   :  { %129 = vadd.xlane.f32.xlu0 %v128_v18 }
 0x173   :  { %v126_v19 = vpop.xlane.xlu0 %125 }
 0x174   :  { %v132_v20 = vmul.f32 0.03125, %v126_v19 }
 0x176   :  { %v134_v21 = vsub.f32 %v120_v15, %v132_v20 }
 0x177   :  { %v130_v22 = vpop.xlane.xlu0 %129 }
 0x178   :  { %v133_v23 = vmul.f32 0.03125, %v130_v22  ;;  %v136_v24 = vmul.f32 %v134_v21, %v134_v21 }
 0x17a   :  { %v135_v25 = vsub.f32 %v121_v17, %v133_v23  ;;  %v138_v26 = vsel %vm36_vm0, %v136_v24, 0.0 }
 0x17b   :  { %139 = vadd.xlane.f32.xlu1 %v138_v26 }
 0x17c   :  { %v137_v27 = vmul.f32 %v135_v25, %v135_v25 }
 0x17e   :  { %v141_v28 = vsel %vm127_vm1, %v137_v27, 0.0 }
 0x17f   :  { %142 = vadd.xlane.f32.xlu1 %v141_v28 }
 0x208   :  { %v140_v29 = vpop.xlane.xlu1 %139 }
 0x209   :  { %v144_v30 = vmul.f32 0.03125, %v140_v29 }
 0x20b   :  { %v146_v31 = vadd.f32 1e-05, %v144_v30 }
 0x20c   :  { %v143_v32 = vpop.xlane.xlu1 %142 }
 0x20d   :  { %204 = vrsqrt.f32 %v146_v31  ;;  %v145_v33 = vmul.f32 0.03125, %v143_v32 }
 0x20f   :  { %v147_v34 = vadd.f32 1e-05, %v145_v33 }
 0x211   :  { %206 = vrsqrt.f32 %v147_v34 }
 0x217   :  { %v205_v35 = vpop.eup %204 }
 0x218   :  { %v150_v37 = vmul.f32 %v205_v35, %v134_v21 }
 0x21a   :  { %v158_v39 = vmul.f32 %v177_v36, %v150_v37 }
 0x21b   :  { %v207_v40 = vpop.eup %206 }
 0x21c   :  { %v166_v41 = vadd.f32 %v178_v38, %v158_v39  ;;  %v151_v42 = vmul.f32 %v207_v40, %v135_v25 }
 0x21e   :  { %168 = vst.msk [vmem:[%s296_s6] sm:$0xff] %vm36_vm0, %v166_v41  ;;  %v159_v43 = vmul.f32 %v177_v36, %v151_v42 }
 0x220   :  { %v167_v44 = vadd.f32 %v178_v38, %v159_v43 }
 0x222   :  { %169 = vst.msk [vmem:[%s296_s6 + $0x8] sm:$0x3] %vm127_vm1, %v167_v44 }

// kernel: informer_forward.29
= control target key start
LH: loop header
LB: loop body
LE: loop exit
PB: predicated region body
PF: predicated region fallthrough
CT: control target
= control target key end

     0   :  { %vm39_vm0 = vcmask 261120   ;;  %vm230_vm1 = vcmask 254976   ;;  %s441_s1 = inlined_call_operand.vmem [shape: f32[32,32], index: 1, kind: input, shape index: {}]   ;;  %s442_s0 = inlined_call_operand.vmem [shape: f32[10,32], index: 0, kind: input, shape index: {}]   ;;  %s443_s3 = inlined_call_operand.vmem [shape: f32[32,32], index: 3, kind: input, shape index: {}]   ;;  %s444_s2 = inlined_call_operand.vmem [shape: f32[1,32], index: 2, kind: input, shape index: {}]   ;;  %s445_s4 = inlined_call_operand.vmem [shape: f32[1,32], index: 4, kind: input, shape index: {}]   ;;  %s446_s5 = inlined_call_operand.vmem [shape: f32[1,32], index: 5, kind: input, shape index: {}]   ;;  %s447_s6 = inlined_call_operand.vmem [shape: f32[1,32], index: 6, kind: input, shape index: {}]   ;;  %s448_s7 = inlined_call_operand.vmem [shape: f32[10,32], index: 7, kind: output, shape index: {}]  }
   0x1   :  { %v28_v0 = vld [vmem:[%s441_s1] sm:$0xff]  ;;  %v29_v1 = vld [vmem:[%s441_s1 + $0x8] sm:$0xff]  ;;  %v30_v2 = vld [vmem:[%s441_s1 + $0x10] sm:$0xff] }
   0x2   :  { %v319_v3 = vpack.c.bf16 %v29_v1, %v28_v0  ;;  %v31_v4 = vld [vmem:[%s441_s1 + $0x18] sm:$0xff]  ;;  %v26_v5 = vld [vmem:[%s442_s0] sm:$0xff]  ;;  %v27_v7 = vld [vmem:[%s442_s0 + $0x8] sm:$0x3] }
   0x3   :  { %v323_v6 = vpack.c.bf16 %v31_v4, %v30_v2  ;;  %305 = vmatprep.mubr.msk.f32.mxu0 %vm39_vm0, %v26_v5  ;;  %v131_v8 = vld [vmem:[%s443_s3] sm:$0xff]  ;;  %v132_v9 = vld [vmem:[%s443_s3 + $0x8] sm:$0xff]  ;;  %v133_v11 = vld [vmem:[%s443_s3 + $0x10] sm:$0xff] }
   0x4   :  { %320 = vmatprep.subr.bf16.mxu0 %v319_v3  ;;  %v327_v10 = vpack.c.bf16 %v132_v9, %v131_v8  ;;  %v134_v12 = vld [vmem:[%s443_s3 + $0x18] sm:$0xff]  ;;  %v277_v14 = vld [vmem:[%s444_s2] ss:$0 sm:$0xff] }
   0x5   :  { %322 = vmatpush3.bf16.msra.mxu0 %v319_v3  ;;  %v331_v13 = vpack.c.bf16 %v134_v12, %v133_v11  ;;  %v280_v29 = vld [vmem:[%s445_s4] ss:$0 sm:$0xff] }
   0x6   :  { %324 = vmatprep.subr.bf16.mxu0 %v323_v6  ;;  %328 = vmatprep.subr.bf16.mxu1 %v327_v10  ;;  %v283_v55 = vld [vmem:[%s446_s5] ss:$0 sm:$0xff] }
   0x7   :  { %330 = vmatpush3.bf16.msra.mxu1 %v327_v10  ;;  %v284_v57 = vld [vmem:[%s447_s6] ss:$0 sm:$0xff] }
   0x8   :  { %332 = vmatprep.subr.bf16.mxu1 %v331_v13 }
   0x9   :  { %326 = vmatpush3.bf16.msra.mxu0 %v323_v6 }
   0xb   :  { %334 = vmatpush3.bf16.msra.mxu1 %v331_v13 }
   0xc   :  { %306 = vmatmul.mubr.msk.f32.vlgmr.msra.gmra.mrb[0].mxu0 %vm39_vm0, %v27_v7 }
  0xdf   :  { %v307_v15 = vpop.f32.mrb[0].mxu0 }
  0xe0   :  { %v118_v16 = vadd.f32 %v307_v15, %v277_v14  ;;  %v112_v17 = vpop.f32.mrb[1].mxu0 }
  0xe1   :  { %v113_v18 = vadd.f32 %v277_v14, %v112_v17 }
  0xe2   :  { %v124_v19 = vmul.f32 0.70710677, %v118_v16  ;;  %v122_v26 = vmul.f32 0.5, %v118_v16 }
  0xe3   :  { %v123_v20 = vmul.f32 0.70710677, %v113_v18  ;;  %v121_v24 = vmul.f32 0.5, %v113_v18 }
  0xe4   :  { %335 = verf.f32 %v124_v19 }
  0xe5   :  { %337 = verf.f32 %v123_v20 }
  0xee   :  { %v336_v21 = vpop.eup %335 }
  0xef   :  { %v338_v22 = vpop.eup %337  ;;  %v128_v23 = vadd.f32 1.0, %v336_v21 }
  0xf0   :  { %v127_v25 = vadd.f32 1.0, %v338_v22 }
  0xf1   :  { %v130_v28 = vmul.f32 %v128_v23, %v122_v26 }
  0xf2   :  { %v129_v27 = vmul.f32 %v127_v25, %v121_v24 }
  0xf4   :  { %316 = vmatprep.mubr.msk.f32.mxu1 %vm39_vm0, %v129_v27 }
  0xf5   :  { %317 = vmatmul.mubr.msk.f32.vlgmr.msra.gmra.mrb[0].mxu1 %vm39_vm0, %v130_v28 }
 0x1c8   :  { %v318_v30 = vpop.f32.mrb[0].mxu1 }
 0x1c9   :  { %v214_v31 = vpop.f32.mrb[1].mxu1  ;;  %v220_v32 = vadd.f32 %v318_v30, %v280_v29 }
 0x1ca   :  { %v215_v33 = vadd.f32 %v280_v29, %v214_v31 }
 0x1cb   :  { %v224_v36 = vadd.f32 %v220_v32, %v27_v7 }
 0x1cc   :  { %v223_v34 = vadd.f32 %v215_v33, %v26_v5 }
 0x1cd   :  { %v231_v37 = vsel %vm230_vm1, %v224_v36, 0.0 }
 0x1ce   :  { %v227_v35 = vsel %vm39_vm0, %v223_v34, 0.0 }
 0x1cf   :  { %228 = vadd.xlane.f32.xlu0 %v227_v35 }
 0x1d3   :  { %232 = vadd.xlane.f32.xlu0 %v231_v37 }
 0x25c   :  { %v229_v38 = vpop.xlane.xlu0 %228 }
 0x25d   :  { %v235_v39 = vmul.f32 0.03125, %v229_v38 }
 0x25f   :  { %v237_v40 = vsub.f32 %v223_v34, %v235_v39 }
 0x260   :  { %v233_v41 = vpop.xlane.xlu0 %232 }
 0x261   :  { %v236_v42 = vmul.f32 0.03125, %v233_v41  ;;  %v239_v43 = vmul.f32 %v237_v40, %v237_v40 }
 0x263   :  { %v238_v44 = vsub.f32 %v224_v36, %v236_v42  ;;  %v241_v45 = vsel %vm39_vm0, %v239_v43, 0.0 }
 0x264   :  { %242 = vadd.xlane.f32.xlu1 %v241_v45 }
 0x265   :  { %v240_v46 = vmul.f32 %v238_v44, %v238_v44 }
 0x267   :  { %v244_v47 = vsel %vm230_vm1, %v240_v46, 0.0 }
 0x268   :  { %245 = vadd.xlane.f32.xlu1 %v244_v47 }
 0x2f1   :  { %v243_v48 = vpop.xlane.xlu1 %242 }
 0x2f2   :  { %v247_v49 = vmul.f32 0.03125, %v243_v48 }
 0x2f4   :  { %v249_v50 = vadd.f32 1e-05, %v247_v49 }
 0x2f5   :  { %v246_v51 = vpop.xlane.xlu1 %245 }
 0x2f6   :  { %339 = vrsqrt.f32 %v249_v50  ;;  %v248_v52 = vmul.f32 0.03125, %v246_v51 }
 0x2f8   :  { %v250_v53 = vadd.f32 1e-05, %v248_v52 }
 0x2fa   :  { %341 = vrsqrt.f32 %v250_v53 }
 0x300   :  { %v340_v54 = vpop.eup %339 }
 0x301   :  { %v253_v56 = vmul.f32 %v340_v54, %v237_v40 }
 0x303   :  { %v261_v58 = vmul.f32 %v283_v55, %v253_v56 }
 0x304   :  { %v342_v59 = vpop.eup %341 }
 0x305   :  { %v269_v60 = vadd.f32 %v284_v57, %v261_v58  ;;  %v254_v61 = vmul.f32 %v342_v59, %v238_v44 }
 0x307   :  { %271 = vst.msk [vmem:[%s448_s7] sm:$0xff] %vm39_vm0, %v269_v60  ;;  %v262_v62 = vmul.f32 %v283_v55, %v254_v61 }
 0x309   :  { %v270_v63 = vadd.f32 %v284_v57, %v262_v62 }
 0x30b   :  { %272 = vst.msk [vmem:[%s448_s7 + $0x8] sm:$0x3] %vm230_vm1, %v270_v63 }

// kernel: informer_forward.27
= control target key start
LH: loop header
LB: loop body
LE: loop exit
PB: predicated region body
PF: predicated region fallthrough
CT: control target
= control target key end

     0   :  { %vm38_vm0 = vcmask 64512   ;;  %v1545_v0 = vmov 0.0   ;;  %vm1546_vm1 = vmmov 0   ;;  %vm655_vm2 = vcmask 36864   ;;  %s1779_s1 = inlined_call_operand.vmem [shape: f32[8,5,8], index: 1, kind: input, shape index: {}]   ;;  %s1780_s0 = inlined_call_operand.vmem [shape: f32[8,5,8], index: 0, kind: input, shape index: {}]   ;;  %s1781_s2 = inlined_call_operand.vmem [shape: f32[8,5,8], index: 2, kind: input, shape index: {}]   ;;  %s1782_s3 = inlined_call_operand.vmem [shape: f32[8,5,8], index: 3, kind: output, shape index: {}]  }
   0x1   :  { %1431 = vmatprep.subr.mxu0 %v1545_v0  ;;  %v22_v1 = vld [vmem:[%s1779_s1] sm:$0x1f]  ;;  %1433 = vmatprep.mubr.msk.f32.mxu0 %vm1546_vm1, %v1545_v0  ;;  %v23_v2 = vld [vmem:[%s1779_s1 + $0x8] sm:$0x1f]  ;;  %v24_v4 = vld [vmem:[%s1779_s1 + $0x10] sm:$0x1f] }
   0x2   :  { %1432 = vmatpush3.xpose.msk.msra.mxu0 %vm38_vm0, %v22_v1  ;;  %v14_v3 = vld [vmem:[%s1780_s0] sm:$0x1f]  ;;  %1436 = vmatprep.subr.mxu1 %v1545_v0  ;;  %v15_v5 = vld [vmem:[%s1780_s0 + $0x8] sm:$0x1f]  ;;  %v25_v6 = vld [vmem:[%s1779_s1 + $0x18] sm:$0x1f] }
   0x3   :  { %1441 = vmatprep.subr.mxu0 %v1545_v0  ;;  %1437 = vmatpush3.xpose.msk.msra.mxu1 %vm38_vm0, %v23_v2  ;;  %v16_v7 = vld [vmem:[%s1780_s0 + $0x10] sm:$0x1f]  ;;  %v26_v8 = vld [vmem:[%s1779_s1 + $0x20] sm:$0x1f]  ;;  %v17_v9 = vld [vmem:[%s1780_s0 + $0x18] sm:$0x1f] }
   0x4   :  { %1438 = vmatprep.mubr.msk.f32.mxu1 %vm1546_vm1, %v1545_v0  ;;  %1446 = vmatprep.subr.mxu1 %v1545_v0  ;;  %v27_v10 = vld [vmem:[%s1779_s1 + $0x28] sm:$0x1f]  ;;  %v18_v11 = vld [vmem:[%s1780_s0 + $0x20] sm:$0x1f]  ;;  %v28_v12 = vld [vmem:[%s1779_s1 + $0x30] sm:$0x1f] }
   0x5   :  { %1434 = vmatmul.mubr.msk.f32.vlgmr.msra.gmra.mrb[0].mxu0 %vm38_vm0, %v14_v3  ;;  %v19_v13 = vld [vmem:[%s1780_s0 + $0x28] sm:$0x1f]  ;;  %v29_v14 = vld [vmem:[%s1779_s1 + $0x38] sm:$0x1f]  ;;  %v20_v15 = vld [vmem:[%s1780_s0 + $0x30] sm:$0x1f] }
   0x6   :  { %1442 = vmatpush3.xpose.msk.msra.mxu0 %vm38_vm0, %v24_v4  ;;  %1443 = vmatprep.mubr.msk.f32.mxu0 %vm1546_vm1, %v1545_v0  ;;  %v21_v16 = vld [vmem:[%s1780_s0 + $0x38] sm:$0x1f]  ;;  %vm748_vm3 = vcmask 1044480   ;;  %vm744_vm4 = vcmask 39936   ;;  %vm1354_vm5 = vcmask 61440  }
   0x7   :  { %1439 = vmatmul.mubr.msk.f32.vlgmr.msra.gmra.mrb[0].mxu1 %vm38_vm0, %v15_v5  ;;  %1451 = vmatprep.subr.mxu0 %v1545_v0 }
   0x8   :  { %1447 = vmatpush3.xpose.msk.msra.mxu1 %vm38_vm0, %v25_v6  ;;  %1448 = vmatprep.mubr.msk.f32.mxu1 %vm1546_vm1, %v1545_v0 }
   0x9   :  { %1444 = vmatmul.mubr.msk.f32.vlgmr.msra.gmra.mrb[2].mxu0 %vm38_vm0, %v16_v7  ;;  %1456 = vmatprep.subr.mxu1 %v1545_v0 }
   0xa   :  { %1452 = vmatpush3.xpose.msk.msra.mxu0 %vm38_vm0, %v26_v8  ;;  %1453 = vmatprep.mubr.msk.f32.mxu0 %vm1546_vm1, %v1545_v0 }
   0xb   :  { %1449 = vmatmul.mubr.msk.f32.vlgmr.msra.gmra.mrb[2].mxu1 %vm38_vm0, %v17_v9  ;;  %1461 = vmatprep.subr.mxu0 %v1545_v0 }
   0xc   :  { %1457 = vmatpush3.xpose.msk.msra.mxu1 %vm38_vm0, %v27_v10  ;;  %1458 = vmatprep.mubr.msk.f32.mxu1 %vm1546_vm1, %v1545_v0 }
   0xd   :  { %1454 = vmatmul.mubr.msk.f32.vlgmr.msra.gmra.mrb[4].mxu0 %vm38_vm0, %v18_v11  ;;  %1466 = vmatprep.subr.mxu1 %v1545_v0 }
   0xe   :  { %1462 = vmatpush3.xpose.msk.msra.mxu0 %vm38_vm0, %v28_v12  ;;  %1463 = vmatprep.mubr.msk.f32.mxu0 %vm1546_vm1, %v1545_v0 }
   0xf   :  { %1459 = vmatmul.mubr.msk.f32.vlgmr.msra.gmra.mrb[4].mxu1 %vm38_vm0, %v19_v13  ;;  %1471 = vmatprep.subr.mxu0 %v1545_v0 }
  0x10   :  { %1467 = vmatpush3.xpose.msk.msra.mxu1 %vm38_vm0, %v29_v14  ;;  %1468 = vmatprep.mubr.msk.f32.mxu1 %vm1546_vm1, %v1545_v0 }
  0x11   :  { %1464 = vmatmul.mubr.msk.f32.vlgmr.msra.gmra.mrb[6].mxu0 %vm38_vm0, %v20_v15  ;;  %1476 = vmatprep.subr.mxu1 %v1545_v0 }
  0x12   :  { %1473 = vmatprep.mubr.msk.f32.mxu0 %vm1546_vm1, %v1545_v0 }
  0x13   :  { %1469 = vmatmul.mubr.msk.f32.vlgmr.msra.gmra.mrb[6].mxu1 %vm38_vm0, %v21_v16 }
  0x14   :  { %1478 = vmatprep.mubr.msk.f32.mxu1 %vm1546_vm1, %v1545_v0 }
  0xd8   :  { %v111_v17 = vpop.f32.mrb[0].mxu0 }
  0xd9   :  { %v647_v18 = vmul.f32 0.35355338, %v111_v17  ;;  %v1435_v19 = vpop.f32.mrb[1].mxu0 }
  0xda   :  { %v187_v20 = vpop.f32.mrb[0].mxu1 }
  0xdb   :  { %v648_v21 = vmul.f32 0.35355338, %v187_v20  ;;  %v656_v22 = vsel %vm655_vm2, %v647_v18, -inf  ;;  %v1440_v23 = vpop.f32.mrb[1].mxu1 }
  0xdc   :  { %657 = vmax.xlane.f32.xlu0 %v656_v22  ;;  %v263_v24 = vpop.f32.mrb[2].mxu0 }
  0xdd   :  { %v649_v25 = vmul.f32 0.35355338, %v263_v24  ;;  %v1445_v26 = vpop.f32.mrb[3].mxu0  ;;  %v659_v27 = vsel %vm655_vm2, %v648_v21, -inf }
  0xde   :  { %v339_v28 = vpop.f32.mrb[2].mxu1  ;;  %v30_v26 = vld [vmem:[%s1781_s2] sm:$0x1f] }
  0xdf   :  { %v650_v29 = vmul.f32 0.35355338, %v339_v28  ;;  %v662_v30 = vsel %vm655_vm2, %v649_v25, -inf  ;;  %v1450_v31 = vpop.f32.mrb[3].mxu1  ;;  %1472 = vmatpush3.msk.msra.mxu0 %vm748_vm3, %v30_v26 }
  0xe0   :  { %660 = vmax.xlane.f32.xlu0 %v659_v27  ;;  %663 = vmax.xlane.f32.xlu1 %v662_v30  ;;  %v415_v32 = vpop.f32.mrb[4].mxu0  ;;  %v31_v27 = vld [vmem:[%s1781_s2 + $0x8] sm:$0x1f] }
  0xe1   :  { %v651_v33 = vmul.f32 0.35355338, %v415_v32  ;;  %v1455_v34 = vpop.f32.mrb[5].mxu0  ;;  %v665_v35 = vsel %vm655_vm2, %v650_v29, -inf  ;;  %1481 = vmatprep.subr.mxu0 %v1545_v0  ;;  %1477 = vmatpush3.msk.msra.mxu1 %vm748_vm3, %v31_v27 }
  0xe2   :  { %v491_v36 = vpop.f32.mrb[4].mxu1  ;;  %1486 = vmatprep.subr.mxu1 %v1545_v0 }
  0xe3   :  { %v652_v37 = vmul.f32 0.35355338, %v491_v36  ;;  %v668_v38 = vsel %vm655_vm2, %v651_v33, -inf  ;;  %v1460_v39 = vpop.f32.mrb[5].mxu1  ;;  %v32_v36 = vld [vmem:[%s1781_s2 + $0x10] sm:$0x1f] }
  0xe4   :  { %666 = vmax.xlane.f32.xlu1 %v665_v35  ;;  %669 = vmax.xlane.f32.xlu0 %v668_v38  ;;  %v567_v40 = vpop.f32.mrb[6].mxu0 }
  0xe5   :  { %v653_v41 = vmul.f32 0.35355338, %v567_v40  ;;  %v671_v42 = vsel %vm655_vm2, %v652_v37, -inf  ;;  %v1465_v43 = vpop.f32.mrb[7].mxu0 }
  0xe6   :  { %v643_v44 = vpop.f32.mrb[6].mxu1 }
  0xe7   :  { %v654_v45 = vmul.f32 0.35355338, %v643_v44  ;;  %v674_v46 = vsel %vm655_vm2, %v653_v41, -inf  ;;  %v1470_v47 = vpop.f32.mrb[7].mxu1  ;;  %v34_v44 = vld [vmem:[%s1781_s2 + $0x20] sm:$0x1f] }
  0xe8   :  { %672 = vmax.xlane.f32.xlu1 %v671_v42  ;;  %675 = vmax.xlane.f32.xlu0 %v674_v46  ;;  %v33_v42 = vld [vmem:[%s1781_s2 + $0x18] sm:$0x1f] }
  0xe9   :  { %v677_v48 = vsel %vm655_vm2, %v654_v45, -inf }
  0xec   :  { %678 = vmax.xlane.f32.xlu1 %v677_v48  ;;  %v35_v48 = vld [vmem:[%s1781_s2 + $0x28] sm:$0x1f] }
 0x169   :  { %v658_v49 = vpop.xlane.xlu0 %657 }
 0x16a   :  { %v680_v50 = vsub.f32 %v647_v18, %v658_v49 }
 0x16c   :  { %v688_v51 = vmul.f32 1.442695, %v680_v50  ;;  %v36_v50 = vld [vmem:[%s1781_s2 + $0x30] sm:$0x1f] }
 0x16d   :  { %v661_v52 = vpop.xlane.xlu0 %660  ;;  %v664_v53 = vpop.xlane.xlu1 %663 }
 0x16e   :  { %1513 = vpow2.f32 %v688_v51  ;;  %v681_v54 = vsub.f32 %v648_v21, %v661_v52  ;;  %v682_v55 = vsub.f32 %v649_v25, %v664_v53 }
 0x170   :  { %v690_v56 = vmul.f32 1.442695, %v681_v54  ;;  %v692_v57 = vmul.f32 1.442695, %v682_v55  ;;  %v37_v54 = vld [vmem:[%s1781_s2 + $0x38] sm:$0x1f] }
 0x171   :  { %v667_v58 = vpop.xlane.xlu1 %666  ;;  %v670_v59 = vpop.xlane.xlu0 %669 }
 0x172   :  { %1515 = vpow2.f32 %v690_v56  ;;  %v683_v60 = vsub.f32 %v650_v29, %v667_v58  ;;  %v684_v61 = vsub.f32 %v651_v33, %v670_v59 }
 0x173   :  { %1517 = vpow2.f32 %v692_v57 }
 0x174   :  { %v694_v62 = vmul.f32 1.442695, %v683_v60  ;;  %v696_v63 = vmul.f32 1.442695, %v684_v61 }
 0x175   :  { %v673_v1 = vpop.xlane.xlu1 %672  ;;  %v676_v2 = vpop.xlane.xlu0 %675 }
 0x176   :  { %1519 = vpow2.f32 %v694_v62  ;;  %v685_v3 = vsub.f32 %v652_v37, %v673_v1  ;;  %v686_v4 = vsub.f32 %v653_v41, %v676_v2 }
 0x177   :  { %1521 = vpow2.f32 %v696_v63 }
 0x178   :  { %v1514_v5 = vpop.eup %1513  ;;  %v698_v6 = vmul.f32 1.442695, %v685_v3  ;;  %v700_v7 = vmul.f32 1.442695, %v686_v4 }
 0x179   :  { %v679_v8 = vpop.xlane.xlu1 %678  ;;  %v704_v9 = vsel %vm655_vm2, %v1514_v5, 0.0 }
 0x17a   :  { %1523 = vpow2.f32 %v698_v6  ;;  %v687_v10 = vsub.f32 %v654_v45, %v679_v8  ;;  %705 = vadd.xlane.f32.xlu0 %v704_v9 }
 0x17b   :  { %1525 = vpow2.f32 %v700_v7 }
 0x17c   :  { %v1516_v11 = vpop.eup %1515  ;;  %v702_v12 = vmul.f32 1.442695, %v687_v10 }
 0x17d   :  { %v1518_v13 = vpop.eup %1517  ;;  %v707_v14 = vsel %vm655_vm2, %v1516_v11, 0.0 }
 0x17e   :  { %1527 = vpow2.f32 %v702_v12  ;;  %708 = vadd.xlane.f32.xlu1 %v707_v14  ;;  %v710_v15 = vsel %vm655_vm2, %v1518_v13, 0.0 }
 0x17f   :  { %711 = vadd.xlane.f32.xlu0 %v710_v15 }
 0x180   :  { %v1520_v16 = vpop.eup %1519 }
 0x181   :  { %v1522_v17 = vpop.eup %1521  ;;  %v713_v18 = vsel %vm655_vm2, %v1520_v16, 0.0 }
 0x182   :  { %714 = vadd.xlane.f32.xlu1 %v713_v18  ;;  %v716_v19 = vsel %vm655_vm2, %v1522_v17, 0.0 }
 0x183   :  { %717 = vadd.xlane.f32.xlu0 %v716_v19 }
 0x184   :  { %v1674_v20 = vpop.eup %1523 }
 0x185   :  { %v1676_v21 = vpop.eup %1525  ;;  %v719_v22 = vsel %vm655_vm2, %v1674_v20, 0.0 }
 0x186   :  { %720 = vadd.xlane.f32.xlu1 %v719_v22  ;;  %v722_v23 = vsel %vm655_vm2, %v1676_v21, 0.0 }
 0x187   :  { %723 = vadd.xlane.f32.xlu0 %v722_v23 }
 0x188   :  { %v1682_v24 = vpop.eup %1527 }
 0x189   :  { %v725_v25 = vsel %vm655_vm2, %v1682_v24, 0.0 }
 0x18a   :  { %726 = vadd.xlane.f32.xlu1 %v725_v25 }
 0x207   :  { %v706_v28 = vpop.xlane.xlu0 %705 }
 0x208   :  { %1529 = vrcp.f32 %v706_v28 }
 0x20b   :  { %v709_v29 = vpop.xlane.xlu1 %708 }
 0x20c   :  { %1531 = vrcp.f32 %v709_v29  ;;  %v712_v30 = vpop.xlane.xlu0 %711 }
 0x20d   :  { %1533 = vrcp.f32 %v712_v30 }
 0x20f   :  { %v715_v31 = vpop.xlane.xlu1 %714 }
 0x210   :  { %1535 = vrcp.f32 %v715_v31  ;;  %v718_v32 = vpop.xlane.xlu0 %717 }
 0x211   :  { %1537 = vrcp.f32 %v718_v32 }
 0x212   :  { %v1530_v33 = vpop.eup %1529 }
 0x213   :  { %v736_v34 = vmul.f32 %v1530_v33, %v1514_v5  ;;  %v721_v35 = vpop.xlane.xlu1 %720 }
 0x214   :  { %1539 = vrcp.f32 %v721_v35  ;;  %v724_v37 = vpop.xlane.xlu0 %723 }
 0x215   :  { %1541 = vrcp.f32 %v724_v37  ;;  %1474 = vmatmul.mubr.msk.f32.vlgmr.msra.gmra.mrb[8].mxu0 %vm744_vm4, %v736_v34 }
 0x216   :  { %v1532_v38 = vpop.eup %1531  ;;  %1482 = vmatpush3.msk.msra.mxu0 %vm748_vm3, %v32_v36  ;;  %1483 = vmatprep.mubr.msk.f32.mxu0 %vm1546_vm1, %v1545_v0 }
 0x217   :  { %v1534_v39 = vpop.eup %1533  ;;  %v737_v40 = vmul.f32 %v1532_v38, %v1516_v11  ;;  %v727_v41 = vpop.xlane.xlu1 %726  ;;  %1491 = vmatprep.subr.mxu0 %v1545_v0 }
 0x218   :  { %v738_v43 = vmul.f32 %v1534_v39, %v1518_v13  ;;  %1543 = vrcp.f32 %v727_v41 }
 0x219   :  { %1479 = vmatmul.mubr.msk.f32.vlgmr.msra.gmra.mrb[8].mxu1 %vm744_vm4, %v737_v40 }
 0x21a   :  { %v1536_v45 = vpop.eup %1535  ;;  %1484 = vmatmul.mubr.msk.f32.vlgmr.msra.gmra.mrb[10].mxu0 %vm744_vm4, %v738_v43  ;;  %1487 = vmatpush3.msk.msra.mxu1 %vm748_vm3, %v33_v42 }
 0x21b   :  { %v1538_v46 = vpop.eup %1537  ;;  %v739_v47 = vmul.f32 %v1536_v45, %v1520_v16  ;;  %1488 = vmatprep.mubr.msk.f32.mxu1 %vm1546_vm1, %v1545_v0  ;;  %1492 = vmatpush3.msk.msra.mxu0 %vm748_vm3, %v34_v44 }
 0x21c   :  { %v740_v49 = vmul.f32 %v1538_v46, %v1522_v17  ;;  %1493 = vmatprep.mubr.msk.f32.mxu0 %vm1546_vm1, %v1545_v0  ;;  %1496 = vmatprep.subr.mxu1 %v1545_v0 }
 0x21d   :  { %1489 = vmatmul.mubr.msk.f32.vlgmr.msra.gmra.mrb[10].mxu1 %vm744_vm4, %v739_v47  ;;  %1501 = vmatprep.subr.mxu0 %v1545_v0 }
 0x21e   :  { %v1540_v51 = vpop.eup %1539  ;;  %1494 = vmatmul.mubr.msk.f32.vlgmr.msra.gmra.mrb[12].mxu0 %vm744_vm4, %v740_v49  ;;  %1497 = vmatpush3.msk.msra.mxu1 %vm748_vm3, %v35_v48 }
 0x21f   :  { %v1542_v52 = vpop.eup %1541  ;;  %v741_v53 = vmul.f32 %v1540_v51, %v1674_v20  ;;  %1498 = vmatprep.mubr.msk.f32.mxu1 %vm1546_vm1, %v1545_v0  ;;  %1502 = vmatpush3.msk.msra.mxu0 %vm748_vm3, %v36_v50 }
 0x220   :  { %v742_v55 = vmul.f32 %v1542_v52, %v1676_v21  ;;  %1503 = vmatprep.mubr.msk.f32.mxu0 %vm1546_vm1, %v1545_v0  ;;  %1506 = vmatprep.subr.mxu1 %v1545_v0 }
 0x221   :  { %1499 = vmatmul.mubr.msk.f32.vlgmr.msra.gmra.mrb[12].mxu1 %vm744_vm4, %v741_v53 }
 0x222   :  { %v1544_v56 = vpop.eup %1543  ;;  %1504 = vmatmul.mubr.msk.f32.vlgmr.msra.gmra.mrb[14].mxu0 %vm744_vm4, %v742_v55  ;;  %1507 = vmatpush3.msk.msra.mxu1 %vm748_vm3, %v37_v54 }
 0x223   :  { %v743_v57 = vmul.f32 %v1544_v56, %v1682_v24  ;;  %1508 = vmatprep.mubr.msk.f32.mxu1 %vm1546_vm1, %v1545_v0 }
 0x225   :  { %1509 = vmatmul.mubr.msk.f32.vlgmr.msra.gmra.mrb[14].mxu1 %vm744_vm4, %v743_v57 }
 0x2e8   :  { %v818_v58 = vpop.f32.mrb[8].mxu0 }
 0x2e9   :  { %1355 = vst.msk [vmem:[%s1782_s3] sm:$0x1f] %vm1354_vm5, %v818_v58  ;;  %v1475_v59 = vpop.f32.mrb[9].mxu0 }
 0x2ec   :  { %v894_v60 = vpop.f32.mrb[8].mxu1 }
 0x2ed   :  { %1356 = vst.msk [vmem:[%s1782_s3 + $0x8] sm:$0x1f] %vm1354_vm5, %v894_v60  ;;  %v970_v61 = vpop.f32.mrb[10].mxu0  ;;  %v1480_v62 = vpop.f32.mrb[9].mxu1 }
 0x2ee   :  { %1357 = vst.msk [vmem:[%s1782_s3 + $0x10] sm:$0x1f] %vm1354_vm5, %v970_v61  ;;  %v1485_v0 = vpop.f32.mrb[11].mxu0 }
 0x2f0   :  { %v1046_v63 = vpop.f32.mrb[10].mxu1 }
 0x2f1   :  { %1358 = vst.msk [vmem:[%s1782_s3 + $0x18] sm:$0x1f] %vm1354_vm5, %v1046_v63  ;;  %v1122_v1 = vpop.f32.mrb[12].mxu0  ;;  %v1490_v2 = vpop.f32.mrb[11].mxu1 }
 0x2f2   :  { %1359 = vst.msk [vmem:[%s1782_s3 + $0x20] sm:$0x1f] %vm1354_vm5, %v1122_v1  ;;  %v1495_v3 = vpop.f32.mrb[13].mxu0 }
 0x2f4   :  { %v1198_v4 = vpop.f32.mrb[12].mxu1 }
 0x2f5   :  { %1360 = vst.msk [vmem:[%s1782_s3 + $0x28] sm:$0x1f] %vm1354_vm5, %v1198_v4  ;;  %v1274_v5 = vpop.f32.mrb[14].mxu0  ;;  %v1500_v6 = vpop.f32.mrb[13].mxu1 }
 0x2f6   :  { %1361 = vst.msk [vmem:[%s1782_s3 + $0x30] sm:$0x1f] %vm1354_vm5, %v1274_v5  ;;  %v1505_v7 = vpop.f32.mrb[15].mxu0 }
 0x2f8   :  { %v1350_v8 = vpop.f32.mrb[14].mxu1 }
 0x2f9   :  { %1362 = vst.msk [vmem:[%s1782_s3 + $0x38] sm:$0x1f] %vm1354_vm5, %v1350_v8  ;;  %v1510_v9 = vpop.f32.mrb[15].mxu1 }

// kernel: informer_forward.30
= control target key start
LH: loop header
LB: loop body
LE: loop exit
PB: predicated region body
PF: predicated region fallthrough
CT: control target
= control target key end

     0   :  { %vm18_vm0 = vcmask 261120   ;;  %vm22_vm1 = vcmask 254976   ;;  %s119_s0 = inlined_call_operand.vmem [shape: f32[10,32], index: 0, kind: input, shape index: {}]   ;;  %s120_s1 = inlined_call_operand.vmem [shape: f32[1,32], index: 1, kind: input, shape index: {}]   ;;  %s121_s2 = inlined_call_operand.vmem [shape: f32[1,32], index: 2, kind: input, shape index: {}]   ;;  %s122_s3 = inlined_call_operand.vmem [shape: f32[10,32], index: 3, kind: output, shape index: {}]  }
   0x1   :  { %v14_v0 = vld [vmem:[%s119_s0] sm:$0xff]  ;;  %v15_v1 = vld [vmem:[%s119_s0 + $0x8] sm:$0x3] }
   0x2   :  { %v19_v2 = vsel %vm18_vm0, %v14_v0, 0.0  ;;  %v23_v3 = vsel %vm22_vm1, %v15_v1, 0.0  ;;  %v69_v21 = vld [vmem:[%s120_s1] ss:$0 sm:$0xff] }
   0x3   :  { %20 = vadd.xlane.f32.xlu0 %v19_v2  ;;  %v70_v23 = vld [vmem:[%s121_s2] ss:$0 sm:$0xff] }
   0x7   :  { %24 = vadd.xlane.f32.xlu0 %v23_v3 }
  0x90   :  { %v21_v4 = vpop.xlane.xlu0 %20 }
  0x91   :  { %v27_v5 = vmul.f32 0.03125, %v21_v4 }
  0x93   :  { %v29_v6 = vsub.f32 %v14_v0, %v27_v5 }
  0x94   :  { %v25_v7 = vpop.xlane.xlu0 %24 }
  0x95   :  { %v28_v8 = vmul.f32 0.03125, %v25_v7  ;;  %v31_v9 = vmul.f32 %v29_v6, %v29_v6 }
  0x97   :  { %v30_v10 = vsub.f32 %v15_v1, %v28_v8  ;;  %v33_v11 = vsel %vm18_vm0, %v31_v9, 0.0 }
  0x98   :  { %34 = vadd.xlane.f32.xlu1 %v33_v11 }
  0x99   :  { %v32_v12 = vmul.f32 %v30_v10, %v30_v10 }
  0x9b   :  { %v36_v13 = vsel %vm22_vm1, %v32_v12, 0.0 }
  0x9c   :  { %37 = vadd.xlane.f32.xlu1 %v36_v13 }
 0x125   :  { %v35_v14 = vpop.xlane.xlu1 %34 }
 0x126   :  { %v39_v15 = vmul.f32 0.03125, %v35_v14 }
 0x128   :  { %v41_v16 = vadd.f32 1e-05, %v39_v15 }
 0x129   :  { %v38_v17 = vpop.xlane.xlu1 %37 }
 0x12a   :  { %71 = vrsqrt.f32 %v41_v16  ;;  %v40_v18 = vmul.f32 0.03125, %v38_v17 }
 0x12c   :  { %v42_v19 = vadd.f32 1e-05, %v40_v18 }
 0x12e   :  { %73 = vrsqrt.f32 %v42_v19 }
 0x134   :  { %v72_v20 = vpop.eup %71 }
 0x135   :  { %v45_v22 = vmul.f32 %v72_v20, %v29_v6 }
 0x137   :  { %v53_v24 = vmul.f32 %v69_v21, %v45_v22 }
 0x138   :  { %v74_v25 = vpop.eup %73 }
 0x139   :  { %v61_v26 = vadd.f32 %v70_v23, %v53_v24  ;;  %v46_v27 = vmul.f32 %v74_v25, %v30_v10 }
 0x13b   :  { %63 = vst.msk [vmem:[%s122_s3] sm:$0xff] %vm18_vm0, %v61_v26  ;;  %v54_v28 = vmul.f32 %v69_v21, %v46_v27 }
 0x13d   :  { %v62_v29 = vadd.f32 %v70_v23, %v54_v28 }
 0x13f   :  { %64 = vst.msk [vmem:[%s122_s3 + $0x8] sm:$0x3] %vm22_vm1, %v62_v29 }

// kernel: informer_forward.35
= control target key start
LH: loop header
LB: loop body
LE: loop exit
PB: predicated region body
PF: predicated region fallthrough
CT: control target
= control target key end

     0   :  { %vm38_vm0 = vcmask 261120   ;;  %vm218_vm1 = vcmask 517120   ;;  %vm216_vm2 = vcmask 523264   ;;  %s384_s2 = inlined_call_operand.vmem [shape: f32[32,32], index: 2, kind: input, shape index: {}]   ;;  %s385_s4 = inlined_call_operand.vmem [shape: f32[32,64], index: 4, kind: input, shape index: {}]   ;;  %s386_s0 = inlined_call_operand.vmem [shape: f32[16,32], index: 0, kind: input, shape index: {}]   ;;  %s387_s1 = inlined_call_operand.vmem [shape: f32[10,32], index: 1, kind: input, shape index: {}]   ;;  %s388_s3 = inlined_call_operand.vmem [shape: f32[1,32], index: 3, kind: input, shape index: {}]   ;;  %s389_s5 = inlined_call_operand.vmem [shape: f32[1,64], index: 5, kind: input, shape index: {}]   ;;  %s390_s6 = inlined_call_operand.vmem [shape: f32[16,32], index: 6, kind: output, shape index: {0}]   ;;  %s391_s7 = inlined_call_operand.vmem [shape: f32[10,64], index: 7, kind: output, shape index: {1}]  }
   0x1   :  { %v27_v0 = vld [vmem:[%s384_s2] sm:$0xff]  ;;  %v28_v1 = vld [vmem:[%s384_s2 + $0x8] sm:$0xff]  ;;  %v29_v5 = vld [vmem:[%s384_s2 + $0x10] sm:$0xff] }
   0x2   :  { %v124_v2 = vld [vmem:[%s385_s4] sm:$0xff]  ;;  %v268_v3 = vpack.c.bf16 %v28_v1, %v27_v0  ;;  %v125_v4 = vld [vmem:[%s385_s4 + $0x8] sm:$0xff]  ;;  %v30_v6 = vld [vmem:[%s384_s2 + $0x18] sm:$0xff] }
   0x3   :  { %v276_v7 = vpack.c.bf16 %v125_v4, %v124_v2  ;;  %v272_v8 = vpack.c.bf16 %v30_v6, %v29_v5  ;;  %v126_v9 = vld [vmem:[%s385_s4 + $0x10] sm:$0xff]  ;;  %v127_v10 = vld [vmem:[%s385_s4 + $0x18] sm:$0xff]  ;;  %v25_v11 = vld [vmem:[%s386_s0] sm:$0xff] }
   0x4   :  { %269 = vmatprep.subr.bf16.mxu0 %v268_v3  ;;  %v280_v12 = vpack.c.bf16 %v127_v10, %v126_v9  ;;  %254 = vmatprep.mubr.msk.f32.mxu0 %vm38_vm0, %v25_v11  ;;  %v122_v13 = vld [vmem:[%s387_s1] sm:$0xff]  ;;  %v26_v14 = vld [vmem:[%s386_s0 + $0x8] sm:$0xff] }
   0x5   :  { %277 = vmatprep.subr.bf16.mxu1 %v276_v7  ;;  %271 = vmatpush3.bf16.msra.mxu0 %v268_v3  ;;  %v123_v15 = vld [vmem:[%s387_s1 + $0x8] sm:$0x3]  ;;  %v228_v16 = vld [vmem:[%s388_s3] ss:$0 sm:$0xff] }
   0x6   :  { %279 = vmatpush3.bf16.msra.mxu1 %v276_v7  ;;  %273 = vmatprep.subr.bf16.mxu0 %v272_v8  ;;  %v231_v17 = vld [vmem:[%s389_s5] ss:$0 sm:$0xff] }
   0x7   :  { %281 = vmatprep.subr.bf16.mxu1 %v280_v12  ;;  %265 = vmatprep.mubr.msk.f32.mxu1 %vm38_vm0, %v122_v13 }
   0x9   :  { %275 = vmatpush3.bf16.msra.mxu0 %v272_v8 }
   0xa   :  { %283 = vmatpush3.bf16.msra.mxu1 %v280_v12 }
   0xc   :  { %255 = vmatmul.mubr.msk.f32.vlgmr.msra.gmra.mrb[0].mxu0 %vm38_vm0, %v26_v14 }
   0xd   :  { %266 = vmatmul.mubr.msk.f32.vlgmr.msra.gmra.mrb[0].mxu1 %vm38_vm0, %v123_v15 }
  0xdf   :  { %v256_v18 = vpop.f32.mrb[0].mxu0 }
  0xe0   :  { %v117_v19 = vadd.f32 %v256_v18, %v228_v16  ;;  %v267_v20 = vpop.f32.mrb[0].mxu1  ;;  %v111_v21 = vpop.f32.mrb[1].mxu0 }
  0xe1   :  { %v213_v22 = vadd.f32 %v267_v20, %v231_v17  ;;  %v112_v23 = vadd.f32 %v228_v16, %v111_v21  ;;  %v207_v24 = vpop.f32.mrb[1].mxu1 }
  0xe2   :  { %121 = vst.msk [vmem:[%s390_s6 + $0x8] sm:$0xff] %vm38_vm0, %v117_v19  ;;  %v208_v25 = vadd.f32 %v231_v17, %v207_v24 }
  0xe3   :  { %219 = vst.msk [vmem:[%s391_s7 + $0x8] sm:$0x3] %vm218_vm1, %v213_v22 }
  0xe4   :  { %120 = vst.msk [vmem:[%s390_s6] sm:$0xff] %vm38_vm0, %v112_v23 }
  0xe5   :  { %217 = vst.msk [vmem:[%s391_s7] sm:$0xff] %vm216_vm2, %v208_v25 }

// kernel: informer_forward.33
= control target key start
LH: loop header
LB: loop body
LE: loop exit
PB: predicated region body
PF: predicated region fallthrough
CT: control target
= control target key end

     0   :  { %vm38_vm0 = vcmask 64512   ;;  %v1524_v0 = vmov 0.0   ;;  %vm1525_vm1 = vmmov 0   ;;  %v655_v17 = vlaneseq  ;;  %s1770_s1 = inlined_call_operand.vmem [shape: f32[8,8,8], index: 1, kind: input, shape index: {}]   ;;  %s1771_s0 = inlined_call_operand.vmem [shape: f32[8,8,8], index: 0, kind: input, shape index: {}]   ;;  %s1772_s2 = inlined_call_operand.vmem [shape: f32[8,8,8], index: 2, kind: input, shape index: {}]   ;;  %s1773_s3 = inlined_call_operand.vmem [shape: f32[8,8,8], index: 3, kind: output, shape index: {}]  }
   0x1   :  { %1410 = vmatprep.subr.mxu0 %v1524_v0  ;;  %v22_v1 = vld [vmem:[%s1770_s1] sm:$0xff]  ;;  %1412 = vmatprep.mubr.msk.f32.mxu0 %vm1525_vm1, %v1524_v0  ;;  %v23_v2 = vld [vmem:[%s1770_s1 + $0x8] sm:$0xff]  ;;  %v24_v4 = vld [vmem:[%s1770_s1 + $0x10] sm:$0xff] }
   0x2   :  { %1411 = vmatpush3.xpose.msk.msra.mxu0 %vm38_vm0, %v22_v1  ;;  %v14_v3 = vld [vmem:[%s1771_s0] sm:$0xff]  ;;  %1415 = vmatprep.subr.mxu1 %v1524_v0  ;;  %v15_v5 = vld [vmem:[%s1771_s0 + $0x8] sm:$0xff]  ;;  %v25_v6 = vld [vmem:[%s1770_s1 + $0x18] sm:$0xff]  ;;  %v656_v18 = vshrl.u32 %v655_v17, 7  ;;  %v658_v19 = vand.u32 127, %v655_v17 }
   0x3   :  { %1420 = vmatprep.subr.mxu0 %v1524_v0  ;;  %1416 = vmatpush3.xpose.msk.msra.mxu1 %vm38_vm0, %v23_v2  ;;  %v16_v7 = vld [vmem:[%s1771_s0 + $0x10] sm:$0xff]  ;;  %v26_v8 = vld [vmem:[%s1770_s1 + $0x20] sm:$0xff]  ;;  %v17_v9 = vld [vmem:[%s1771_s0 + $0x18] sm:$0xff] }
   0x4   :  { %1417 = vmatprep.mubr.msk.f32.mxu1 %vm1525_vm1, %v1524_v0  ;;  %1425 = vmatprep.subr.mxu1 %v1524_v0  ;;  %v27_v10 = vld [vmem:[%s1770_s1 + $0x28] sm:$0xff]  ;;  %v18_v11 = vld [vmem:[%s1771_s0 + $0x20] sm:$0xff]  ;;  %v28_v12 = vld [vmem:[%s1770_s1 + $0x30] sm:$0xff]  ;;  %vm1640_vm2 = vcmp.gt.s32.totalorder %v658_v19, %v656_v18 }
   0x5   :  { %1413 = vmatmul.mubr.msk.f32.vlgmr.msra.gmra.mrb[0].mxu0 %vm38_vm0, %v14_v3  ;;  %v19_v13 = vld [vmem:[%s1771_s0 + $0x28] sm:$0xff]  ;;  %v29_v14 = vld [vmem:[%s1770_s1 + $0x38] sm:$0xff]  ;;  %v20_v15 = vld [vmem:[%s1771_s0 + $0x30] sm:$0xff] }
   0x6   :  { %1421 = vmatpush3.xpose.msk.msra.mxu0 %vm38_vm0, %v24_v4  ;;  %1422 = vmatprep.mubr.msk.f32.mxu0 %vm1525_vm1, %v1524_v0  ;;  %v21_v16 = vld [vmem:[%s1771_s0 + $0x38] sm:$0xff] }
   0x7   :  { %1418 = vmatmul.mubr.msk.f32.vlgmr.msra.gmra.mrb[0].mxu1 %vm38_vm0, %v15_v5  ;;  %1430 = vmatprep.subr.mxu0 %v1524_v0 }
   0x8   :  { %1426 = vmatpush3.xpose.msk.msra.mxu1 %vm38_vm0, %v25_v6  ;;  %1427 = vmatprep.mubr.msk.f32.mxu1 %vm1525_vm1, %v1524_v0 }
   0x9   :  { %1423 = vmatmul.mubr.msk.f32.vlgmr.msra.gmra.mrb[2].mxu0 %vm38_vm0, %v16_v7  ;;  %1435 = vmatprep.subr.mxu1 %v1524_v0 }
   0xa   :  { %1431 = vmatpush3.xpose.msk.msra.mxu0 %vm38_vm0, %v26_v8  ;;  %1432 = vmatprep.mubr.msk.f32.mxu0 %vm1525_vm1, %v1524_v0 }
   0xb   :  { %1428 = vmatmul.mubr.msk.f32.vlgmr.msra.gmra.mrb[2].mxu1 %vm38_vm0, %v17_v9  ;;  %1440 = vmatprep.subr.mxu0 %v1524_v0 }
   0xc   :  { %1436 = vmatpush3.xpose.msk.msra.mxu1 %vm38_vm0, %v27_v10  ;;  %1437 = vmatprep.mubr.msk.f32.mxu1 %vm1525_vm1, %v1524_v0 }
   0xd   :  { %1433 = vmatmul.mubr.msk.f32.vlgmr.msra.gmra.mrb[4].mxu0 %vm38_vm0, %v18_v11  ;;  %1445 = vmatprep.subr.mxu1 %v1524_v0 }
   0xe   :  { %1441 = vmatpush3.xpose.msk.msra.mxu0 %vm38_vm0, %v28_v12  ;;  %1442 = vmatprep.mubr.msk.f32.mxu0 %vm1525_vm1, %v1524_v0 }
   0xf   :  { %1438 = vmatmul.mubr.msk.f32.vlgmr.msra.gmra.mrb[4].mxu1 %vm38_vm0, %v19_v13  ;;  %1450 = vmatprep.subr.mxu0 %v1524_v0 }
  0x10   :  { %1446 = vmatpush3.xpose.msk.msra.mxu1 %vm38_vm0, %v29_v14  ;;  %1447 = vmatprep.mubr.msk.f32.mxu1 %vm1525_vm1, %v1524_v0 }
  0x11   :  { %1443 = vmatmul.mubr.msk.f32.vlgmr.msra.gmra.mrb[6].mxu0 %vm38_vm0, %v20_v15  ;;  %1455 = vmatprep.subr.mxu1 %v1524_v0 }
  0x12   :  { %1452 = vmatprep.mubr.msk.f32.mxu0 %vm1525_vm1, %v1524_v0 }
  0x13   :  { %1448 = vmatmul.mubr.msk.f32.vlgmr.msra.gmra.mrb[6].mxu1 %vm38_vm0, %v21_v16 }
  0x14   :  { %1457 = vmatprep.mubr.msk.f32.mxu1 %vm1525_vm1, %v1524_v0 }
  0xd8   :  { %v111_v20 = vpop.f32.mrb[0].mxu0 }
  0xd9   :  { %v647_v22 = vmul.f32 0.35355338, %v111_v20  ;;  %v1414_v23 = vpop.f32.mrb[1].mxu0 }
  0xda   :  { %v187_v24 = vpop.f32.mrb[0].mxu1 }
  0xdb   :  { %v648_v25 = vmul.f32 0.35355338, %v187_v24  ;;  %v1419_v26 = vpop.f32.mrb[1].mxu1  ;;  %v662_v27 = vsel %vm1640_vm2, -inf, %v647_v22 }
  0xdc   :  { %v263_v28 = vpop.f32.mrb[2].mxu0  ;;  %v670_v29 = vsel %vm38_vm0, %v662_v27, -inf }
  0xdd   :  { %v649_v30 = vmul.f32 0.35355338, %v263_v28  ;;  %671 = vmax.xlane.f32.xlu0 %v670_v29  ;;  %v1424_v31 = vpop.f32.mrb[3].mxu0  ;;  %v663_v32 = vsel %vm1640_vm2, -inf, %v648_v25 }
  0xde   :  { %v339_v33 = vpop.f32.mrb[2].mxu1  ;;  %v673_v34 = vsel %vm38_vm0, %v663_v32, -inf }
  0xdf   :  { %v650_v35 = vmul.f32 0.35355338, %v339_v33  ;;  %v1429_v36 = vpop.f32.mrb[3].mxu1  ;;  %v664_v37 = vsel %vm1640_vm2, -inf, %v649_v30 }
  0xe0   :  { %v415_v38 = vpop.f32.mrb[4].mxu0  ;;  %v676_v39 = vsel %vm38_vm0, %v664_v37, -inf }
  0xe1   :  { %v651_v40 = vmul.f32 0.35355338, %v415_v38  ;;  %674 = vmax.xlane.f32.xlu0 %v673_v34  ;;  %677 = vmax.xlane.f32.xlu1 %v676_v39  ;;  %v1434_v41 = vpop.f32.mrb[5].mxu0  ;;  %v665_v42 = vsel %vm1640_vm2, -inf, %v650_v35  ;;  %v30_v38 = vld [vmem:[%s1772_s2] sm:$0xff]  ;;  %v31_v39 = vld [vmem:[%s1772_s2 + $0x8] sm:$0xff] }
  0xe2   :  { %v491_v43 = vpop.f32.mrb[4].mxu1  ;;  %v679_v44 = vsel %vm38_vm0, %v665_v42, -inf  ;;  %1451 = vmatpush3.msra.mxu0 %v30_v38  ;;  %1456 = vmatpush3.msra.mxu1 %v31_v39 }
  0xe3   :  { %v652_v45 = vmul.f32 0.35355338, %v491_v43  ;;  %v1439_v46 = vpop.f32.mrb[5].mxu1  ;;  %v666_v47 = vsel %vm1640_vm2, -inf, %v651_v40  ;;  %1460 = vmatprep.subr.mxu0 %v1524_v0  ;;  %1465 = vmatprep.subr.mxu1 %v1524_v0 }
  0xe4   :  { %v567_v48 = vpop.f32.mrb[6].mxu0  ;;  %v682_v49 = vsel %vm38_vm0, %v666_v47, -inf }
  0xe5   :  { %v653_v50 = vmul.f32 0.35355338, %v567_v48  ;;  %680 = vmax.xlane.f32.xlu1 %v679_v44  ;;  %683 = vmax.xlane.f32.xlu0 %v682_v49  ;;  %v667_v51 = vsel %vm1640_vm2, -inf, %v652_v45  ;;  %v1444_v52 = vpop.f32.mrb[7].mxu0  ;;  %v32_v48 = vld [vmem:[%s1772_s2 + $0x10] sm:$0xff] }
  0xe6   :  { %v643_v53 = vpop.f32.mrb[6].mxu1  ;;  %v685_v54 = vsel %vm38_vm0, %v667_v51, -inf }
  0xe7   :  { %v654_v55 = vmul.f32 0.35355338, %v643_v53  ;;  %v1449_v56 = vpop.f32.mrb[7].mxu1  ;;  %v668_v57 = vsel %vm1640_vm2, -inf, %v653_v50 }
  0xe8   :  { %v688_v58 = vsel %vm38_vm0, %v668_v57, -inf  ;;  %v34_v56 = vld [vmem:[%s1772_s2 + $0x20] sm:$0xff] }
  0xe9   :  { %686 = vmax.xlane.f32.xlu1 %v685_v54  ;;  %689 = vmax.xlane.f32.xlu0 %v688_v58  ;;  %v669_v59 = vsel %vm1640_vm2, -inf, %v654_v55  ;;  %v33_v54 = vld [vmem:[%s1772_s2 + $0x18] sm:$0xff] }
  0xea   :  { %v691_v60 = vsel %vm38_vm0, %v669_v59, -inf }
  0xed   :  { %692 = vmax.xlane.f32.xlu1 %v691_v60  ;;  %v35_v60 = vld [vmem:[%s1772_s2 + $0x28] sm:$0xff] }
 0x16a   :  { %v672_v61 = vpop.xlane.xlu0 %671 }
 0x16b   :  { %v694_v62 = vsub.f32 %v662_v27, %v672_v61 }
 0x16d   :  { %v702_v63 = vmul.f32 1.442695, %v694_v62  ;;  %v36_v62 = vld [vmem:[%s1772_s2 + $0x30] sm:$0xff] }
 0x16e   :  { %v675_v1 = vpop.xlane.xlu0 %674  ;;  %v678_v2 = vpop.xlane.xlu1 %677 }
 0x16f   :  { %1492 = vpow2.f32 %v702_v63  ;;  %v695_v3 = vsub.f32 %v663_v32, %v675_v1  ;;  %v696_v4 = vsub.f32 %v664_v37, %v678_v2 }
 0x171   :  { %v704_v5 = vmul.f32 1.442695, %v695_v3  ;;  %v706_v6 = vmul.f32 1.442695, %v696_v4  ;;  %v37_v3 = vld [vmem:[%s1772_s2 + $0x38] sm:$0xff] }
 0x172   :  { %v681_v7 = vpop.xlane.xlu1 %680  ;;  %v684_v8 = vpop.xlane.xlu0 %683 }
 0x173   :  { %1494 = vpow2.f32 %v704_v5  ;;  %v697_v9 = vsub.f32 %v665_v42, %v681_v7  ;;  %v698_v10 = vsub.f32 %v666_v47, %v684_v8 }
 0x174   :  { %1496 = vpow2.f32 %v706_v6 }
 0x175   :  { %v708_v11 = vmul.f32 1.442695, %v697_v9  ;;  %v710_v12 = vmul.f32 1.442695, %v698_v10 }
 0x176   :  { %v687_v13 = vpop.xlane.xlu1 %686  ;;  %v690_v14 = vpop.xlane.xlu0 %689 }
 0x177   :  { %1498 = vpow2.f32 %v708_v11  ;;  %v699_v15 = vsub.f32 %v667_v51, %v687_v13  ;;  %v700_v16 = vsub.f32 %v668_v57, %v690_v14 }
 0x178   :  { %1500 = vpow2.f32 %v710_v12 }
 0x179   :  { %v1493_v17 = vpop.eup %1492  ;;  %v712_v18 = vmul.f32 1.442695, %v699_v15  ;;  %v714_v19 = vmul.f32 1.442695, %v700_v16 }
 0x17a   :  { %v693_v20 = vpop.xlane.xlu1 %692  ;;  %v718_v21 = vsel %vm38_vm0, %v1493_v17, 0.0 }
 0x17b   :  { %1502 = vpow2.f32 %v712_v18  ;;  %v701_v22 = vsub.f32 %v669_v59, %v693_v20  ;;  %719 = vadd.xlane.f32.xlu0 %v718_v21 }
 0x17c   :  { %1504 = vpow2.f32 %v714_v19 }
 0x17d   :  { %v1495_v23 = vpop.eup %1494  ;;  %v716_v24 = vmul.f32 1.442695, %v701_v22 }
 0x17e   :  { %v1497_v25 = vpop.eup %1496  ;;  %v721_v26 = vsel %vm38_vm0, %v1495_v23, 0.0 }
 0x17f   :  { %1506 = vpow2.f32 %v716_v24  ;;  %722 = vadd.xlane.f32.xlu1 %v721_v26  ;;  %v724_v27 = vsel %vm38_vm0, %v1497_v25, 0.0 }
 0x180   :  { %725 = vadd.xlane.f32.xlu0 %v724_v27 }
 0x181   :  { %v1499_v28 = vpop.eup %1498 }
 0x182   :  { %v1501_v29 = vpop.eup %1500  ;;  %v727_v30 = vsel %vm38_vm0, %v1499_v28, 0.0 }
 0x183   :  { %728 = vadd.xlane.f32.xlu1 %v727_v30  ;;  %v730_v31 = vsel %vm38_vm0, %v1501_v29, 0.0 }
 0x184   :  { %731 = vadd.xlane.f32.xlu0 %v730_v31 }
 0x185   :  { %v1673_v32 = vpop.eup %1502 }
 0x186   :  { %v1675_v33 = vpop.eup %1504  ;;  %v733_v34 = vsel %vm38_vm0, %v1673_v32, 0.0 }
 0x187   :  { %734 = vadd.xlane.f32.xlu1 %v733_v34  ;;  %v736_v35 = vsel %vm38_vm0, %v1675_v33, 0.0 }
 0x188   :  { %737 = vadd.xlane.f32.xlu0 %v736_v35 }
 0x189   :  { %v1681_v36 = vpop.eup %1506 }
 0x18a   :  { %v739_v37 = vsel %vm38_vm0, %v1681_v36, 0.0 }
 0x18b   :  { %740 = vadd.xlane.f32.xlu1 %v739_v37 }
 0x208   :  { %v720_v40 = vpop.xlane.xlu0 %719 }
 0x209   :  { %1508 = vrcp.f32 %v720_v40 }
 0x20c   :  { %v723_v41 = vpop.xlane.xlu1 %722 }
 0x20d   :  { %1510 = vrcp.f32 %v723_v41  ;;  %v726_v42 = vpop.xlane.xlu0 %725 }
 0x20e   :  { %1512 = vrcp.f32 %v726_v42 }
 0x210   :  { %v729_v43 = vpop.xlane.xlu1 %728 }
 0x211   :  { %1514 = vrcp.f32 %v729_v43  ;;  %v732_v44 = vpop.xlane.xlu0 %731 }
 0x212   :  { %1516 = vrcp.f32 %v732_v44 }
 0x213   :  { %v1509_v45 = vpop.eup %1508 }
 0x214   :  { %v750_v46 = vmul.f32 %v1509_v45, %v1493_v17  ;;  %v735_v47 = vpop.xlane.xlu1 %734 }
 0x215   :  { %1518 = vrcp.f32 %v735_v47  ;;  %v738_v49 = vpop.xlane.xlu0 %737 }
 0x216   :  { %1520 = vrcp.f32 %v738_v49  ;;  %1453 = vmatmul.mubr.msk.f32.vlgmr.msra.gmra.mrb[8].mxu0 %vm38_vm0, %v750_v46 }
 0x217   :  { %v1511_v50 = vpop.eup %1510  ;;  %1461 = vmatpush3.msra.mxu0 %v32_v48  ;;  %1462 = vmatprep.mubr.msk.f32.mxu0 %vm1525_vm1, %v1524_v0 }
 0x218   :  { %v1513_v51 = vpop.eup %1512  ;;  %v751_v52 = vmul.f32 %v1511_v50, %v1495_v23  ;;  %v741_v53 = vpop.xlane.xlu1 %740  ;;  %1470 = vmatprep.subr.mxu0 %v1524_v0 }
 0x219   :  { %v752_v55 = vmul.f32 %v1513_v51, %v1497_v25  ;;  %1522 = vrcp.f32 %v741_v53 }
 0x21a   :  { %1458 = vmatmul.mubr.msk.f32.vlgmr.msra.gmra.mrb[8].mxu1 %vm38_vm0, %v751_v52 }
 0x21b   :  { %v1515_v57 = vpop.eup %1514  ;;  %1463 = vmatmul.mubr.msk.f32.vlgmr.msra.gmra.mrb[10].mxu0 %vm38_vm0, %v752_v55  ;;  %1466 = vmatpush3.msra.mxu1 %v33_v54 }
 0x21c   :  { %v1517_v58 = vpop.eup %1516  ;;  %v753_v59 = vmul.f32 %v1515_v57, %v1499_v28  ;;  %1467 = vmatprep.mubr.msk.f32.mxu1 %vm1525_vm1, %v1524_v0  ;;  %1471 = vmatpush3.msra.mxu0 %v34_v56 }
 0x21d   :  { %v754_v61 = vmul.f32 %v1517_v58, %v1501_v29  ;;  %1472 = vmatprep.mubr.msk.f32.mxu0 %vm1525_vm1, %v1524_v0  ;;  %1475 = vmatprep.subr.mxu1 %v1524_v0 }
 0x21e   :  { %1468 = vmatmul.mubr.msk.f32.vlgmr.msra.gmra.mrb[10].mxu1 %vm38_vm0, %v753_v59  ;;  %1480 = vmatprep.subr.mxu0 %v1524_v0 }
 0x21f   :  { %v1519_v63 = vpop.eup %1518  ;;  %1473 = vmatmul.mubr.msk.f32.vlgmr.msra.gmra.mrb[12].mxu0 %vm38_vm0, %v754_v61  ;;  %1476 = vmatpush3.msra.mxu1 %v35_v60 }
 0x220   :  { %v1521_v1 = vpop.eup %1520  ;;  %v755_v2 = vmul.f32 %v1519_v63, %v1673_v32  ;;  %1477 = vmatprep.mubr.msk.f32.mxu1 %vm1525_vm1, %v1524_v0  ;;  %1481 = vmatpush3.msra.mxu0 %v36_v62 }
 0x221   :  { %v756_v4 = vmul.f32 %v1521_v1, %v1675_v33  ;;  %1482 = vmatprep.mubr.msk.f32.mxu0 %vm1525_vm1, %v1524_v0  ;;  %1485 = vmatprep.subr.mxu1 %v1524_v0 }
 0x222   :  { %1478 = vmatmul.mubr.msk.f32.vlgmr.msra.gmra.mrb[12].mxu1 %vm38_vm0, %v755_v2 }
 0x223   :  { %v1523_v5 = vpop.eup %1522  ;;  %1483 = vmatmul.mubr.msk.f32.vlgmr.msra.gmra.mrb[14].mxu0 %vm38_vm0, %v756_v4  ;;  %1486 = vmatpush3.msra.mxu1 %v37_v3 }
 0x224   :  { %v757_v6 = vmul.f32 %v1523_v5, %v1681_v36  ;;  %1487 = vmatprep.mubr.msk.f32.mxu1 %vm1525_vm1, %v1524_v0 }
 0x226   :  { %1488 = vmatmul.mubr.msk.f32.vlgmr.msra.gmra.mrb[14].mxu1 %vm38_vm0, %v757_v6 }
 0x2e9   :  { %v827_v7 = vpop.f32.mrb[8].mxu0 }
 0x2ea   :  { %1342 = vst.msk [vmem:[%s1773_s3] sm:$0xff] %vm38_vm0, %v827_v7  ;;  %v1454_v8 = vpop.f32.mrb[9].mxu0 }
 0x2ed   :  { %v900_v9 = vpop.f32.mrb[8].mxu1 }
 0x2ee   :  { %1343 = vst.msk [vmem:[%s1773_s3 + $0x8] sm:$0xff] %vm38_vm0, %v900_v9  ;;  %v973_v10 = vpop.f32.mrb[10].mxu0  ;;  %v1459_v11 = vpop.f32.mrb[9].mxu1 }
 0x2ef   :  { %1344 = vst.msk [vmem:[%s1773_s3 + $0x10] sm:$0xff] %vm38_vm0, %v973_v10  ;;  %v1464_v0 = vpop.f32.mrb[11].mxu0 }
 0x2f1   :  { %v1046_v12 = vpop.f32.mrb[10].mxu1 }
 0x2f2   :  { %1345 = vst.msk [vmem:[%s1773_s3 + $0x18] sm:$0xff] %vm38_vm0, %v1046_v12  ;;  %v1119_v13 = vpop.f32.mrb[12].mxu0  ;;  %v1469_v14 = vpop.f32.mrb[11].mxu1 }
 0x2f3   :  { %1346 = vst.msk [vmem:[%s1773_s3 + $0x20] sm:$0xff] %vm38_vm0, %v1119_v13  ;;  %v1474_v15 = vpop.f32.mrb[13].mxu0 }
 0x2f5   :  { %v1192_v16 = vpop.f32.mrb[12].mxu1 }
 0x2f6   :  { %1347 = vst.msk [vmem:[%s1773_s3 + $0x28] sm:$0xff] %vm38_vm0, %v1192_v16  ;;  %v1265_v17 = vpop.f32.mrb[14].mxu0  ;;  %v1479_v18 = vpop.f32.mrb[13].mxu1 }
 0x2f7   :  { %1348 = vst.msk [vmem:[%s1773_s3 + $0x30] sm:$0xff] %vm38_vm0, %v1265_v17  ;;  %v1484_v19 = vpop.f32.mrb[15].mxu0 }
 0x2f9   :  { %v1338_v20 = vpop.f32.mrb[14].mxu1 }
 0x2fa   :  { %1349 = vst.msk [vmem:[%s1773_s3 + $0x38] sm:$0xff] %vm38_vm0, %v1338_v20  ;;  %v1489_v21 = vpop.f32.mrb[15].mxu1 }

// kernel: informer_forward.39
= control target key start
LH: loop header
LB: loop body
LE: loop exit
PB: predicated region body
PF: predicated region fallthrough
CT: control target
= control target key end

     0   :  { %vm24_vm0 = vcmask 261120   ;;  %vm160_vm1 = vcmask 31744   ;;  %s270_s0 = inlined_call_operand.vmem [shape: f32[16,32], index: 0, kind: input, shape index: {}]   ;;  %s271_s3 = inlined_call_operand.vmem [shape: f32[32,4], index: 3, kind: input, shape index: {}]   ;;  %s272_s1 = inlined_call_operand.vmem [shape: f32[1,32], index: 1, kind: input, shape index: {}]   ;;  %s273_s2 = inlined_call_operand.vmem [shape: f32[1,32], index: 2, kind: input, shape index: {}]   ;;  %s274_s4 = inlined_call_operand.vmem [shape: f32[1,4], index: 4, kind: input, shape index: {}]   ;;  %s275_s5 = inlined_call_operand.vmem [shape: f32[16,4], index: 5, kind: output, shape index: {}]  }
   0x1   :  { %v20_v0 = vld [vmem:[%s270_s0] sm:$0xff]  ;;  %v21_v1 = vld [vmem:[%s270_s0 + $0x8] sm:$0xff]  ;;  %v70_v16 = vld [vmem:[%s271_s3 + $0x10] sm:$0xff] }
   0x2   :  { %v25_v2 = vsel %vm24_vm0, %v20_v0, 0.0  ;;  %v28_v3 = vsel %vm24_vm0, %v21_v1, 0.0  ;;  %v68_v14 = vld [vmem:[%s271_s3] sm:$0xff]  ;;  %v69_v15 = vld [vmem:[%s271_s3 + $0x8] sm:$0xff]  ;;  %v71_v18 = vld [vmem:[%s271_s3 + $0x18] sm:$0xff] }
   0x3   :  { %26 = vadd.xlane.f32.xlu0 %v25_v2  ;;  %v189_v17 = vpack.c.bf16 %v69_v15, %v68_v14  ;;  %v193_v19 = vpack.c.bf16 %v71_v18, %v70_v16  ;;  %v167_v27 = vld [vmem:[%s272_s1] ss:$0 sm:$0xff] }
   0x4   :  { %v168_v29 = vld [vmem:[%s273_s2] ss:$0 sm:$0xff] }
   0x5   :  { %190 = vmatprep.subr.bf16.mxu0 %v189_v17  ;;  %v169_v36 = vld [vmem:[%s274_s4] ss:$0 sm:$0xff] }
   0x6   :  { %192 = vmatpush3.bf16.msra.mxu0 %v189_v17 }
   0x7   :  { %29 = vadd.xlane.f32.xlu0 %v28_v3  ;;  %194 = vmatprep.subr.bf16.mxu0 %v193_v19 }
   0xa   :  { %196 = vmatpush3.bf16.msra.mxu0 %v193_v19 }
  0x90   :  { %v27_v4 = vpop.xlane.xlu0 %26 }
  0x91   :  { %v32_v5 = vmul.f32 0.03125, %v27_v4 }
  0x93   :  { %v34_v6 = vsub.f32 %v20_v0, %v32_v5 }
  0x94   :  { %v30_v7 = vpop.xlane.xlu0 %29 }
  0x95   :  { %v33_v8 = vmul.f32 0.03125, %v30_v7  ;;  %v36_v9 = vmul.f32 %v34_v6, %v34_v6 }
  0x97   :  { %v35_v10 = vsub.f32 %v21_v1, %v33_v8  ;;  %v38_v11 = vsel %vm24_vm0, %v36_v9, 0.0 }
  0x98   :  { %39 = vadd.xlane.f32.xlu1 %v38_v11 }
  0x99   :  { %v37_v12 = vmul.f32 %v35_v10, %v35_v10 }
  0x9b   :  { %v41_v13 = vsel %vm24_vm0, %v37_v12, 0.0 }
  0x9c   :  { %42 = vadd.xlane.f32.xlu1 %v41_v13 }
 0x125   :  { %v40_v20 = vpop.xlane.xlu1 %39 }
 0x126   :  { %v44_v21 = vmul.f32 0.03125, %v40_v20 }
 0x128   :  { %v46_v22 = vadd.f32 1e-05, %v44_v21 }
 0x129   :  { %v43_v23 = vpop.xlane.xlu1 %42 }
 0x12a   :  { %197 = vrsqrt.f32 %v46_v22  ;;  %v45_v24 = vmul.f32 0.03125, %v43_v23 }
 0x12c   :  { %v47_v25 = vadd.f32 1e-05, %v45_v24 }
 0x12e   :  { %199 = vrsqrt.f32 %v47_v25 }
 0x134   :  { %v198_v26 = vpop.eup %197 }
 0x135   :  { %v50_v28 = vmul.f32 %v198_v26, %v34_v6 }
 0x137   :  { %v58_v30 = vmul.f32 %v167_v27, %v50_v28 }
 0x138   :  { %v200_v31 = vpop.eup %199 }
 0x139   :  { %v51_v32 = vmul.f32 %v200_v31, %v35_v10  ;;  %v66_v33 = vadd.f32 %v168_v29, %v58_v30 }
 0x13b   :  { %v59_v34 = vmul.f32 %v167_v27, %v51_v32  ;;  %186 = vmatprep.mubr.msk.f32.mxu0 %vm24_vm0, %v66_v33 }
 0x13d   :  { %v67_v35 = vadd.f32 %v168_v29, %v59_v34 }
 0x13f   :  { %187 = vmatmul.mubr.msk.f32.vlgmr.msra.gmra.mrb[0].mxu0 %vm24_vm0, %v67_v35 }
 0x212   :  { %v188_v37 = vpop.f32.mrb[0].mxu0 }
 0x213   :  { %v157_v38 = vadd.f32 %v188_v37, %v169_v36  ;;  %v151_v39 = vpop.f32.mrb[1].mxu0 }
 0x214   :  { %v152_v40 = vadd.f32 %v169_v36, %v151_v39 }
 0x215   :  { %162 = vst.msk [vmem:[%s275_s5 + $0x8] sm:$0xff] %vm160_vm1, %v157_v38 }
 0x216   :  { %161 = vst.msk [vmem:[%s275_s5] sm:$0xff] %vm160_vm1, %v152_v40 }

// kernel: informer_forward.36
= control target key start
LH: loop header
LB: loop body
LE: loop exit
PB: predicated region body
PF: predicated region fallthrough
CT: control target
= control target key end

     0   :  { %vm38_vm0 = vcmask 64512   ;;  %v1543_v0 = vmov 0.0   ;;  %vm1544_vm1 = vmmov 0   ;;  %vm655_vm2 = vcmask 39936   ;;  %s1777_s1 = inlined_call_operand.vmem [shape: f32[8,5,8], index: 1, kind: input, shape index: {}]   ;;  %s1778_s0 = inlined_call_operand.vmem [shape: f32[8,8,8], index: 0, kind: input, shape index: {}]   ;;  %s1779_s2 = inlined_call_operand.vmem [shape: f32[8,5,8], index: 2, kind: input, shape index: {}]   ;;  %s1780_s3 = inlined_call_operand.vmem [shape: f32[8,8,8], index: 3, kind: output, shape index: {}]  }
   0x1   :  { %1429 = vmatprep.subr.mxu0 %v1543_v0  ;;  %v22_v1 = vld [vmem:[%s1777_s1] sm:$0x1f]  ;;  %1431 = vmatprep.mubr.msk.f32.mxu0 %vm1544_vm1, %v1543_v0  ;;  %v23_v2 = vld [vmem:[%s1777_s1 + $0x8] sm:$0x1f]  ;;  %v24_v4 = vld [vmem:[%s1777_s1 + $0x10] sm:$0x1f] }
   0x2   :  { %1430 = vmatpush3.xpose.msk.msra.mxu0 %vm38_vm0, %v22_v1  ;;  %v14_v3 = vld [vmem:[%s1778_s0] sm:$0xff]  ;;  %1434 = vmatprep.subr.mxu1 %v1543_v0  ;;  %v15_v5 = vld [vmem:[%s1778_s0 + $0x8] sm:$0xff]  ;;  %v25_v6 = vld [vmem:[%s1777_s1 + $0x18] sm:$0x1f]  ;;  %vm747_vm3 = vcmask 1044480  }
   0x3   :  { %1439 = vmatprep.subr.mxu0 %v1543_v0  ;;  %1435 = vmatpush3.xpose.msk.msra.mxu1 %vm38_vm0, %v23_v2  ;;  %v16_v7 = vld [vmem:[%s1778_s0 + $0x10] sm:$0xff]  ;;  %v26_v8 = vld [vmem:[%s1777_s1 + $0x20] sm:$0x1f]  ;;  %v17_v9 = vld [vmem:[%s1778_s0 + $0x18] sm:$0xff] }
   0x4   :  { %1436 = vmatprep.mubr.msk.f32.mxu1 %vm1544_vm1, %v1543_v0  ;;  %1444 = vmatprep.subr.mxu1 %v1543_v0  ;;  %v27_v10 = vld [vmem:[%s1777_s1 + $0x28] sm:$0x1f]  ;;  %v18_v11 = vld [vmem:[%s1778_s0 + $0x20] sm:$0xff]  ;;  %v28_v12 = vld [vmem:[%s1777_s1 + $0x30] sm:$0x1f] }
   0x5   :  { %1432 = vmatmul.mubr.msk.f32.vlgmr.msra.gmra.mrb[0].mxu0 %vm38_vm0, %v14_v3  ;;  %v19_v13 = vld [vmem:[%s1778_s0 + $0x28] sm:$0xff]  ;;  %v29_v14 = vld [vmem:[%s1777_s1 + $0x38] sm:$0x1f]  ;;  %v20_v15 = vld [vmem:[%s1778_s0 + $0x30] sm:$0xff] }
   0x6   :  { %1440 = vmatpush3.xpose.msk.msra.mxu0 %vm38_vm0, %v24_v4  ;;  %1441 = vmatprep.mubr.msk.f32.mxu0 %vm1544_vm1, %v1543_v0  ;;  %v21_v16 = vld [vmem:[%s1778_s0 + $0x38] sm:$0xff] }
   0x7   :  { %1437 = vmatmul.mubr.msk.f32.vlgmr.msra.gmra.mrb[0].mxu1 %vm38_vm0, %v15_v5  ;;  %1449 = vmatprep.subr.mxu0 %v1543_v0 }
   0x8   :  { %1445 = vmatpush3.xpose.msk.msra.mxu1 %vm38_vm0, %v25_v6  ;;  %1446 = vmatprep.mubr.msk.f32.mxu1 %vm1544_vm1, %v1543_v0 }
   0x9   :  { %1442 = vmatmul.mubr.msk.f32.vlgmr.msra.gmra.mrb[2].mxu0 %vm38_vm0, %v16_v7  ;;  %1454 = vmatprep.subr.mxu1 %v1543_v0 }
   0xa   :  { %1450 = vmatpush3.xpose.msk.msra.mxu0 %vm38_vm0, %v26_v8  ;;  %1451 = vmatprep.mubr.msk.f32.mxu0 %vm1544_vm1, %v1543_v0 }
   0xb   :  { %1447 = vmatmul.mubr.msk.f32.vlgmr.msra.gmra.mrb[2].mxu1 %vm38_vm0, %v17_v9  ;;  %1459 = vmatprep.subr.mxu0 %v1543_v0 }
   0xc   :  { %1455 = vmatpush3.xpose.msk.msra.mxu1 %vm38_vm0, %v27_v10  ;;  %1456 = vmatprep.mubr.msk.f32.mxu1 %vm1544_vm1, %v1543_v0 }
   0xd   :  { %1452 = vmatmul.mubr.msk.f32.vlgmr.msra.gmra.mrb[4].mxu0 %vm38_vm0, %v18_v11  ;;  %1464 = vmatprep.subr.mxu1 %v1543_v0 }
   0xe   :  { %1460 = vmatpush3.xpose.msk.msra.mxu0 %vm38_vm0, %v28_v12  ;;  %1461 = vmatprep.mubr.msk.f32.mxu0 %vm1544_vm1, %v1543_v0 }
   0xf   :  { %1457 = vmatmul.mubr.msk.f32.vlgmr.msra.gmra.mrb[4].mxu1 %vm38_vm0, %v19_v13  ;;  %1469 = vmatprep.subr.mxu0 %v1543_v0 }
  0x10   :  { %1465 = vmatpush3.xpose.msk.msra.mxu1 %vm38_vm0, %v29_v14  ;;  %1466 = vmatprep.mubr.msk.f32.mxu1 %vm1544_vm1, %v1543_v0 }
  0x11   :  { %1462 = vmatmul.mubr.msk.f32.vlgmr.msra.gmra.mrb[6].mxu0 %vm38_vm0, %v20_v15  ;;  %1474 = vmatprep.subr.mxu1 %v1543_v0 }
  0x12   :  { %1471 = vmatprep.mubr.msk.f32.mxu0 %vm1544_vm1, %v1543_v0 }
  0x13   :  { %1467 = vmatmul.mubr.msk.f32.vlgmr.msra.gmra.mrb[6].mxu1 %vm38_vm0, %v21_v16 }
  0x14   :  { %1476 = vmatprep.mubr.msk.f32.mxu1 %vm1544_vm1, %v1543_v0 }
  0xd8   :  { %v111_v17 = vpop.f32.mrb[0].mxu0 }
  0xd9   :  { %v647_v18 = vmul.f32 0.35355338, %v111_v17  ;;  %v1433_v19 = vpop.f32.mrb[1].mxu0 }
  0xda   :  { %v187_v20 = vpop.f32.mrb[0].mxu1 }
  0xdb   :  { %v648_v21 = vmul.f32 0.35355338, %v187_v20  ;;  %v656_v22 = vsel %vm655_vm2, %v647_v18, -inf  ;;  %v1438_v23 = vpop.f32.mrb[1].mxu1 }
  0xdc   :  { %657 = vmax.xlane.f32.xlu0 %v656_v22  ;;  %v263_v24 = vpop.f32.mrb[2].mxu0 }
  0xdd   :  { %v649_v25 = vmul.f32 0.35355338, %v263_v24  ;;  %v1443_v26 = vpop.f32.mrb[3].mxu0  ;;  %v659_v27 = vsel %vm655_vm2, %v648_v21, -inf }
  0xde   :  { %v339_v28 = vpop.f32.mrb[2].mxu1  ;;  %v30_v26 = vld [vmem:[%s1779_s2] sm:$0x1f] }
  0xdf   :  { %v650_v29 = vmul.f32 0.35355338, %v339_v28  ;;  %v662_v30 = vsel %vm655_vm2, %v649_v25, -inf  ;;  %v1448_v31 = vpop.f32.mrb[3].mxu1  ;;  %1470 = vmatpush3.msk.msra.mxu0 %vm747_vm3, %v30_v26 }
  0xe0   :  { %660 = vmax.xlane.f32.xlu0 %v659_v27  ;;  %663 = vmax.xlane.f32.xlu1 %v662_v30  ;;  %v415_v32 = vpop.f32.mrb[4].mxu0  ;;  %v31_v27 = vld [vmem:[%s1779_s2 + $0x8] sm:$0x1f] }
  0xe1   :  { %v651_v33 = vmul.f32 0.35355338, %v415_v32  ;;  %v1453_v34 = vpop.f32.mrb[5].mxu0  ;;  %v665_v35 = vsel %vm655_vm2, %v650_v29, -inf  ;;  %1479 = vmatprep.subr.mxu0 %v1543_v0  ;;  %1475 = vmatpush3.msk.msra.mxu1 %vm747_vm3, %v31_v27 }
  0xe2   :  { %v491_v36 = vpop.f32.mrb[4].mxu1  ;;  %1484 = vmatprep.subr.mxu1 %v1543_v0 }
  0xe3   :  { %v652_v37 = vmul.f32 0.35355338, %v491_v36  ;;  %v668_v38 = vsel %vm655_vm2, %v651_v33, -inf  ;;  %v1458_v39 = vpop.f32.mrb[5].mxu1  ;;  %v32_v36 = vld [vmem:[%s1779_s2 + $0x10] sm:$0x1f] }
  0xe4   :  { %666 = vmax.xlane.f32.xlu1 %v665_v35  ;;  %669 = vmax.xlane.f32.xlu0 %v668_v38  ;;  %v567_v40 = vpop.f32.mrb[6].mxu0 }
  0xe5   :  { %v653_v41 = vmul.f32 0.35355338, %v567_v40  ;;  %v671_v42 = vsel %vm655_vm2, %v652_v37, -inf  ;;  %v1463_v43 = vpop.f32.mrb[7].mxu0 }
  0xe6   :  { %v643_v44 = vpop.f32.mrb[6].mxu1 }
  0xe7   :  { %v654_v45 = vmul.f32 0.35355338, %v643_v44  ;;  %v674_v46 = vsel %vm655_vm2, %v653_v41, -inf  ;;  %v1468_v47 = vpop.f32.mrb[7].mxu1  ;;  %v34_v44 = vld [vmem:[%s1779_s2 + $0x20] sm:$0x1f] }
  0xe8   :  { %672 = vmax.xlane.f32.xlu1 %v671_v42  ;;  %675 = vmax.xlane.f32.xlu0 %v674_v46  ;;  %v33_v42 = vld [vmem:[%s1779_s2 + $0x18] sm:$0x1f] }
  0xe9   :  { %v677_v48 = vsel %vm655_vm2, %v654_v45, -inf }
  0xec   :  { %678 = vmax.xlane.f32.xlu1 %v677_v48  ;;  %v35_v48 = vld [vmem:[%s1779_s2 + $0x28] sm:$0x1f] }
 0x169   :  { %v658_v49 = vpop.xlane.xlu0 %657 }
 0x16a   :  { %v680_v50 = vsub.f32 %v647_v18, %v658_v49 }
 0x16c   :  { %v688_v51 = vmul.f32 1.442695, %v680_v50  ;;  %v36_v50 = vld [vmem:[%s1779_s2 + $0x30] sm:$0x1f] }
 0x16d   :  { %v661_v52 = vpop.xlane.xlu0 %660  ;;  %v664_v53 = vpop.xlane.xlu1 %663 }
 0x16e   :  { %1511 = vpow2.f32 %v688_v51  ;;  %v681_v54 = vsub.f32 %v648_v21, %v661_v52  ;;  %v682_v55 = vsub.f32 %v649_v25, %v664_v53 }
 0x170   :  { %v690_v56 = vmul.f32 1.442695, %v681_v54  ;;  %v692_v57 = vmul.f32 1.442695, %v682_v55  ;;  %v37_v54 = vld [vmem:[%s1779_s2 + $0x38] sm:$0x1f] }
 0x171   :  { %v667_v58 = vpop.xlane.xlu1 %666  ;;  %v670_v59 = vpop.xlane.xlu0 %669 }
 0x172   :  { %1513 = vpow2.f32 %v690_v56  ;;  %v683_v60 = vsub.f32 %v650_v29, %v667_v58  ;;  %v684_v61 = vsub.f32 %v651_v33, %v670_v59 }
 0x173   :  { %1515 = vpow2.f32 %v692_v57 }
 0x174   :  { %v694_v62 = vmul.f32 1.442695, %v683_v60  ;;  %v696_v63 = vmul.f32 1.442695, %v684_v61 }
 0x175   :  { %v673_v1 = vpop.xlane.xlu1 %672  ;;  %v676_v2 = vpop.xlane.xlu0 %675 }
 0x176   :  { %1517 = vpow2.f32 %v694_v62  ;;  %v685_v3 = vsub.f32 %v652_v37, %v673_v1  ;;  %v686_v4 = vsub.f32 %v653_v41, %v676_v2 }
 0x177   :  { %1519 = vpow2.f32 %v696_v63 }
 0x178   :  { %v1512_v5 = vpop.eup %1511  ;;  %v698_v6 = vmul.f32 1.442695, %v685_v3  ;;  %v700_v7 = vmul.f32 1.442695, %v686_v4 }
 0x179   :  { %v679_v8 = vpop.xlane.xlu1 %678  ;;  %v704_v9 = vsel %vm655_vm2, %v1512_v5, 0.0 }
 0x17a   :  { %1521 = vpow2.f32 %v698_v6  ;;  %v687_v10 = vsub.f32 %v654_v45, %v679_v8  ;;  %705 = vadd.xlane.f32.xlu0 %v704_v9 }
 0x17b   :  { %1523 = vpow2.f32 %v700_v7 }
 0x17c   :  { %v1514_v11 = vpop.eup %1513  ;;  %v702_v12 = vmul.f32 1.442695, %v687_v10 }
 0x17d   :  { %v1516_v13 = vpop.eup %1515  ;;  %v707_v14 = vsel %vm655_vm2, %v1514_v11, 0.0 }
 0x17e   :  { %1525 = vpow2.f32 %v702_v12  ;;  %708 = vadd.xlane.f32.xlu1 %v707_v14  ;;  %v710_v15 = vsel %vm655_vm2, %v1516_v13, 0.0 }
 0x17f   :  { %711 = vadd.xlane.f32.xlu0 %v710_v15 }
 0x180   :  { %v1518_v16 = vpop.eup %1517 }
 0x181   :  { %v1520_v17 = vpop.eup %1519  ;;  %v713_v18 = vsel %vm655_vm2, %v1518_v16, 0.0 }
 0x182   :  { %714 = vadd.xlane.f32.xlu1 %v713_v18  ;;  %v716_v19 = vsel %vm655_vm2, %v1520_v17, 0.0 }
 0x183   :  { %717 = vadd.xlane.f32.xlu0 %v716_v19 }
 0x184   :  { %v1672_v20 = vpop.eup %1521 }
 0x185   :  { %v1674_v21 = vpop.eup %1523  ;;  %v719_v22 = vsel %vm655_vm2, %v1672_v20, 0.0 }
 0x186   :  { %720 = vadd.xlane.f32.xlu1 %v719_v22  ;;  %v722_v23 = vsel %vm655_vm2, %v1674_v21, 0.0 }
 0x187   :  { %723 = vadd.xlane.f32.xlu0 %v722_v23 }
 0x188   :  { %v1680_v24 = vpop.eup %1525 }
 0x189   :  { %v725_v25 = vsel %vm655_vm2, %v1680_v24, 0.0 }
 0x18a   :  { %726 = vadd.xlane.f32.xlu1 %v725_v25 }
 0x207   :  { %v706_v28 = vpop.xlane.xlu0 %705 }
 0x208   :  { %1527 = vrcp.f32 %v706_v28 }
 0x20b   :  { %v709_v29 = vpop.xlane.xlu1 %708 }
 0x20c   :  { %1529 = vrcp.f32 %v709_v29  ;;  %v712_v30 = vpop.xlane.xlu0 %711 }
 0x20d   :  { %1531 = vrcp.f32 %v712_v30 }
 0x20f   :  { %v715_v31 = vpop.xlane.xlu1 %714 }
 0x210   :  { %1533 = vrcp.f32 %v715_v31  ;;  %v718_v32 = vpop.xlane.xlu0 %717 }
 0x211   :  { %1535 = vrcp.f32 %v718_v32 }
 0x212   :  { %v1528_v33 = vpop.eup %1527 }
 0x213   :  { %v736_v34 = vmul.f32 %v1528_v33, %v1512_v5  ;;  %v721_v35 = vpop.xlane.xlu1 %720 }
 0x214   :  { %1537 = vrcp.f32 %v721_v35  ;;  %v724_v37 = vpop.xlane.xlu0 %723 }
 0x215   :  { %1539 = vrcp.f32 %v724_v37  ;;  %1472 = vmatmul.mubr.msk.f32.vlgmr.msra.gmra.mrb[8].mxu0 %vm655_vm2, %v736_v34 }
 0x216   :  { %v1530_v38 = vpop.eup %1529  ;;  %1480 = vmatpush3.msk.msra.mxu0 %vm747_vm3, %v32_v36  ;;  %1481 = vmatprep.mubr.msk.f32.mxu0 %vm1544_vm1, %v1543_v0 }
 0x217   :  { %v1532_v39 = vpop.eup %1531  ;;  %v737_v40 = vmul.f32 %v1530_v38, %v1514_v11  ;;  %v727_v41 = vpop.xlane.xlu1 %726  ;;  %1489 = vmatprep.subr.mxu0 %v1543_v0 }
 0x218   :  { %v738_v43 = vmul.f32 %v1532_v39, %v1516_v13  ;;  %1541 = vrcp.f32 %v727_v41 }
 0x219   :  { %1477 = vmatmul.mubr.msk.f32.vlgmr.msra.gmra.mrb[8].mxu1 %vm655_vm2, %v737_v40 }
 0x21a   :  { %v1534_v45 = vpop.eup %1533  ;;  %1482 = vmatmul.mubr.msk.f32.vlgmr.msra.gmra.mrb[10].mxu0 %vm655_vm2, %v738_v43  ;;  %1485 = vmatpush3.msk.msra.mxu1 %vm747_vm3, %v33_v42 }
 0x21b   :  { %v1536_v46 = vpop.eup %1535  ;;  %v739_v47 = vmul.f32 %v1534_v45, %v1518_v16  ;;  %1486 = vmatprep.mubr.msk.f32.mxu1 %vm1544_vm1, %v1543_v0  ;;  %1490 = vmatpush3.msk.msra.mxu0 %vm747_vm3, %v34_v44 }
 0x21c   :  { %v740_v49 = vmul.f32 %v1536_v46, %v1520_v17  ;;  %1491 = vmatprep.mubr.msk.f32.mxu0 %vm1544_vm1, %v1543_v0  ;;  %1494 = vmatprep.subr.mxu1 %v1543_v0 }
 0x21d   :  { %1487 = vmatmul.mubr.msk.f32.vlgmr.msra.gmra.mrb[10].mxu1 %vm655_vm2, %v739_v47  ;;  %1499 = vmatprep.subr.mxu0 %v1543_v0 }
 0x21e   :  { %v1538_v51 = vpop.eup %1537  ;;  %1492 = vmatmul.mubr.msk.f32.vlgmr.msra.gmra.mrb[12].mxu0 %vm655_vm2, %v740_v49  ;;  %1495 = vmatpush3.msk.msra.mxu1 %vm747_vm3, %v35_v48 }
 0x21f   :  { %v1540_v52 = vpop.eup %1539  ;;  %v741_v53 = vmul.f32 %v1538_v51, %v1672_v20  ;;  %1496 = vmatprep.mubr.msk.f32.mxu1 %vm1544_vm1, %v1543_v0  ;;  %1500 = vmatpush3.msk.msra.mxu0 %vm747_vm3, %v36_v50 }
 0x220   :  { %v742_v55 = vmul.f32 %v1540_v52, %v1674_v21  ;;  %1501 = vmatprep.mubr.msk.f32.mxu0 %vm1544_vm1, %v1543_v0  ;;  %1504 = vmatprep.subr.mxu1 %v1543_v0 }
 0x221   :  { %1497 = vmatmul.mubr.msk.f32.vlgmr.msra.gmra.mrb[12].mxu1 %vm655_vm2, %v741_v53 }
 0x222   :  { %v1542_v56 = vpop.eup %1541  ;;  %1502 = vmatmul.mubr.msk.f32.vlgmr.msra.gmra.mrb[14].mxu0 %vm655_vm2, %v742_v55  ;;  %1505 = vmatpush3.msk.msra.mxu1 %vm747_vm3, %v37_v54 }
 0x223   :  { %v743_v57 = vmul.f32 %v1542_v56, %v1680_v24  ;;  %1506 = vmatprep.mubr.msk.f32.mxu1 %vm1544_vm1, %v1543_v0 }
 0x225   :  { %1507 = vmatmul.mubr.msk.f32.vlgmr.msra.gmra.mrb[14].mxu1 %vm655_vm2, %v743_v57 }
 0x2e8   :  { %v817_v58 = vpop.f32.mrb[8].mxu0 }
 0x2e9   :  { %1353 = vst.msk [vmem:[%s1780_s3] sm:$0xff] %vm38_vm0, %v817_v58  ;;  %v1473_v59 = vpop.f32.mrb[9].mxu0 }
 0x2ec   :  { %v893_v60 = vpop.f32.mrb[8].mxu1 }
 0x2ed   :  { %1354 = vst.msk [vmem:[%s1780_s3 + $0x8] sm:$0xff] %vm38_vm0, %v893_v60  ;;  %v969_v61 = vpop.f32.mrb[10].mxu0  ;;  %v1478_v62 = vpop.f32.mrb[9].mxu1 }
 0x2ee   :  { %1355 = vst.msk [vmem:[%s1780_s3 + $0x10] sm:$0xff] %vm38_vm0, %v969_v61  ;;  %v1483_v0 = vpop.f32.mrb[11].mxu0 }
 0x2f0   :  { %v1045_v63 = vpop.f32.mrb[10].mxu1 }
 0x2f1   :  { %1356 = vst.msk [vmem:[%s1780_s3 + $0x18] sm:$0xff] %vm38_vm0, %v1045_v63  ;;  %v1121_v1 = vpop.f32.mrb[12].mxu0  ;;  %v1488_v2 = vpop.f32.mrb[11].mxu1 }
 0x2f2   :  { %1357 = vst.msk [vmem:[%s1780_s3 + $0x20] sm:$0xff] %vm38_vm0, %v1121_v1  ;;  %v1493_v3 = vpop.f32.mrb[13].mxu0 }
 0x2f4   :  { %v1197_v4 = vpop.f32.mrb[12].mxu1 }
 0x2f5   :  { %1358 = vst.msk [vmem:[%s1780_s3 + $0x28] sm:$0xff] %vm38_vm0, %v1197_v4  ;;  %v1273_v5 = vpop.f32.mrb[14].mxu0  ;;  %v1498_v6 = vpop.f32.mrb[13].mxu1 }
 0x2f6   :  { %1359 = vst.msk [vmem:[%s1780_s3 + $0x30] sm:$0xff] %vm38_vm0, %v1273_v5  ;;  %v1503_v7 = vpop.f32.mrb[15].mxu0 }
 0x2f8   :  { %v1349_v8 = vpop.f32.mrb[14].mxu1 }
 0x2f9   :  { %1360 = vst.msk [vmem:[%s1780_s3 + $0x38] sm:$0xff] %vm38_vm0, %v1349_v8  ;;  %v1508_v9 = vpop.f32.mrb[15].mxu1 }

</bundles_post_ra>
